<compile_context>
chip_gen: v5e
topology: v5e:2x2
jax: 0.10.0
libtpu: 0.0.40
codegen_flags: <defaults>
</compile_context>

<pallas_src>
import math

import jax
import jax.numpy as jnp
from jax.experimental import pallas as pl
from jax.experimental.pallas import tpu as pltpu

# ---------------- configuration (small synthetic shapes) ----------------
HIST_LEN = 4
BATCH = 2
TEXT_LEN = 8
SRC_LEN = 2                 # ui_len (user + first item slot), PETER convention
TGT_LEN = TEXT_LEN
PAD_IDX = 0
NUSER, NITEM, NTOKEN = 10, 40, 50
EMSIZE, NHEAD, NHID, NLAYERS = 32, 2, 64, 2
HEAD_DIM = EMSIZE // NHEAD
UI_LEN = 2
TOTAL_LEN = UI_LEN + HIST_LEN + TEXT_LEN   # user + (HIST_LEN+1) items + text = 14
LN_EPS = 1e-5

_VMEM = pl.BlockSpec(memory_space=pltpu.MemorySpace.VMEM)   # full-array VMEM block


# ---------------------------- fused Pallas kernel ----------------------------
def _sequer_fused_kernel(src_ref, mask_ref,
                         wqkv_ref, bqkv_ref, wo_ref, bo_ref,
                         ln1w_ref, ln1b_ref, w1_ref, b1_ref, w2_ref, b2_ref,
                         ln2w_ref, ln2b_ref,
                         h2t_w_ref, h2t_b_ref, item_w_ref,
                         rec_w1_ref, rec_b1_ref, rec_w2_ref, rec_b2_ref,
                         lsm_ref, item_ref, rating_ref, attn_ref):
    """Whole SEQUER hot path.

    src:  (B, L, E)   f32  embedded + scaled + pos-encoded input (batch-first)
    mask: (B, L, L)   f32  additive attention mask (allowed + key padding)
    outputs:
      lsm_ref    (B*L, NTOKEN)        log_softmax(hidden @ h2t) for every position
      item_ref   (B*L, NITEM)         log_softmax(hidden @ item_emb.T) for every position
      rating_ref (B*L, 1)             recommender MLP for every position
      attn_ref   (NLAYERS, B, L, L)   head-averaged attention weights
    """
    B, L, E = src_ref.shape
    N = B * L
    scale = 1.0 / math.sqrt(HEAD_DIM)

    x = src_ref[...].reshape(N, E)          # running hidden state, (B*L, E)
    mask = mask_ref[...]                    # (B, L, L)

    for li in range(NLAYERS):               # static unroll over layers (tiny)
        # ---- self-attention: one fused QKV matmul ----
        qkv = (jnp.dot(x, wqkv_ref[li], preferred_element_type=jnp.float32)
               + bqkv_ref[li])              # (N, 3E)
        qkv = qkv.reshape(B, L, 3 * E)

        p_sum = jnp.zeros((B, L, L), jnp.float32)
        head_ctx = []
        for h in range(NHEAD):              # static unroll over heads (tiny)
            lo = h * HEAD_DIM
            qh = qkv[:, :, lo:lo + HEAD_DIM]                      # (B, L, hd)
            kh = qkv[:, :, E + lo:E + lo + HEAD_DIM]
            vh = qkv[:, :, 2 * E + lo:2 * E + lo + HEAD_DIM]
            s = jnp.einsum('bld,bmd->blm', qh, kh,
                           preferred_element_type=jnp.float32) * scale + mask
            s = s - jnp.max(s, axis=-1, keepdims=True)
            p = jnp.exp(s)
            p = p * pl.reciprocal(jnp.sum(p, axis=-1, keepdims=True), approx=True)
            p_sum = p_sum + p
            head_ctx.append(jnp.einsum('blm,bmd->bld', p, vh,
                                       preferred_element_type=jnp.float32))
        attn_ref[li] = p_sum * (1.0 / NHEAD)                      # head-averaged weights

        ctx = jnp.concatenate(head_ctx, axis=-1).reshape(N, E)    # (N, E) head-concat
        attn_out = (jnp.dot(ctx, wo_ref[li], preferred_element_type=jnp.float32)
                    + bo_ref[li])

        # ---- residual + layer norm 1 ----
        h1 = x + attn_out
        mu = jnp.mean(h1, axis=-1, keepdims=True)
        var = jnp.mean((h1 - mu) ** 2, axis=-1, keepdims=True)
        h1n = (h1 - mu) * jax.lax.rsqrt(var + LN_EPS) * ln1w_ref[li] + ln1b_ref[li]

        # ---- feed-forward (ReLU) + residual + layer norm 2 ----
        ff = jnp.maximum(
            jnp.dot(h1n, w1_ref[li], preferred_element_type=jnp.float32) + b1_ref[li],
            0.0)
        ff = jnp.dot(ff, w2_ref[li], preferred_element_type=jnp.float32) + b2_ref[li]
        h2 = h1n + ff
        mu2 = jnp.mean(h2, axis=-1, keepdims=True)
        var2 = jnp.mean((h2 - mu2) ** 2, axis=-1, keepdims=True)
        x = (h2 - mu2) * jax.lax.rsqrt(var2 + LN_EPS) * ln2w_ref[li] + ln2b_ref[li]

    hidden = x                                                     # (N, E)

    # ---- word / context head: single matmul over ALL positions, log_softmax ----
    tok = (jnp.dot(hidden, h2t_w_ref[...], preferred_element_type=jnp.float32)
           + h2t_b_ref[...])                                       # (N, NTOKEN)
    z = tok - jnp.max(tok, axis=-1, keepdims=True)
    lsm_ref[...] = z - jnp.log(jnp.sum(jnp.exp(z), axis=-1, keepdims=True))

    # ---- next-item head: hidden @ item_embeddings.T, log_softmax ----
    itl = jnp.dot(hidden, item_w_ref[...], preferred_element_type=jnp.float32)
    zi = itl - jnp.max(itl, axis=-1, keepdims=True)
    item_ref[...] = zi - jnp.log(jnp.sum(jnp.exp(zi), axis=-1, keepdims=True))

    # ---- rating head: Linear(E,E) -> sigmoid -> Linear(E,1) ----
    rh = jax.nn.sigmoid(
        jnp.dot(hidden, rec_w1_ref[...], preferred_element_type=jnp.float32)
        + rec_b1_ref[...])
    rating_ref[...] = (jnp.dot(rh, rec_w2_ref[...], preferred_element_type=jnp.float32)
                       + rec_b2_ref[...])


# ------------------------------- model glue -------------------------------
def sinusoidal_pe(max_len, d_model):
    pos = jnp.arange(max_len, dtype=jnp.float32)[:, None]
    div = jnp.exp(jnp.arange(0, d_model, 2, dtype=jnp.float32)
                  * (-math.log(10000.0) / d_model))
    pe = jnp.zeros((max_len, d_model), jnp.float32)
    pe = pe.at[:, 0::2].set(jnp.sin(pos * div))
    pe = pe.at[:, 1::2].set(jnp.cos(pos * div))
    return pe


def generate_sequer_mask(total_len, prefix_len):
    # TODO(synk): generate_sequer_mask source not provided; using a PETER-style mask:
    # full attention within the [user + item-history] prefix, causal elsewhere.
    causal = jnp.tril(jnp.ones((total_len, total_len), bool))
    prefix = jnp.zeros((total_len, total_len), bool).at[:prefix_len, :prefix_len].set(True)
    return causal | prefix


def init_params(key):
    keys = iter(jax.random.split(key, 64))

    def u(shape, r=0.1):
        return jax.random.uniform(next(keys), shape, jnp.float32, -r, r)

    params = {}
    params['user_emb'] = u((NUSER, EMSIZE))
    params['item_emb'] = u((NITEM, EMSIZE)).at[PAD_IDX].set(0.0)   # padding_idx row = 0
    params['word_emb'] = u((NTOKEN, EMSIZE)).at[PAD_IDX].set(0.0)
    params['h2t_w'] = u((EMSIZE, NTOKEN))                          # hidden2token (W.T layout)
    params['h2t_b'] = jnp.zeros((1, NTOKEN), jnp.float32)
    params['rec_w1'] = u((EMSIZE, EMSIZE))                         # recommender MLP
    params['rec_b1'] = jnp.zeros((1, EMSIZE), jnp.float32)
    params['rec_w2'] = u((EMSIZE, 1))
    params['rec_b2'] = jnp.zeros((1, 1), jnp.float32)
    # encoder layers, stacked along a leading NLAYERS axis, QKV fused into one weight
    params['enc'] = dict(
        wqkv=u((NLAYERS, EMSIZE, 3 * EMSIZE)),      # [q heads | k heads | v heads]
        bqkv=u((NLAYERS, 1, 3 * EMSIZE)),
        wo=u((NLAYERS, EMSIZE, EMSIZE)),            # head-concatenated output proj
        bo=u((NLAYERS, 1, EMSIZE)),
        ln1_w=jnp.ones((NLAYERS, 1, EMSIZE), jnp.float32),
        ln1_b=jnp.zeros((NLAYERS, 1, EMSIZE), jnp.float32),
        w1=u((NLAYERS, EMSIZE, NHID)),
        b1=u((NLAYERS, 1, NHID)),
        w2=u((NLAYERS, NHID, EMSIZE)),
        b2=u((NLAYERS, 1, EMSIZE)),
        ln2_w=jnp.ones((NLAYERS, 1, EMSIZE), jnp.float32),
        ln2_b=jnp.zeros((NLAYERS, 1, EMSIZE), jnp.float32),
    )
    return params


def sequer_forward(params, user, item, text):
    """user: (B,) int32, item: (B, HIST_LEN+1) int32, text: (T, B) int32."""
    B = user.shape[0]
    T = text.shape[0]
    L = UI_LEN + HIST_LEN + T

    # embeddings + scaling + positional encoding (glue), built batch-first directly
    u_src = jnp.take(params['user_emb'], user, axis=0)[:, None, :]          # (B, 1, E)
    i_src = jnp.take(params['item_emb'], item, axis=0)                      # (B, HIST+1, E)
    w_src = jnp.take(params['word_emb'], text.T, axis=0)                    # (B, T, E)
    src = jnp.concatenate([u_src, i_src, w_src], axis=1) * math.sqrt(EMSIZE)
    src = src + sinusoidal_pe(L, EMSIZE)[None, :, :]                        # (B, L, E)

    # attention mask + key padding mask -> additive (B, L, L)
    allowed = generate_sequer_mask(L, UI_LEN + HIST_LEN)
    left = jnp.zeros((B, UI_LEN + HIST_LEN), bool)
    left = left.at[:, 1:HIST_LEN + 2].set(item == PAD_IDX)
    right = text.T == PAD_IDX
    key_pad = jnp.concatenate([left, right], axis=1)                        # (B, L)
    neg = jnp.float32(-1e9)
    add_mask = (jnp.where(allowed[None, :, :], 0.0, neg)
                + jnp.where(key_pad[:, None, :], neg, 0.0)).astype(jnp.float32)

    enc = params['enc']
    args = (src, add_mask,
            enc['wqkv'], enc['bqkv'], enc['wo'], enc['bo'],
            enc['ln1_w'], enc['ln1_b'], enc['w1'], enc['b1'], enc['w2'], enc['b2'],
            enc['ln2_w'], enc['ln2_b'],
            params['h2t_w'], params['h2t_b'], params['item_emb'].T,
            params['rec_w1'], params['rec_b1'], params['rec_w2'], params['rec_b2'])

    lsm, item_lsm, rating, attns = pl.pallas_call(
        _sequer_fused_kernel,
        out_shape=(
            jax.ShapeDtypeStruct((B * L, NTOKEN), jnp.float32),
            jax.ShapeDtypeStruct((B * L, NITEM), jnp.float32),
            jax.ShapeDtypeStruct((B * L, 1), jnp.float32),
            jax.ShapeDtypeStruct((NLAYERS, B, L, L), jnp.float32),
        ),
        in_specs=[_VMEM] * len(args),
        out_specs=(_VMEM, _VMEM, _VMEM, _VMEM),
    )(*args)

    # slice prediction heads back to the reference (seq-first) convention
    lsm = lsm.reshape(B, L, NTOKEN)
    item_lsm = item_lsm.reshape(B, L, NITEM)
    rating = rating.reshape(B, L)

    log_context = lsm[:, 0, :]                                              # (B, NTOKEN)
    log_word = jnp.transpose(lsm[:, UI_LEN + HIST_LEN:, :], (1, 0, 2))      # (T, B, NTOKEN)
    log_item = jnp.transpose(item_lsm[:, 1:1 + HIST_LEN, :], (1, 0, 2))     # (HIST, B, NITEM)
    rating_out = rating[:, HIST_LEN + 1]                                    # (B,) seq_mode=0

    return {'rating': rating_out, 'context': log_context, 'item': log_item,
            'word': log_word, 'attns': attns}


if __name__ == "__main__":
    key = jax.random.PRNGKey(0)
    k_params, k_user, k_item, k_text = jax.random.split(key, 4)
    params = init_params(k_params)

    user = jax.random.randint(k_user, (BATCH,), 0, NUSER, dtype=jnp.int32)
    item = jax.random.randint(k_item, (BATCH, HIST_LEN + 1), 1, NITEM, dtype=jnp.int32)
    item = item.at[0, 0].set(PAD_IDX)           # exercise item key-padding mask
    text = jax.random.randint(k_text, (TEXT_LEN, BATCH), 1, NTOKEN, dtype=jnp.int32)
    text = text.at[-2:, 1].set(PAD_IDX)         # exercise text key-padding mask

    fwd = jax.jit(sequer_forward)
    out = fwd(params, user, item, text)
    out = jax.tree_util.tree_map(jax.block_until_ready, out)

    assert out['word'].shape == (TGT_LEN, BATCH, NTOKEN)
    assert out['context'].shape == (BATCH, NTOKEN)
    assert out['rating'].shape == (BATCH,)
    assert out['item'].shape == (HIST_LEN, BATCH, NITEM)
    assert out['attns'].shape == (NLAYERS, BATCH, TOTAL_LEN, TOTAL_LEN)
    print("KERNEL_OK")
</pallas_src>

<mosaic_0001>
module attributes {stable_mosaic.version = 11 : i64} {
  func.func @_sequer_fused_kernel(%arg0: memref<2x14x32xf32, #tpu.memory_space<vmem>>, %arg1: memref<2x14x14xf32, #tpu.memory_space<vmem>>, %arg2: memref<2x32x96xf32, #tpu.memory_space<vmem>>, %arg3: memref<2x1x96xf32, #tpu.memory_space<vmem>>, %arg4: memref<2x32x32xf32, #tpu.memory_space<vmem>>, %arg5: memref<2x1x32xf32, #tpu.memory_space<vmem>>, %arg6: memref<2x1x32xf32, #tpu.memory_space<vmem>>, %arg7: memref<2x1x32xf32, #tpu.memory_space<vmem>>, %arg8: memref<2x32x64xf32, #tpu.memory_space<vmem>>, %arg9: memref<2x1x64xf32, #tpu.memory_space<vmem>>, %arg10: memref<2x64x32xf32, #tpu.memory_space<vmem>>, %arg11: memref<2x1x32xf32, #tpu.memory_space<vmem>>, %arg12: memref<2x1x32xf32, #tpu.memory_space<vmem>>, %arg13: memref<2x1x32xf32, #tpu.memory_space<vmem>>, %arg14: memref<32x50xf32, #tpu.memory_space<vmem>>, %arg15: memref<1x50xf32, #tpu.memory_space<vmem>>, %arg16: memref<32x40xf32, #tpu.memory_space<vmem>>, %arg17: memref<32x32xf32, #tpu.memory_space<vmem>>, %arg18: memref<1x32xf32, #tpu.memory_space<vmem>>, %arg19: memref<32x1xf32, #tpu.memory_space<vmem>>, %arg20: memref<1x1xf32, #tpu.memory_space<vmem>>, %arg21: memref<28x50xf32, #tpu.memory_space<vmem>>, %arg22: memref<28x40xf32, #tpu.memory_space<vmem>>, %arg23: memref<28x1xf32, #tpu.memory_space<vmem>>, %arg24: memref<2x2x14x14xf32, #tpu.memory_space<vmem>>) attributes {dimension_semantics = [], scalar_prefetch = 0 : i64, scratch_operands = 0 : i64, tpu.core_type = #tpu.core_type<tc>} {
    %c0 = arith.constant 0 : index
    %c0_0 = arith.constant 0 : index
    %c0_1 = arith.constant 0 : index
    %0 = vector.load %arg0[%c0, %c0_0, %c0_1] : memref<2x14x32xf32, #tpu.memory_space<vmem>>, vector<2x14x32xf32>
    %1 = vector.shape_cast %0 : vector<2x14x32xf32> to vector<28x32xf32>
    %c0_2 = arith.constant 0 : index
    %c0_3 = arith.constant 0 : index
    %c0_4 = arith.constant 0 : index
    %2 = vector.load %arg1[%c0_2, %c0_3, %c0_4] : memref<2x14x14xf32, #tpu.memory_space<vmem>>, vector<2x14x14xf32>
    %c0_5 = arith.constant 0 : index
    %c0_6 = arith.constant 0 : index
    %c0_7 = arith.constant 0 : index
    %3 = vector.load %arg2[%c0_5, %c0_6, %c0_7] : memref<2x32x96xf32, #tpu.memory_space<vmem>>, vector<1x32x96xf32>
    %4 = vector.shape_cast %3 : vector<1x32x96xf32> to vector<32x96xf32>
    %cst = arith.constant dense<0.000000e+00> : vector<28x96xf32>
    %5 = tpu.matmul %1, %4, %cst {dimension_numbers = #tpu.dot_dimension_numbers<[1], [0], [0], [1], [0, 0, 1, 1], [], []>} : vector<28x32xf32>, vector<32x96xf32>, vector<28x96xf32> -> vector<28x96xf32>
    %c0_8 = arith.constant 0 : index
    %c0_9 = arith.constant 0 : index
    %c0_10 = arith.constant 0 : index
    %6 = vector.load %arg3[%c0_8, %c0_9, %c0_10] : memref<2x1x96xf32, #tpu.memory_space<vmem>>, vector<1x1x96xf32>
    %7 = vector.shape_cast %6 : vector<1x1x96xf32> to vector<1x96xf32>
    %8 = vector.broadcast %7 : vector<1x96xf32> to vector<28x96xf32>
    %9 = arith.addf %5, %8 : vector<28x96xf32>
    %10 = vector.shape_cast %9 : vector<28x96xf32> to vector<2x14x96xf32>
    %cst_11 = arith.constant 0.000000e+00 : f32
    %11 = vector.broadcast %cst_11 : f32 to vector<2x14x14xf32>
    %12 = vector.extract_strided_slice %10 {offsets = [0, 0, 0], sizes = [2, 14, 16], strides = [1, 1, 1]} : vector<2x14x96xf32> to vector<2x14x16xf32>
    %13 = vector.extract_strided_slice %10 {offsets = [0, 0, 32], sizes = [2, 14, 16], strides = [1, 1, 1]} : vector<2x14x96xf32> to vector<2x14x16xf32>
    %14 = vector.extract_strided_slice %10 {offsets = [0, 0, 64], sizes = [2, 14, 16], strides = [1, 1, 1]} : vector<2x14x96xf32> to vector<2x14x16xf32>
    "tpu.trace_start"() <{level = 10 : i32, message = "bld,bmd->blm"}> : () -> ()
    %cst_12 = arith.constant dense<0.000000e+00> : vector<2x14x14xf32>
    %15 = tpu.matmul %12, %13, %cst_12 {dimension_numbers = #tpu.dot_dimension_numbers<[2], [2], [1], [1], [0, 0, 0, 1, 1, 1], [0], [0]>} : vector<2x14x16xf32>, vector<2x14x16xf32>, vector<2x14x14xf32> -> vector<2x14x14xf32>
    "tpu.trace_stop"() : () -> ()
    %cst_13 = arith.constant 2.500000e-01 : f32
    %16 = vector.broadcast %cst_13 : f32 to vector<2x14x14xf32>
    %17 = arith.mulf %15, %16 : vector<2x14x14xf32>
    %18 = arith.addf %17, %2 : vector<2x14x14xf32>
    %cst_14 = arith.constant dense<0xFF800000> : vector<2x14xf32>
    %19 = vector.multi_reduction <maximumf>, %18, %cst_14 [2] : vector<2x14x14xf32> to vector<2x14xf32>
    %20 = vector.shape_cast %19 : vector<2x14xf32> to vector<2x14x1xf32>
    %21 = vector.broadcast %20 : vector<2x14x1xf32> to vector<2x14x14xf32>
    %22 = arith.subf %18, %21 : vector<2x14x14xf32>
    %23 = math.exp %22 : vector<2x14x14xf32>
    %cst_15 = arith.constant dense<0.000000e+00> : vector<2x14xf32>
    %24 = vector.multi_reduction <add>, %23, %cst_15 [2] : vector<2x14x14xf32> to vector<2x14xf32>
    %25 = vector.shape_cast %24 : vector<2x14xf32> to vector<2x14x1xf32>
    %26 = tpu.reciprocal %25 {approx = true} : vector<2x14x1xf32> -> vector<2x14x1xf32>
    %27 = vector.broadcast %26 : vector<2x14x1xf32> to vector<2x14x14xf32>
    %28 = arith.mulf %23, %27 : vector<2x14x14xf32>
    %29 = arith.addf %11, %28 : vector<2x14x14xf32>
    "tpu.trace_start"() <{level = 10 : i32, message = "blm,bmd->bld"}> : () -> ()
    %cst_16 = arith.constant dense<0.000000e+00> : vector<2x14x16xf32>
    %30 = tpu.matmul %28, %14, %cst_16 {dimension_numbers = #tpu.dot_dimension_numbers<[2], [1], [1], [2], [0, 0, 0, 1, 1, 2], [0], [0]>} : vector<2x14x14xf32>, vector<2x14x16xf32>, vector<2x14x16xf32> -> vector<2x14x16xf32>
    "tpu.trace_stop"() : () -> ()
    %31 = vector.extract_strided_slice %10 {offsets = [0, 0, 16], sizes = [2, 14, 16], strides = [1, 1, 1]} : vector<2x14x96xf32> to vector<2x14x16xf32>
    %32 = vector.extract_strided_slice %10 {offsets = [0, 0, 48], sizes = [2, 14, 16], strides = [1, 1, 1]} : vector<2x14x96xf32> to vector<2x14x16xf32>
    %33 = vector.extract_strided_slice %10 {offsets = [0, 0, 80], sizes = [2, 14, 16], strides = [1, 1, 1]} : vector<2x14x96xf32> to vector<2x14x16xf32>
    "tpu.trace_start"() <{level = 10 : i32, message = "bld,bmd->blm"}> : () -> ()
    %cst_17 = arith.constant dense<0.000000e+00> : vector<2x14x14xf32>
    %34 = tpu.matmul %31, %32, %cst_17 {dimension_numbers = #tpu.dot_dimension_numbers<[2], [2], [1], [1], [0, 0, 0, 1, 1, 1], [0], [0]>} : vector<2x14x16xf32>, vector<2x14x16xf32>, vector<2x14x14xf32> -> vector<2x14x14xf32>
    "tpu.trace_stop"() : () -> ()
    %cst_18 = arith.constant 2.500000e-01 : f32
    %35 = vector.broadcast %cst_18 : f32 to vector<2x14x14xf32>
    %36 = arith.mulf %34, %35 : vector<2x14x14xf32>
    %37 = arith.addf %36, %2 : vector<2x14x14xf32>
    %cst_19 = arith.constant dense<0xFF800000> : vector<2x14xf32>
    %38 = vector.multi_reduction <maximumf>, %37, %cst_19 [2] : vector<2x14x14xf32> to vector<2x14xf32>
    %39 = vector.shape_cast %38 : vector<2x14xf32> to vector<2x14x1xf32>
    %40 = vector.broadcast %39 : vector<2x14x1xf32> to vector<2x14x14xf32>
    %41 = arith.subf %37, %40 : vector<2x14x14xf32>
    %42 = math.exp %41 : vector<2x14x14xf32>
    %cst_20 = arith.constant dense<0.000000e+00> : vector<2x14xf32>
    %43 = vector.multi_reduction <add>, %42, %cst_20 [2] : vector<2x14x14xf32> to vector<2x14xf32>
    %44 = vector.shape_cast %43 : vector<2x14xf32> to vector<2x14x1xf32>
    %45 = tpu.reciprocal %44 {approx = true} : vector<2x14x1xf32> -> vector<2x14x1xf32>
    %46 = vector.broadcast %45 : vector<2x14x1xf32> to vector<2x14x14xf32>
    %47 = arith.mulf %42, %46 : vector<2x14x14xf32>
    %48 = arith.addf %29, %47 : vector<2x14x14xf32>
    "tpu.trace_start"() <{level = 10 : i32, message = "blm,bmd->bld"}> : () -> ()
    %cst_21 = arith.constant dense<0.000000e+00> : vector<2x14x16xf32>
    %49 = tpu.matmul %47, %33, %cst_21 {dimension_numbers = #tpu.dot_dimension_numbers<[2], [1], [1], [2], [0, 0, 0, 1, 1, 2], [0], [0]>} : vector<2x14x14xf32>, vector<2x14x16xf32>, vector<2x14x16xf32> -> vector<2x14x16xf32>
    "tpu.trace_stop"() : () -> ()
    %cst_22 = arith.constant 5.000000e-01 : f32
    %50 = vector.broadcast %cst_22 : f32 to vector<2x14x14xf32>
    %51 = arith.mulf %48, %50 : vector<2x14x14xf32>
    %c0_23 = arith.constant 0 : index
    %c0_24 = arith.constant 0 : index
    %c0_25 = arith.constant 0 : index
    %c0_26 = arith.constant 0 : index
    %52 = vector.load %arg24[%c0_23, %c0_24, %c0_25, %c0_26] : memref<2x2x14x14xf32, #tpu.memory_space<vmem>>, vector<1x2x14x14xf32>
    %53 = vector.shape_cast %52 : vector<1x2x14x14xf32> to vector<2x14x14xf32>
    %54 = vector.shape_cast %51 : vector<2x14x14xf32> to vector<1x2x14x14xf32>
    tpu.vector_store %arg24[%c0_23, %c0_24, %c0_25, %c0_26], %54 {strides = array<i32>} : memref<2x2x14x14xf32, #tpu.memory_space<vmem>>, vector<1x2x14x14xf32>,
    %55 = tpu.concatenate %30, %49 in 2 : vector<2x14x16xf32>, vector<2x14x16xf32> -> vector<2x14x32xf32>
    %56 = vector.shape_cast %55 : vector<2x14x32xf32> to vector<28x32xf32>
    %c0_27 = arith.constant 0 : index
    %c0_28 = arith.constant 0 : index
    %c0_29 = arith.constant 0 : index
    %57 = vector.load %arg4[%c0_27, %c0_28, %c0_29] : memref<2x32x32xf32, #tpu.memory_space<vmem>>, vector<1x32x32xf32>
    %58 = vector.shape_cast %57 : vector<1x32x32xf32> to vector<32x32xf32>
    %cst_30 = arith.constant dense<0.000000e+00> : vector<28x32xf32>
    %59 = tpu.matmul %56, %58, %cst_30 {dimension_numbers = #tpu.dot_dimension_numbers<[1], [0], [0], [1], [0, 0, 1, 1], [], []>} : vector<28x32xf32>, vector<32x32xf32>, vector<28x32xf32> -> vector<28x32xf32>
    %c0_31 = arith.constant 0 : index
    %c0_32 = arith.constant 0 : index
    %c0_33 = arith.constant 0 : index
    %60 = vector.load %arg5[%c0_31, %c0_32, %c0_33] : memref<2x1x32xf32, #tpu.memory_space<vmem>>, vector<1x1x32xf32>
    %61 = vector.shape_cast %60 : vector<1x1x32xf32> to vector<1x32xf32>
    %62 = vector.broadcast %61 : vector<1x32xf32> to vector<28x32xf32>
    %63 = arith.addf %59, %62 : vector<28x32xf32>
    %64 = arith.addf %1, %63 : vector<28x32xf32>
    %cst_34 = arith.constant dense<0.000000e+00> : vector<28xf32>
    %65 = vector.multi_reduction <add>, %64, %cst_34 [1] : vector<28x32xf32> to vector<28xf32>
    %66 = vector.shape_cast %65 : vector<28xf32> to vector<28x1xf32>
    %cst_35 = arith.constant 3.200000e+01 : f32
    %67 = vector.broadcast %cst_35 : f32 to vector<28x1xf32>
    %68 = arith.divf %66, %67 : vector<28x1xf32>
    %69 = vector.broadcast %68 : vector<28x1xf32> to vector<28x32xf32>
    %70 = arith.subf %64, %69 : vector<28x32xf32>
    %71 = arith.mulf %70, %70 : vector<28x32xf32>
    %cst_36 = arith.constant dense<0.000000e+00> : vector<28xf32>
    %72 = vector.multi_reduction <add>, %71, %cst_36 [1] : vector<28x32xf32> to vector<28xf32>
    %73 = vector.shape_cast %72 : vector<28xf32> to vector<28x1xf32>
    %cst_37 = arith.constant 3.200000e+01 : f32
    %74 = vector.broadcast %cst_37 : f32 to vector<28x1xf32>
    %75 = arith.divf %73, %74 : vector<28x1xf32>
    %76 = vector.broadcast %68 : vector<28x1xf32> to vector<28x32xf32>
    %77 = arith.subf %64, %76 : vector<28x32xf32>
    %cst_38 = arith.constant 9.99999974E-6 : f32
    %78 = vector.broadcast %cst_38 : f32 to vector<28x1xf32>
    %79 = arith.addf %75, %78 : vector<28x1xf32>
    %80 = math.rsqrt %79 : vector<28x1xf32>
    %81 = vector.broadcast %80 : vector<28x1xf32> to vector<28x32xf32>
    %82 = arith.mulf %77, %81 : vector<28x32xf32>
    %c0_39 = arith.constant 0 : index
    %c0_40 = arith.constant 0 : index
    %c0_41 = arith.constant 0 : index
    %83 = vector.load %arg6[%c0_39, %c0_40, %c0_41] : memref<2x1x32xf32, #tpu.memory_space<vmem>>, vector<1x1x32xf32>
    %84 = vector.shape_cast %83 : vector<1x1x32xf32> to vector<1x32xf32>
    %85 = vector.broadcast %84 : vector<1x32xf32> to vector<28x32xf32>
    %86 = arith.mulf %82, %85 : vector<28x32xf32>
    %c0_42 = arith.constant 0 : index
    %c0_43 = arith.constant 0 : index
    %c0_44 = arith.constant 0 : index
    %87 = vector.load %arg7[%c0_42, %c0_43, %c0_44] : memref<2x1x32xf32, #tpu.memory_space<vmem>>, vector<1x1x32xf32>
    %88 = vector.shape_cast %87 : vector<1x1x32xf32> to vector<1x32xf32>
    %89 = vector.broadcast %88 : vector<1x32xf32> to vector<28x32xf32>
    %90 = arith.addf %86, %89 : vector<28x32xf32>
    %c0_45 = arith.constant 0 : index
    %c0_46 = arith.constant 0 : index
    %c0_47 = arith.constant 0 : index
    %91 = vector.load %arg8[%c0_45, %c0_46, %c0_47] : memref<2x32x64xf32, #tpu.memory_space<vmem>>, vector<1x32x64xf32>
    %92 = vector.shape_cast %91 : vector<1x32x64xf32> to vector<32x64xf32>
    %cst_48 = arith.constant dense<0.000000e+00> : vector<28x64xf32>
    %93 = tpu.matmul %90, %92, %cst_48 {dimension_numbers = #tpu.dot_dimension_numbers<[1], [0], [0], [1], [0, 0, 1, 1], [], []>} : vector<28x32xf32>, vector<32x64xf32>, vector<28x64xf32> -> vector<28x64xf32>
    %c0_49 = arith.constant 0 : index
    %c0_50 = arith.constant 0 : index
    %c0_51 = arith.constant 0 : index
    %94 = vector.load %arg9[%c0_49, %c0_50, %c0_51] : memref<2x1x64xf32, #tpu.memory_space<vmem>>, vector<1x1x64xf32>
    %95 = vector.shape_cast %94 : vector<1x1x64xf32> to vector<1x64xf32>
    %96 = vector.broadcast %95 : vector<1x64xf32> to vector<28x64xf32>
    %97 = arith.addf %93, %96 : vector<28x64xf32>
    %cst_52 = arith.constant 0.000000e+00 : f32
    %98 = vector.broadcast %cst_52 : f32 to vector<28x64xf32>
    %99 = arith.maximumf %97, %98 : vector<28x64xf32>
    %c0_53 = arith.constant 0 : index
    %c0_54 = arith.constant 0 : index
    %c0_55 = arith.constant 0 : index
    %100 = vector.load %arg10[%c0_53, %c0_54, %c0_55] : memref<2x64x32xf32, #tpu.memory_space<vmem>>, vector<1x64x32xf32>
    %101 = vector.shape_cast %100 : vector<1x64x32xf32> to vector<64x32xf32>
    %cst_56 = arith.constant dense<0.000000e+00> : vector<28x32xf32>
    %102 = tpu.matmul %99, %101, %cst_56 {dimension_numbers = #tpu.dot_dimension_numbers<[1], [0], [0], [1], [0, 0, 1, 1], [], []>} : vector<28x64xf32>, vector<64x32xf32>, vector<28x32xf32> -> vector<28x32xf32>
    %c0_57 = arith.constant 0 : index
    %c0_58 = arith.constant 0 : index
    %c0_59 = arith.constant 0 : index
    %103 = vector.load %arg11[%c0_57, %c0_58, %c0_59] : memref<2x1x32xf32, #tpu.memory_space<vmem>>, vector<1x1x32xf32>
    %104 = vector.shape_cast %103 : vector<1x1x32xf32> to vector<1x32xf32>
    %105 = vector.broadcast %104 : vector<1x32xf32> to vector<28x32xf32>
    %106 = arith.addf %102, %105 : vector<28x32xf32>
    %107 = arith.addf %90, %106 : vector<28x32xf32>
    %cst_60 = arith.constant dense<0.000000e+00> : vector<28xf32>
    %108 = vector.multi_reduction <add>, %107, %cst_60 [1] : vector<28x32xf32> to vector<28xf32>
    %109 = vector.shape_cast %108 : vector<28xf32> to vector<28x1xf32>
    %cst_61 = arith.constant 3.200000e+01 : f32
    %110 = vector.broadcast %cst_61 : f32 to vector<28x1xf32>
    %111 = arith.divf %109, %110 : vector<28x1xf32>
    %112 = vector.broadcast %111 : vector<28x1xf32> to vector<28x32xf32>
    %113 = arith.subf %107, %112 : vector<28x32xf32>
    %114 = arith.mulf %113, %113 : vector<28x32xf32>
    %cst_62 = arith.constant dense<0.000000e+00> : vector<28xf32>
    %115 = vector.multi_reduction <add>, %114, %cst_62 [1] : vector<28x32xf32> to vector<28xf32>
    %116 = vector.shape_cast %115 : vector<28xf32> to vector<28x1xf32>
    %cst_63 = arith.constant 3.200000e+01 : f32
    %117 = vector.broadcast %cst_63 : f32 to vector<28x1xf32>
    %118 = arith.divf %116, %117 : vector<28x1xf32>
    %119 = vector.broadcast %111 : vector<28x1xf32> to vector<28x32xf32>
    %120 = arith.subf %107, %119 : vector<28x32xf32>
    %cst_64 = arith.constant 9.99999974E-6 : f32
    %121 = vector.broadcast %cst_64 : f32 to vector<28x1xf32>
    %122 = arith.addf %118, %121 : vector<28x1xf32>
    %123 = math.rsqrt %122 : vector<28x1xf32>
    %124 = vector.broadcast %123 : vector<28x1xf32> to vector<28x32xf32>
    %125 = arith.mulf %120, %124 : vector<28x32xf32>
    %c0_65 = arith.constant 0 : index
    %c0_66 = arith.constant 0 : index
    %c0_67 = arith.constant 0 : index
    %126 = vector.load %arg12[%c0_65, %c0_66, %c0_67] : memref<2x1x32xf32, #tpu.memory_space<vmem>>, vector<1x1x32xf32>
    %127 = vector.shape_cast %126 : vector<1x1x32xf32> to vector<1x32xf32>
    %128 = vector.broadcast %127 : vector<1x32xf32> to vector<28x32xf32>
    %129 = arith.mulf %125, %128 : vector<28x32xf32>
    %c0_68 = arith.constant 0 : index
    %c0_69 = arith.constant 0 : index
    %c0_70 = arith.constant 0 : index
    %130 = vector.load %arg13[%c0_68, %c0_69, %c0_70] : memref<2x1x32xf32, #tpu.memory_space<vmem>>, vector<1x1x32xf32>
    %131 = vector.shape_cast %130 : vector<1x1x32xf32> to vector<1x32xf32>
    %132 = vector.broadcast %131 : vector<1x32xf32> to vector<28x32xf32>
    %133 = arith.addf %129, %132 : vector<28x32xf32>
    %c1 = arith.constant 1 : index
    %c0_71 = arith.constant 0 : index
    %c0_72 = arith.constant 0 : index
    %134 = vector.load %arg2[%c1, %c0_71, %c0_72] : memref<2x32x96xf32, #tpu.memory_space<vmem>>, vector<1x32x96xf32>
    %135 = vector.shape_cast %134 : vector<1x32x96xf32> to vector<32x96xf32>
    %cst_73 = arith.constant dense<0.000000e+00> : vector<28x96xf32>
    %136 = tpu.matmul %133, %135, %cst_73 {dimension_numbers = #tpu.dot_dimension_numbers<[1], [0], [0], [1], [0, 0, 1, 1], [], []>} : vector<28x32xf32>, vector<32x96xf32>, vector<28x96xf32> -> vector<28x96xf32>
    %c1_74 = arith.constant 1 : index
    %c0_75 = arith.constant 0 : index
    %c0_76 = arith.constant 0 : index
    %137 = vector.load %arg3[%c1_74, %c0_75, %c0_76] : memref<2x1x96xf32, #tpu.memory_space<vmem>>, vector<1x1x96xf32>
    %138 = vector.shape_cast %137 : vector<1x1x96xf32> to vector<1x96xf32>
    %139 = vector.broadcast %138 : vector<1x96xf32> to vector<28x96xf32>
    %140 = arith.addf %136, %139 : vector<28x96xf32>
    %141 = vector.shape_cast %140 : vector<28x96xf32> to vector<2x14x96xf32>
    %cst_77 = arith.constant 0.000000e+00 : f32
    %142 = vector.broadcast %cst_77 : f32 to vector<2x14x14xf32>
    %143 = vector.extract_strided_slice %141 {offsets = [0, 0, 0], sizes = [2, 14, 16], strides = [1, 1, 1]} : vector<2x14x96xf32> to vector<2x14x16xf32>
    %144 = vector.extract_strided_slice %141 {offsets = [0, 0, 32], sizes = [2, 14, 16], strides = [1, 1, 1]} : vector<2x14x96xf32> to vector<2x14x16xf32>
    %145 = vector.extract_strided_slice %141 {offsets = [0, 0, 64], sizes = [2, 14, 16], strides = [1, 1, 1]} : vector<2x14x96xf32> to vector<2x14x16xf32>
    "tpu.trace_start"() <{level = 10 : i32, message = "bld,bmd->blm"}> : () -> ()
    %cst_78 = arith.constant dense<0.000000e+00> : vector<2x14x14xf32>
    %146 = tpu.matmul %143, %144, %cst_78 {dimension_numbers = #tpu.dot_dimension_numbers<[2], [2], [1], [1], [0, 0, 0, 1, 1, 1], [0], [0]>} : vector<2x14x16xf32>, vector<2x14x16xf32>, vector<2x14x14xf32> -> vector<2x14x14xf32>
    "tpu.trace_stop"() : () -> ()
    %cst_79 = arith.constant 2.500000e-01 : f32
    %147 = vector.broadcast %cst_79 : f32 to vector<2x14x14xf32>
    %148 = arith.mulf %146, %147 : vector<2x14x14xf32>
    %149 = arith.addf %148, %2 : vector<2x14x14xf32>
    %cst_80 = arith.constant dense<0xFF800000> : vector<2x14xf32>
    %150 = vector.multi_reduction <maximumf>, %149, %cst_80 [2] : vector<2x14x14xf32> to vector<2x14xf32>
    %151 = vector.shape_cast %150 : vector<2x14xf32> to vector<2x14x1xf32>
    %152 = vector.broadcast %151 : vector<2x14x1xf32> to vector<2x14x14xf32>
    %153 = arith.subf %149, %152 : vector<2x14x14xf32>
    %154 = math.exp %153 : vector<2x14x14xf32>
    %cst_81 = arith.constant dense<0.000000e+00> : vector<2x14xf32>
    %155 = vector.multi_reduction <add>, %154, %cst_81 [2] : vector<2x14x14xf32> to vector<2x14xf32>
    %156 = vector.shape_cast %155 : vector<2x14xf32> to vector<2x14x1xf32>
    %157 = tpu.reciprocal %156 {approx = true} : vector<2x14x1xf32> -> vector<2x14x1xf32>
    %158 = vector.broadcast %157 : vector<2x14x1xf32> to vector<2x14x14xf32>
    %159 = arith.mulf %154, %158 : vector<2x14x14xf32>
    %160 = arith.addf %142, %159 : vector<2x14x14xf32>
    "tpu.trace_start"() <{level = 10 : i32, message = "blm,bmd->bld"}> : () -> ()
    %cst_82 = arith.constant dense<0.000000e+00> : vector<2x14x16xf32>
    %161 = tpu.matmul %159, %145, %cst_82 {dimension_numbers = #tpu.dot_dimension_numbers<[2], [1], [1], [2], [0, 0, 0, 1, 1, 2], [0], [0]>} : vector<2x14x14xf32>, vector<2x14x16xf32>, vector<2x14x16xf32> -> vector<2x14x16xf32>
    "tpu.trace_stop"() : () -> ()
    %162 = vector.extract_strided_slice %141 {offsets = [0, 0, 16], sizes = [2, 14, 16], strides = [1, 1, 1]} : vector<2x14x96xf32> to vector<2x14x16xf32>
    %163 = vector.extract_strided_slice %141 {offsets = [0, 0, 48], sizes = [2, 14, 16], strides = [1, 1, 1]} : vector<2x14x96xf32> to vector<2x14x16xf32>
    %164 = vector.extract_strided_slice %141 {offsets = [0, 0, 80], sizes = [2, 14, 16], strides = [1, 1, 1]} : vector<2x14x96xf32> to vector<2x14x16xf32>
    "tpu.trace_start"() <{level = 10 : i32, message = "bld,bmd->blm"}> : () -> ()
    %cst_83 = arith.constant dense<0.000000e+00> : vector<2x14x14xf32>
    %165 = tpu.matmul %162, %163, %cst_83 {dimension_numbers = #tpu.dot_dimension_numbers<[2], [2], [1], [1], [0, 0, 0, 1, 1, 1], [0], [0]>} : vector<2x14x16xf32>, vector<2x14x16xf32>, vector<2x14x14xf32> -> vector<2x14x14xf32>
    "tpu.trace_stop"() : () -> ()
    %cst_84 = arith.constant 2.500000e-01 : f32
    %166 = vector.broadcast %cst_84 : f32 to vector<2x14x14xf32>
    %167 = arith.mulf %165, %166 : vector<2x14x14xf32>
    %168 = arith.addf %167, %2 : vector<2x14x14xf32>
    %cst_85 = arith.constant dense<0xFF800000> : vector<2x14xf32>
    %169 = vector.multi_reduction <maximumf>, %168, %cst_85 [2] : vector<2x14x14xf32> to vector<2x14xf32>
    %170 = vector.shape_cast %169 : vector<2x14xf32> to vector<2x14x1xf32>
    %171 = vector.broadcast %170 : vector<2x14x1xf32> to vector<2x14x14xf32>
    %172 = arith.subf %168, %171 : vector<2x14x14xf32>
    %173 = math.exp %172 : vector<2x14x14xf32>
    %cst_86 = arith.constant dense<0.000000e+00> : vector<2x14xf32>
    %174 = vector.multi_reduction <add>, %173, %cst_86 [2] : vector<2x14x14xf32> to vector<2x14xf32>
    %175 = vector.shape_cast %174 : vector<2x14xf32> to vector<2x14x1xf32>
    %176 = tpu.reciprocal %175 {approx = true} : vector<2x14x1xf32> -> vector<2x14x1xf32>
    %177 = vector.broadcast %176 : vector<2x14x1xf32> to vector<2x14x14xf32>
    %178 = arith.mulf %173, %177 : vector<2x14x14xf32>
    %179 = arith.addf %160, %178 : vector<2x14x14xf32>
    "tpu.trace_start"() <{level = 10 : i32, message = "blm,bmd->bld"}> : () -> ()
    %cst_87 = arith.constant dense<0.000000e+00> : vector<2x14x16xf32>
    %180 = tpu.matmul %178, %164, %cst_87 {dimension_numbers = #tpu.dot_dimension_numbers<[2], [1], [1], [2], [0, 0, 0, 1, 1, 2], [0], [0]>} : vector<2x14x14xf32>, vector<2x14x16xf32>, vector<2x14x16xf32> -> vector<2x14x16xf32>
    "tpu.trace_stop"() : () -> ()
    %cst_88 = arith.constant 5.000000e-01 : f32
    %181 = vector.broadcast %cst_88 : f32 to vector<2x14x14xf32>
    %182 = arith.mulf %179, %181 : vector<2x14x14xf32>
    %c1_89 = arith.constant 1 : index
    %c0_90 = arith.constant 0 : index
    %c0_91 = arith.constant 0 : index
    %c0_92 = arith.constant 0 : index
    %183 = vector.load %arg24[%c1_89, %c0_90, %c0_91, %c0_92] : memref<2x2x14x14xf32, #tpu.memory_space<vmem>>, vector<1x2x14x14xf32>
    %184 = vector.shape_cast %183 : vector<1x2x14x14xf32> to vector<2x14x14xf32>
    %185 = vector.shape_cast %182 : vector<2x14x14xf32> to vector<1x2x14x14xf32>
    tpu.vector_store %arg24[%c1_89, %c0_90, %c0_91, %c0_92], %185 {strides = array<i32>} : memref<2x2x14x14xf32, #tpu.memory_space<vmem>>, vector<1x2x14x14xf32>,
    %186 = tpu.concatenate %161, %180 in 2 : vector<2x14x16xf32>, vector<2x14x16xf32> -> vector<2x14x32xf32>
    %187 = vector.shape_cast %186 : vector<2x14x32xf32> to vector<28x32xf32>
    %c1_93 = arith.constant 1 : index
    %c0_94 = arith.constant 0 : index
    %c0_95 = arith.constant 0 : index
    %188 = vector.load %arg4[%c1_93, %c0_94, %c0_95] : memref<2x32x32xf32, #tpu.memory_space<vmem>>, vector<1x32x32xf32>
    %189 = vector.shape_cast %188 : vector<1x32x32xf32> to vector<32x32xf32>
    %cst_96 = arith.constant dense<0.000000e+00> : vector<28x32xf32>
    %190 = tpu.matmul %187, %189, %cst_96 {dimension_numbers = #tpu.dot_dimension_numbers<[1], [0], [0], [1], [0, 0, 1, 1], [], []>} : vector<28x32xf32>, vector<32x32xf32>, vector<28x32xf32> -> vector<28x32xf32>
    %c1_97 = arith.constant 1 : index
    %c0_98 = arith.constant 0 : index
    %c0_99 = arith.constant 0 : index
    %191 = vector.load %arg5[%c1_97, %c0_98, %c0_99] : memref<2x1x32xf32, #tpu.memory_space<vmem>>, vector<1x1x32xf32>
    %192 = vector.shape_cast %191 : vector<1x1x32xf32> to vector<1x32xf32>
    %193 = vector.broadcast %192 : vector<1x32xf32> to vector<28x32xf32>
    %194 = arith.addf %190, %193 : vector<28x32xf32>
    %195 = arith.addf %133, %194 : vector<28x32xf32>
    %cst_100 = arith.constant dense<0.000000e+00> : vector<28xf32>
    %196 = vector.multi_reduction <add>, %195, %cst_100 [1] : vector<28x32xf32> to vector<28xf32>
    %197 = vector.shape_cast %196 : vector<28xf32> to vector<28x1xf32>
    %cst_101 = arith.constant 3.200000e+01 : f32
    %198 = vector.broadcast %cst_101 : f32 to vector<28x1xf32>
    %199 = arith.divf %197, %198 : vector<28x1xf32>
    %200 = vector.broadcast %199 : vector<28x1xf32> to vector<28x32xf32>
    %201 = arith.subf %195, %200 : vector<28x32xf32>
    %202 = arith.mulf %201, %201 : vector<28x32xf32>
    %cst_102 = arith.constant dense<0.000000e+00> : vector<28xf32>
    %203 = vector.multi_reduction <add>, %202, %cst_102 [1] : vector<28x32xf32> to vector<28xf32>
    %204 = vector.shape_cast %203 : vector<28xf32> to vector<28x1xf32>
    %cst_103 = arith.constant 3.200000e+01 : f32
    %205 = vector.broadcast %cst_103 : f32 to vector<28x1xf32>
    %206 = arith.divf %204, %205 : vector<28x1xf32>
    %207 = vector.broadcast %199 : vector<28x1xf32> to vector<28x32xf32>
    %208 = arith.subf %195, %207 : vector<28x32xf32>
    %cst_104 = arith.constant 9.99999974E-6 : f32
    %209 = vector.broadcast %cst_104 : f32 to vector<28x1xf32>
    %210 = arith.addf %206, %209 : vector<28x1xf32>
    %211 = math.rsqrt %210 : vector<28x1xf32>
    %212 = vector.broadcast %211 : vector<28x1xf32> to vector<28x32xf32>
    %213 = arith.mulf %208, %212 : vector<28x32xf32>
    %c1_105 = arith.constant 1 : index
    %c0_106 = arith.constant 0 : index
    %c0_107 = arith.constant 0 : index
    %214 = vector.load %arg6[%c1_105, %c0_106, %c0_107] : memref<2x1x32xf32, #tpu.memory_space<vmem>>, vector<1x1x32xf32>
    %215 = vector.shape_cast %214 : vector<1x1x32xf32> to vector<1x32xf32>
    %216 = vector.broadcast %215 : vector<1x32xf32> to vector<28x32xf32>
    %217 = arith.mulf %213, %216 : vector<28x32xf32>
    %c1_108 = arith.constant 1 : index
    %c0_109 = arith.constant 0 : index
    %c0_110 = arith.constant 0 : index
    %218 = vector.load %arg7[%c1_108, %c0_109, %c0_110] : memref<2x1x32xf32, #tpu.memory_space<vmem>>, vector<1x1x32xf32>
    %219 = vector.shape_cast %218 : vector<1x1x32xf32> to vector<1x32xf32>
    %220 = vector.broadcast %219 : vector<1x32xf32> to vector<28x32xf32>
    %221 = arith.addf %217, %220 : vector<28x32xf32>
    %c1_111 = arith.constant 1 : index
    %c0_112 = arith.constant 0 : index
    %c0_113 = arith.constant 0 : index
    %222 = vector.load %arg8[%c1_111, %c0_112, %c0_113] : memref<2x32x64xf32, #tpu.memory_space<vmem>>, vector<1x32x64xf32>
    %223 = vector.shape_cast %222 : vector<1x32x64xf32> to vector<32x64xf32>
    %cst_114 = arith.constant dense<0.000000e+00> : vector<28x64xf32>
    %224 = tpu.matmul %221, %223, %cst_114 {dimension_numbers = #tpu.dot_dimension_numbers<[1], [0], [0], [1], [0, 0, 1, 1], [], []>} : vector<28x32xf32>, vector<32x64xf32>, vector<28x64xf32> -> vector<28x64xf32>
    %c1_115 = arith.constant 1 : index
    %c0_116 = arith.constant 0 : index
    %c0_117 = arith.constant 0 : index
    %225 = vector.load %arg9[%c1_115, %c0_116, %c0_117] : memref<2x1x64xf32, #tpu.memory_space<vmem>>, vector<1x1x64xf32>
    %226 = vector.shape_cast %225 : vector<1x1x64xf32> to vector<1x64xf32>
    %227 = vector.broadcast %226 : vector<1x64xf32> to vector<28x64xf32>
    %228 = arith.addf %224, %227 : vector<28x64xf32>
    %cst_118 = arith.constant 0.000000e+00 : f32
    %229 = vector.broadcast %cst_118 : f32 to vector<28x64xf32>
    %230 = arith.maximumf %228, %229 : vector<28x64xf32>
    %c1_119 = arith.constant 1 : index
    %c0_120 = arith.constant 0 : index
    %c0_121 = arith.constant 0 : index
    %231 = vector.load %arg10[%c1_119, %c0_120, %c0_121] : memref<2x64x32xf32, #tpu.memory_space<vmem>>, vector<1x64x32xf32>
    %232 = vector.shape_cast %231 : vector<1x64x32xf32> to vector<64x32xf32>
    %cst_122 = arith.constant dense<0.000000e+00> : vector<28x32xf32>
    %233 = tpu.matmul %230, %232, %cst_122 {dimension_numbers = #tpu.dot_dimension_numbers<[1], [0], [0], [1], [0, 0, 1, 1], [], []>} : vector<28x64xf32>, vector<64x32xf32>, vector<28x32xf32> -> vector<28x32xf32>
    %c1_123 = arith.constant 1 : index
    %c0_124 = arith.constant 0 : index
    %c0_125 = arith.constant 0 : index
    %234 = vector.load %arg11[%c1_123, %c0_124, %c0_125] : memref<2x1x32xf32, #tpu.memory_space<vmem>>, vector<1x1x32xf32>
    %235 = vector.shape_cast %234 : vector<1x1x32xf32> to vector<1x32xf32>
    %236 = vector.broadcast %235 : vector<1x32xf32> to vector<28x32xf32>
    %237 = arith.addf %233, %236 : vector<28x32xf32>
    %238 = arith.addf %221, %237 : vector<28x32xf32>
    %cst_126 = arith.constant dense<0.000000e+00> : vector<28xf32>
    %239 = vector.multi_reduction <add>, %238, %cst_126 [1] : vector<28x32xf32> to vector<28xf32>
    %240 = vector.shape_cast %239 : vector<28xf32> to vector<28x1xf32>
    %cst_127 = arith.constant 3.200000e+01 : f32
    %241 = vector.broadcast %cst_127 : f32 to vector<28x1xf32>
    %242 = arith.divf %240, %241 : vector<28x1xf32>
    %243 = vector.broadcast %242 : vector<28x1xf32> to vector<28x32xf32>
    %244 = arith.subf %238, %243 : vector<28x32xf32>
    %245 = arith.mulf %244, %244 : vector<28x32xf32>
    %cst_128 = arith.constant dense<0.000000e+00> : vector<28xf32>
    %246 = vector.multi_reduction <add>, %245, %cst_128 [1] : vector<28x32xf32> to vector<28xf32>
    %247 = vector.shape_cast %246 : vector<28xf32> to vector<28x1xf32>
    %cst_129 = arith.constant 3.200000e+01 : f32
    %248 = vector.broadcast %cst_129 : f32 to vector<28x1xf32>
    %249 = arith.divf %247, %248 : vector<28x1xf32>
    %250 = vector.broadcast %242 : vector<28x1xf32> to vector<28x32xf32>
    %251 = arith.subf %238, %250 : vector<28x32xf32>
    %cst_130 = arith.constant 9.99999974E-6 : f32
    %252 = vector.broadcast %cst_130 : f32 to vector<28x1xf32>
    %253 = arith.addf %249, %252 : vector<28x1xf32>
    %254 = math.rsqrt %253 : vector<28x1xf32>
    %255 = vector.broadcast %254 : vector<28x1xf32> to vector<28x32xf32>
    %256 = arith.mulf %251, %255 : vector<28x32xf32>
    %c1_131 = arith.constant 1 : index
    %c0_132 = arith.constant 0 : index
    %c0_133 = arith.constant 0 : index
    %257 = vector.load %arg12[%c1_131, %c0_132, %c0_133] : memref<2x1x32xf32, #tpu.memory_space<vmem>>, vector<1x1x32xf32>
    %258 = vector.shape_cast %257 : vector<1x1x32xf32> to vector<1x32xf32>
    %259 = vector.broadcast %258 : vector<1x32xf32> to vector<28x32xf32>
    %260 = arith.mulf %256, %259 : vector<28x32xf32>
    %c1_134 = arith.constant 1 : index
    %c0_135 = arith.constant 0 : index
    %c0_136 = arith.constant 0 : index
    %261 = vector.load %arg13[%c1_134, %c0_135, %c0_136] : memref<2x1x32xf32, #tpu.memory_space<vmem>>, vector<1x1x32xf32>
    %262 = vector.shape_cast %261 : vector<1x1x32xf32> to vector<1x32xf32>
    %263 = vector.broadcast %262 : vector<1x32xf32> to vector<28x32xf32>
    %264 = arith.addf %260, %263 : vector<28x32xf32>
    %c0_137 = arith.constant 0 : index
    %c0_138 = arith.constant 0 : index
    %265 = vector.load %arg14[%c0_137, %c0_138] : memref<32x50xf32, #tpu.memory_space<vmem>>, vector<32x50xf32>
    %cst_139 = arith.constant dense<0.000000e+00> : vector<28x50xf32>
    %266 = tpu.matmul %264, %265, %cst_139 {dimension_numbers = #tpu.dot_dimension_numbers<[1], [0], [0], [1], [0, 0, 1, 1], [], []>} : vector<28x32xf32>, vector<32x50xf32>, vector<28x50xf32> -> vector<28x50xf32>
    %c0_140 = arith.constant 0 : index
    %c0_141 = arith.constant 0 : index
    %267 = vector.load %arg15[%c0_140, %c0_141] : memref<1x50xf32, #tpu.memory_space<vmem>>, vector<1x50xf32>
    %268 = vector.broadcast %267 : vector<1x50xf32> to vector<28x50xf32>
    %269 = arith.addf %266, %268 : vector<28x50xf32>
    %cst_142 = arith.constant dense<0xFF800000> : vector<28xf32>
    %270 = vector.multi_reduction <maximumf>, %269, %cst_142 [1] : vector<28x50xf32> to vector<28xf32>
    %271 = vector.shape_cast %270 : vector<28xf32> to vector<28x1xf32>
    %272 = vector.broadcast %271 : vector<28x1xf32> to vector<28x50xf32>
    %273 = arith.subf %269, %272 : vector<28x50xf32>
    %274 = math.exp %273 : vector<28x50xf32>
    %cst_143 = arith.constant dense<0.000000e+00> : vector<28xf32>
    %275 = vector.multi_reduction <add>, %274, %cst_143 [1] : vector<28x50xf32> to vector<28xf32>
    %276 = vector.shape_cast %275 : vector<28xf32> to vector<28x1xf32>
    %277 = math.log %276 : vector<28x1xf32>
    %278 = vector.broadcast %277 : vector<28x1xf32> to vector<28x50xf32>
    %279 = arith.subf %273, %278 : vector<28x50xf32>
    %c0_144 = arith.constant 0 : index
    %c0_145 = arith.constant 0 : index
    %280 = vector.load %arg21[%c0_144, %c0_145] : memref<28x50xf32, #tpu.memory_space<vmem>>, vector<28x50xf32>
    tpu.vector_store %arg21[%c0_144, %c0_145], %279 {strides = array<i32>} : memref<28x50xf32, #tpu.memory_space<vmem>>, vector<28x50xf32>,
    %c0_146 = arith.constant 0 : index
    %c0_147 = arith.constant 0 : index
    %281 = vector.load %arg16[%c0_146, %c0_147] : memref<32x40xf32, #tpu.memory_space<vmem>>, vector<32x40xf32>
    %cst_148 = arith.constant dense<0.000000e+00> : vector<28x40xf32>
    %282 = tpu.matmul %264, %281, %cst_148 {dimension_numbers = #tpu.dot_dimension_numbers<[1], [0], [0], [1], [0, 0, 1, 1], [], []>} : vector<28x32xf32>, vector<32x40xf32>, vector<28x40xf32> -> vector<28x40xf32>
    %cst_149 = arith.constant dense<0xFF800000> : vector<28xf32>
    %283 = vector.multi_reduction <maximumf>, %282, %cst_149 [1] : vector<28x40xf32> to vector<28xf32>
    %284 = vector.shape_cast %283 : vector<28xf32> to vector<28x1xf32>
    %285 = vector.broadcast %284 : vector<28x1xf32> to vector<28x40xf32>
    %286 = arith.subf %282, %285 : vector<28x40xf32>
    %287 = math.exp %286 : vector<28x40xf32>
    %cst_150 = arith.constant dense<0.000000e+00> : vector<28xf32>
    %288 = vector.multi_reduction <add>, %287, %cst_150 [1] : vector<28x40xf32> to vector<28xf32>
    %289 = vector.shape_cast %288 : vector<28xf32> to vector<28x1xf32>
    %290 = math.log %289 : vector<28x1xf32>
    %291 = vector.broadcast %290 : vector<28x1xf32> to vector<28x40xf32>
    %292 = arith.subf %286, %291 : vector<28x40xf32>
    %c0_151 = arith.constant 0 : index
    %c0_152 = arith.constant 0 : index
    %293 = vector.load %arg22[%c0_151, %c0_152] : memref<28x40xf32, #tpu.memory_space<vmem>>, vector<28x40xf32>
    tpu.vector_store %arg22[%c0_151, %c0_152], %292 {strides = array<i32>} : memref<28x40xf32, #tpu.memory_space<vmem>>, vector<28x40xf32>,
    %c0_153 = arith.constant 0 : index
    %c0_154 = arith.constant 0 : index
    %294 = vector.load %arg17[%c0_153, %c0_154] : memref<32x32xf32, #tpu.memory_space<vmem>>, vector<32x32xf32>
    %cst_155 = arith.constant dense<0.000000e+00> : vector<28x32xf32>
    %295 = tpu.matmul %264, %294, %cst_155 {dimension_numbers = #tpu.dot_dimension_numbers<[1], [0], [0], [1], [0, 0, 1, 1], [], []>} : vector<28x32xf32>, vector<32x32xf32>, vector<28x32xf32> -> vector<28x32xf32>
    %c0_156 = arith.constant 0 : index
    %c0_157 = arith.constant 0 : index
    %296 = vector.load %arg18[%c0_156, %c0_157] : memref<1x32xf32, #tpu.memory_space<vmem>>, vector<1x32xf32>
    %297 = vector.broadcast %296 : vector<1x32xf32> to vector<28x32xf32>
    %298 = arith.addf %295, %297 : vector<28x32xf32>
    %299 = arith.negf %298 : vector<28x32xf32>
    %300 = math.exp %299 : vector<28x32xf32>
    %cst_158 = arith.constant 1.000000e+00 : f32
    %301 = vector.broadcast %cst_158 : f32 to vector<28x32xf32>
    %302 = arith.addf %301, %300 : vector<28x32xf32>
    %303 = arith.divf %301, %302 : vector<28x32xf32>
    %c0_159 = arith.constant 0 : index
    %c0_160 = arith.constant 0 : index
    %304 = vector.load %arg19[%c0_159, %c0_160] : memref<32x1xf32, #tpu.memory_space<vmem>>, vector<32x1xf32>
    %cst_161 = arith.constant dense<0.000000e+00> : vector<28x1xf32>
    %305 = tpu.matmul %303, %304, %cst_161 {dimension_numbers = #tpu.dot_dimension_numbers<[1], [0], [0], [1], [0, 0, 1, 1], [], []>} : vector<28x32xf32>, vector<32x1xf32>, vector<28x1xf32> -> vector<28x1xf32>
    %c0_162 = arith.constant 0 : index
    %c0_163 = arith.constant 0 : index
    %306 = vector.load %arg20[%c0_162, %c0_163] : memref<1x1xf32, #tpu.memory_space<vmem>>, vector<1x1xf32>
    %307 = vector.broadcast %306 : vector<1x1xf32> to vector<28x1xf32>
    %308 = arith.addf %305, %307 : vector<28x1xf32>
    %c0_164 = arith.constant 0 : index
    %c0_165 = arith.constant 0 : index
    %309 = vector.load %arg23[%c0_164, %c0_165] : memref<28x1xf32, #tpu.memory_space<vmem>>, vector<28x1xf32>
    tpu.vector_store %arg23[%c0_164, %c0_165], %308 {strides = array<i32>} : memref<28x1xf32, #tpu.memory_space<vmem>>, vector<28x1xf32>,
    return
  }
}

</mosaic_0001>

<bundles_post_ra>
// kernel: sequer_forward.1
= control target key start
LH: loop header
LB: loop body
LE: loop exit
PB: predicated region body
PF: predicated region fallthrough
CT: control target
= control target key end

     0   :  { %vm139_vm0 = vcmask 261120   ;;  %s6813_s30 = smov 80   ;;  %vm225_vm1 = vcmask 130048   ;;  %vm406_vm2 = vcmask 1045504   ;;  %vm330_vm3 = vcmask 113664   ;;  %s6809_s25 = smov 48   ;;  %s6775_s2 = inlined_call_operand.vmem [shape: f32[2,32,96], index: 2, kind: input, shape index: {}]   ;;  %s6776_s0 = inlined_call_operand.vmem [shape: f32[2,14,32], index: 0, kind: input, shape index: {}]   ;;  %s6777_s3 = inlined_call_operand.vmem [shape: f32[2,1,96], index: 3, kind: input, shape index: {}]   ;;  %s6778_s1 = inlined_call_operand.vmem [shape: f32[2,14,14], index: 1, kind: input, shape index: {}]   ;;  %s6779_s24 = inlined_call_operand.vmem [shape: f32[2,2,14,14], index: 24, kind: output, shape index: {3}]   ;;  %s6780_s5 = inlined_call_operand.vmem [shape: f32[2,1,32], index: 5, kind: input, shape index: {}]   ;;  %s6781_s4 = inlined_call_operand.vmem [shape: f32[2,32,32], index: 4, kind: input, shape index: {}]   ;;  %s6782_s6 = inlined_call_operand.vmem [shape: f32[2,1,32], index: 6, kind: input, shape index: {}]   ;;  %s6783_s7 = inlined_call_operand.vmem [shape: f32[2,1,32], index: 7, kind: input, shape index: {}]   ;;  %s6784_s9 = inlined_call_operand.vmem [shape: f32[2,1,64], index: 9, kind: input, shape index: {}]   ;;  %s6785_s8 = inlined_call_operand.vmem [shape: f32[2,32,64], index: 8, kind: input, shape index: {}]   ;;  %s6786_s10 = inlined_call_operand.vmem [shape: f32[2,64,32], index: 10, kind: input, shape index: {}]   ;;  %s6787_s11 = inlined_call_operand.vmem [shape: f32[2,1,32], index: 11, kind: input, shape index: {}]   ;;  %s6788_s12 = inlined_call_operand.vmem [shape: f32[2,1,32], index: 12, kind: input, shape index: {}]   ;;  %s6789_s13 = inlined_call_operand.vmem [shape: f32[2,1,32], index: 13, kind: input, shape index: {}]   ;;  %s6790_s14 = inlined_call_operand.vmem [shape: f32[32,50], index: 14, kind: input, shape index: {}]   ;;  %s6791_s15 = inlined_call_operand.vmem [shape: f32[1,50], index: 15, kind: input, shape index: {}]   ;;  %s6792_s16 = inlined_call_operand.vmem [shape: f32[32,40], index: 16, kind: input, shape index: {}]   ;;  %s6793_s17 = inlined_call_operand.vmem [shape: f32[32,32], index: 17, kind: input, shape index: {}]   ;;  %s6794_s18 = inlined_call_operand.vmem [shape: f32[1,32], index: 18, kind: input, shape index: {}]   ;;  %s6795_s19 = inlined_call_operand.vmem [shape: f32[32,1], index: 19, kind: input, shape index: {}]   ;;  %s6796_s20 = inlined_call_operand.<no memory space> [shape: f32[1,1], index: 20, kind: input, shape index: {}]   ;;  %s6797_s21 = inlined_call_operand.vmem [shape: f32[28,50], index: 21, kind: output, shape index: {0}]   ;;  %s6798_s23 = inlined_call_operand.vmem [shape: f32[28,1], index: 23, kind: output, shape index: {2}]   ;;  %s6799_s22 = inlined_call_operand.vmem [shape: f32[28,40], index: 22, kind: output, shape index: {1}]  }
   0x1   :  { %6822 = sst [smem:[#allocation3_spill]] %s6775_s2  ;;  %s6811_s2 = smov 64   ;;  %vm334_vm4 = vcmask 111616   ;;  %vm981_vm5 = vcmask 257024  }
   0x2   :  { %6823 = sst [smem:[#allocation4_spill]] %s6776_s0  ;;  %s6817_s26 = smov 16  }
   0x3   :  { %6824 = sst [smem:[#allocation5_spill]] %s6777_s3  ;;  %s6842_s28 = smov 112  }
   0x4   :  { %6825 = sst [smem:[#allocation6_spill]] %s6778_s1 }
   0x5   :  { %6826 = sst [smem:[#allocation7_spill]] %s6779_s24 }
   0x6   :  { %6827 = sst [smem:[#allocation8_spill]] %s6780_s5 }
   0x7   :  { %6828 = sst [smem:[#allocation9_spill]] %s6781_s4 }
   0x8   :  { %6829 = sst [smem:[#allocation10_spill]] %s6782_s6  ;;  %s6815_s6 = smov 112  }
   0x9   :  { %6830 = sst [smem:[#allocation11_spill]] %s6783_s7 }
   0xa   :  { %6831 = sst [smem:[#allocation12_spill]] %s6799_s22  ;;  %s6843_s22 = smov 80  }
   0xb   :  { %s6832_s27 = sld [smem:[#allocation3_spill]] }
   0xc   :  { %s6833_s1 = sld [smem:[#allocation4_spill]] }
   0xd   :  { %s6834_s29 = sld [smem:[#allocation5_spill]] }
   0xe   :  { %s6835_s24 = sld [smem:[#allocation6_spill]] }
   0xf   :  { %s6836_s5 = sld [smem:[#allocation7_spill]] }
  0x10   :  { %s6837_s3 = sld [smem:[#allocation9_spill]] }
  0x11   :  { %v109_v0 = vld [vmem:[%s6832_s27 + $0x18] sm:$0xff]  ;;  %v108_v1 = vld [vmem:[%s6832_s27 + $0x10] sm:$0xff]  ;;  %v107_v4 = vld [vmem:[%s6832_s27 + $0x8] sm:$0xff]  ;;  %s6839_s4 = sld [smem:[#allocation10_spill]] }
  0x12   :  { %160 = vmatpush.msra.mxu0 %v109_v0  ;;  %v4691_v2 = vld [vmem:[%s6833_s1] sm:$0xff]  ;;  %v4696_v3 = vld [vmem:[%s6833_s1 + $0x8] sm:$0x3f]  ;;  %v4719_v11 = vld [vmem:[%s6833_s1 + $0x10] sm:$0xff] }
  0x13   :  { %v82_v5 = vrot.slane %v4691_v2, 2  ;;  %v83_v6 = vrot.slane %v4691_v2, 4  ;;  %v84_v7 = vrot.slane %v4691_v2, 6  ;;  %114 = vst [vmem:[#allocation1] ss:$4 sm:$0xff] %v4691_v2  ;;  %v106_v8 = vld [vmem:[%s6832_s27] sm:$0xff] }
  0x14   :  { %161 = vmatpush.msra.mxu0 %v108_v1  ;;  %v85_v9 = vrot.slane %v4696_v3, 2  ;;  %v86_v10 = vrot.slane %v4696_v3, 4  ;;  %122 = vst [vmem:[#allocation1 + $0x20] ss:$4 sm:$0xff] %v4696_v3  ;;  %v87_v12 = vrot.slane %v4719_v11, 2  ;;  %v88_v13 = vrot.slane %v4719_v11, 4 }
  0x15   :  { %116 = vst [vmem:[#allocation1 + $0x1] ss:$4 sm:$0xff] %v82_v5  ;;  %v89_v14 = vrot.slane %v4719_v11, 6  ;;  %v4733_v16 = vld [vmem:[%s6833_s1 + $0x18] sm:$0x3f]  ;;  %s6819_s1 = smov 96  }
  0x16   :  { %162 = vmatpush.msra.mxu0 %v107_v4  ;;  %118 = vst [vmem:[#allocation1 + $0x2] ss:$4 sm:$0xff] %v83_v6  ;;  %v90_v17 = vrot.slane %v4733_v16, 2  ;;  %v91_v18 = vrot.slane %v4733_v16, 4  ;;  %v4377_v22 = vld [vmem:[%s6834_s29] ss:$0 sm:$0xff] }
  0x17   :  { %120 = vst [vmem:[#allocation1 + $0x3] ss:$4 sm:$0xff] %v84_v7 }
  0x18   :  { %163 = vmatpush.msra.mxu0 %v106_v8  ;;  %124 = vst [vmem:[#allocation1 + $0x21] ss:$4 sm:$0xff] %v85_v9 }
  0x19   :  { %126 = vst [vmem:[#allocation1 + $0x22] ss:$4 sm:$0xff] %v86_v10 }
  0x1a   :  { %128 = vst [vmem:[#allocation1 + $0x23] ss:$4 sm:$0xff] %v4719_v11 }
  0x1e   :  { %v129_v15 = vld.sshfl [vmem:[#allocation1] sm:$0xff pattern:$0x73625140] }
  0x1f   :  { %4216 = vmatmul.msk.f32.vlgmr.msra.gmra.mxu0 %vm139_vm0, %v129_v15  ;;  %131 = vst [vmem:[#allocation1] ss:$4 sm:$0xff] %v87_v12 }
  0x20   :  { %132 = vst [vmem:[#allocation1 + $0x1] ss:$4 sm:$0xff] %v88_v13 }
  0x21   :  { %133 = vst [vmem:[#allocation1 + $0x2] ss:$4 sm:$0xff] %v89_v14  ;;  %v130_v19 = vld.sshfl [vmem:[#allocation1 + $0x20] sm:$0xff pattern:$0x73625140] }
  0x22   :  { %134 = vst [vmem:[#allocation1 + $0x3] ss:$4 sm:$0xff] %v4733_v16 }
  0x23   :  { %135 = vst [vmem:[#allocation1 + $0x20] ss:$4 sm:$0xff] %v90_v17 }
  0x24   :  { %136 = vst [vmem:[#allocation1 + $0x21] ss:$4 sm:$0xff] %v91_v18 }
  0x27   :  { %4217 = vmatmul.msk.f32.gmra.mxu0 %vm139_vm0, %v130_v19 }
  0x29   :  { %v137_v20 = vld.sshfl [vmem:[#allocation1] sm:$0xff pattern:$0x73625140] }
  0x2b   :  { %v138_v21 = vld.sshfl [vmem:[#allocation1 + $0x20] sm:$0xff pattern:$0x73625140] }
  0x2f   :  { %4218 = vmatmul.msk.f32.gmra.mxu0 %vm139_vm0, %v137_v20 }
  0x37   :  { %4219 = vmatmul.msk.f32.gmra.mxu0 %vm139_vm0, %v138_v21 }
  0x9c   :  { %v165_v23 = vpop.f32.mrf.mxu0 }
  0x9d   :  { %v4755_v24 = vadd.f32 %v4377_v22, %v165_v23 }
  0x9f   :  { %v4758_v25 = vrot.slane %v4755_v24, 2  ;;  %v4761_v26 = vrot.slane %v4755_v24, 4  ;;  %v4764_v27 = vrot.slane %v4755_v24, 6  ;;  %191 = vst [vmem:[#allocation1] ss:$4 sm:$0xff] %v4755_v24 }
  0xa1   :  { %193 = vst [vmem:[#allocation1 + $0x1] ss:$4 sm:$0xff] %v4758_v25 }
  0xa2   :  { %195 = vst [vmem:[#allocation1 + $0x2] ss:$4 sm:$0xff] %v4761_v26 }
  0xa3   :  { %197 = vst [vmem:[#allocation1 + $0x3] ss:$4 sm:$0xff] %v4764_v27 }
  0xa4   :  { %v168_v28 = vpop.f32.mrf.mxu0 }
  0xa5   :  { %v4770_v29 = vadd.f32 %v4377_v22, %v168_v28 }
  0xa7   :  { %v4773_v30 = vrot.slane %v4770_v29, 2  ;;  %v4776_v31 = vrot.slane %v4770_v29, 4  ;;  %199 = vst [vmem:[#allocation1 + $0x20] ss:$4 sm:$0xff] %v4770_v29  ;;  %v4794_v36 = vrot.slane %v4770_v29, 6 }
  0xa9   :  { %201 = vst [vmem:[#allocation1 + $0x21] ss:$4 sm:$0xff] %v4773_v30 }
  0xaa   :  { %v4780_v32 = vld.sshfl [vmem:[#allocation1] sm:$0xff pattern:$0x73625140]  ;;  %203 = vst [vmem:[#allocation1 + $0x22] ss:$4 sm:$0xff] %v4776_v31 }
  0xab   :  { %206 = vst [vmem:[#allocation1] ss:$4 sm:$0xff] %v4755_v24 }
  0xac   :  { %210 = vst [vmem:[#allocation1 + $0x2] ss:$4 sm:$0xff] %v4761_v26  ;;  %v171_v33 = vpop.f32.mrf.mxu0 }
  0xad   :  { %212 = vst [vmem:[#allocation1 + $0x3] ss:$4 sm:$0xff] %v4764_v27  ;;  %v4787_v34 = vadd.f32 %v4377_v22, %v171_v33 }
  0xae   :  { %208 = vst [vmem:[#allocation1 + $0x1] ss:$4 sm:$0xff] %v4758_v25 }
  0xaf   :  { %v4798_v37 = vrot.slane %v4787_v34, 2  ;;  %v4801_v39 = vrot.slane %v4787_v34, 4  ;;  %v4810_v42 = vrot.slane %v4787_v34, 6 }
  0xb1   :  { %v4789_v35 = vld.sshfl [vmem:[#allocation1 + $0x20] sm:$0xff pattern:$0x73625140] }
  0xb2   :  { %214 = vst [vmem:[#allocation1 + $0x20] ss:$4 sm:$0xff] %v4770_v29 }
  0xb3   :  { %216 = vst [vmem:[#allocation1 + $0x21] ss:$4 sm:$0xff] %v4773_v30 }
  0xb4   :  { %218 = vst [vmem:[#allocation1 + $0x22] ss:$4 sm:$0xff] %v4776_v31  ;;  %v174_v40 = vpop.f32.mrf.mxu0 }
  0xb5   :  { %v219_v38 = vld.sshfl [vmem:[#allocation1] sm:$0xff pattern:$0x73625140]  ;;  %v4806_v41 = vadd.f32 %v4377_v22, %v174_v40 }
  0xb6   :  { %257 = vst [vmem:[#allocation1] ss:$4 sm:$0xff] %v4794_v36 }
  0xb7   :  { %259 = vst [vmem:[#allocation1 + $0x1] ss:$4 sm:$0xff] %v4787_v34  ;;  %v4813_v43 = vrot.slane %v4806_v41, 2 }
  0xb8   :  { %261 = vst [vmem:[#allocation1 + $0x2] ss:$4 sm:$0xff] %v4798_v37 }
  0xb9   :  { %263 = vst [vmem:[#allocation1 + $0x3] ss:$4 sm:$0xff] %v4801_v39 }
  0xbb   :  { %v220_v44 = vld.sshfl [vmem:[#allocation1 + $0x20] sm:$0xff pattern:$0x73625140] }
  0xbc   :  { %265 = vst [vmem:[#allocation1 + $0x20] ss:$4 sm:$0xff] %v4810_v42  ;;  %223 = vrot.lane.b32.xlu1 %v220_v44, %s6819_s1 }
  0xbd   :  { %267 = vst [vmem:[#allocation1 + $0x21] ss:$4 sm:$0xff] %v4806_v41 }
  0xbe   :  { %269 = vst [vmem:[#allocation1 + $0x22] ss:$4 sm:$0xff] %v4813_v43 }
  0xc0   :  { %v4819_v45 = vld.sshfl [vmem:[#allocation1] sm:$0xff pattern:$0x73625140] }
  0xc1   :  { %272 = vst [vmem:[#allocation1] ss:$4 sm:$0xff] %v4794_v36 }
  0xc2   :  { %274 = vst [vmem:[#allocation1 + $0x1] ss:$4 sm:$0xff] %v4787_v34 }
  0xc3   :  { %276 = vst [vmem:[#allocation1 + $0x2] ss:$4 sm:$0xff] %v4798_v37 }
  0xc4   :  { %278 = vst [vmem:[#allocation1 + $0x3] ss:$4 sm:$0xff] %v4801_v39  ;;  %221 = vrot.lane.b32.xlu1 %v219_v38, %s6819_s1 }
  0xc5   :  { %v4826_v46 = vld.sshfl [vmem:[#allocation1 + $0x20] sm:$0xff pattern:$0x73625140] }
  0xc6   :  { %280 = vst [vmem:[#allocation1 + $0x20] ss:$4 sm:$0xff] %v4810_v42 }
  0xc7   :  { %282 = vst [vmem:[#allocation1 + $0x21] ss:$4 sm:$0xff] %v4806_v41 }
  0xc8   :  { %284 = vst [vmem:[#allocation1 + $0x22] ss:$4 sm:$0xff] %v4813_v43 }
  0xcb   :  { %v285_v47 = vld.sshfl [vmem:[#allocation1] sm:$0xff pattern:$0x73625140] }
  0xcc   :  { %380 = vst [vmem:[#allocation1] ss:$4 sm:$0xff] %v4755_v24 }
  0xcd   :  { %382 = vst [vmem:[#allocation1 + $0x1] ss:$4 sm:$0xff] %v4758_v25 }
  0xce   :  { %384 = vst [vmem:[#allocation1 + $0x2] ss:$4 sm:$0xff] %v4761_v26 }
  0xcf   :  { %386 = vst [vmem:[#allocation1 + $0x3] ss:$4 sm:$0xff] %v4764_v27  ;;  %v286_v48 = vld.sshfl [vmem:[#allocation1 + $0x20] sm:$0xff pattern:$0x73625140] }
  0xd0   :  { %388 = vst [vmem:[#allocation1 + $0x20] ss:$4 sm:$0xff] %v4770_v29  ;;  %289 = vrot.lane.b32.xlu0 %v286_v48, %s6819_s1 }
  0xd1   :  { %390 = vst [vmem:[#allocation1 + $0x21] ss:$4 sm:$0xff] %v4773_v30 }
  0xd2   :  { %392 = vst [vmem:[#allocation1 + $0x22] ss:$4 sm:$0xff] %v4776_v31 }
  0xd6   :  { %v4839_v49 = vld.sshfl [vmem:[#allocation1] sm:$0xff pattern:$0x73625140] }
  0xd7   :  { %432 = vst [vmem:[#allocation1] ss:$4 sm:$0xff] %v4794_v36 }
  0xd8   :  { %434 = vst [vmem:[#allocation1 + $0x1] ss:$4 sm:$0xff] %v4787_v34  ;;  %287 = vrot.lane.b32.xlu0 %v285_v47, %s6819_s1  ;;  %s6844_s1 = smov 64  }
  0xd9   :  { %436 = vst [vmem:[#allocation1 + $0x2] ss:$4 sm:$0xff] %v4798_v37  ;;  %v4845_v50 = vld.sshfl [vmem:[#allocation1 + $0x20] sm:$0xff pattern:$0x73625140] }
  0xda   :  { %438 = vst [vmem:[#allocation1 + $0x3] ss:$4 sm:$0xff] %v4801_v39 }
  0xdb   :  { %440 = vst [vmem:[#allocation1 + $0x20] ss:$4 sm:$0xff] %v4810_v42 }
  0xdc   :  { %442 = vst [vmem:[#allocation1 + $0x21] ss:$4 sm:$0xff] %v4806_v41 }
  0xdd   :  { %444 = vst [vmem:[#allocation1 + $0x22] ss:$4 sm:$0xff] %v4813_v43 }
  0xe1   :  { %v4851_v51 = vld.sshfl [vmem:[#allocation1] sm:$0xff pattern:$0x73625140] }
  0xe2   :  { %483 = vst [vmem:[#allocation1] ss:$4 sm:$0xff] %v4755_v24 }
  0xe3   :  { %485 = vst [vmem:[#allocation1 + $0x1] ss:$4 sm:$0xff] %v4758_v25 }
  0xe4   :  { %487 = vst [vmem:[#allocation1 + $0x2] ss:$4 sm:$0xff] %v4761_v26  ;;  %v446_v52 = vld.sshfl [vmem:[#allocation1 + $0x20] sm:$0xff pattern:$0x73625140] }
  0xe5   :  { %489 = vst [vmem:[#allocation1 + $0x3] ss:$4 sm:$0xff] %v4764_v27 }
  0xe6   :  { %491 = vst [vmem:[#allocation1 + $0x20] ss:$4 sm:$0xff] %v4770_v29 }
  0xe7   :  { %493 = vst [vmem:[#allocation1 + $0x21] ss:$4 sm:$0xff] %v4773_v30 }
  0xe8   :  { %495 = vst [vmem:[#allocation1 + $0x22] ss:$4 sm:$0xff] %v4776_v31 }
  0xec   :  { %v496_v53 = vld.sshfl [vmem:[#allocation1] sm:$0xff pattern:$0x73625140] }
  0xed   :  { %502 = vst [vmem:[#allocation1] ss:$4 sm:$0xff] %v4755_v24  ;;  %498 = vrot.lane.b32.xlu0 %v496_v53, %s6815_s6 }
  0xee   :  { %504 = vst [vmem:[#allocation1 + $0x1] ss:$4 sm:$0xff] %v4758_v25 }
  0xef   :  { %506 = vst [vmem:[#allocation1 + $0x2] ss:$4 sm:$0xff] %v4761_v26  ;;  %v497_v54 = vld.sshfl [vmem:[#allocation1 + $0x20] sm:$0xff pattern:$0x73625140] }
  0xf0   :  { %508 = vst [vmem:[#allocation1 + $0x3] ss:$4 sm:$0xff] %v4764_v27 }
  0xf1   :  { %510 = vst [vmem:[#allocation1 + $0x20] ss:$4 sm:$0xff] %v4770_v29 }
  0xf2   :  { %512 = vst [vmem:[#allocation1 + $0x21] ss:$4 sm:$0xff] %v4773_v30 }
  0xf3   :  { %514 = vst [vmem:[#allocation1 + $0x22] ss:$4 sm:$0xff] %v4776_v31 }
  0xf5   :  { %500 = vrot.lane.b32.xlu0 %v497_v54, %s6815_s6 }
  0xf7   :  { %v515_v55 = vld.sshfl [vmem:[#allocation1] sm:$0xff pattern:$0x73625140] }
  0xf8   :  { %552 = vst [vmem:[#allocation1] ss:$4 sm:$0xff] %v4794_v36 }
  0xf9   :  { %554 = vst [vmem:[#allocation1 + $0x1] ss:$4 sm:$0xff] %v4787_v34 }
  0xfa   :  { %556 = vst [vmem:[#allocation1 + $0x2] ss:$4 sm:$0xff] %v4798_v37  ;;  %v516_v56 = vld.sshfl [vmem:[#allocation1 + $0x20] sm:$0xff pattern:$0x73625140] }
  0xfb   :  { %558 = vst [vmem:[#allocation1 + $0x3] ss:$4 sm:$0xff] %v4801_v39  ;;  %519 = vrot.lane.b32.xlu2 %v516_v56, %s6813_s30 }
  0xfc   :  { %560 = vst [vmem:[#allocation1 + $0x20] ss:$4 sm:$0xff] %v4810_v42 }
  0xfd   :  { %562 = vst [vmem:[#allocation1 + $0x21] ss:$4 sm:$0xff] %v4806_v41 }
  0xfe   :  { %564 = vst [vmem:[#allocation1 + $0x22] ss:$4 sm:$0xff] %v4813_v43 }
 0x102   :  { %v565_v57 = vld.sshfl [vmem:[#allocation1] sm:$0xff pattern:$0x73625140] }
 0x103   :  { %571 = vst [vmem:[#allocation1] ss:$4 sm:$0xff] %v4794_v36  ;;  %517 = vrot.lane.b32.xlu2 %v515_v55, %s6813_s30 }
 0x104   :  { %573 = vst [vmem:[#allocation1 + $0x1] ss:$4 sm:$0xff] %v4787_v34 }
 0x105   :  { %575 = vst [vmem:[#allocation1 + $0x2] ss:$4 sm:$0xff] %v4798_v37  ;;  %v566_v58 = vld.sshfl [vmem:[#allocation1 + $0x20] sm:$0xff pattern:$0x73625140] }
 0x106   :  { %577 = vst [vmem:[#allocation1 + $0x3] ss:$4 sm:$0xff] %v4801_v39 }
 0x107   :  { %579 = vst [vmem:[#allocation1 + $0x20] ss:$4 sm:$0xff] %v4810_v42 }
 0x108   :  { %581 = vst [vmem:[#allocation1 + $0x21] ss:$4 sm:$0xff] %v4806_v41 }
 0x109   :  { %583 = vst [vmem:[#allocation1 + $0x22] ss:$4 sm:$0xff] %v4813_v43 }
 0x10d   :  { %v584_v59 = vld.sshfl [vmem:[#allocation1] sm:$0xff pattern:$0x73625140] }
 0x10e   :  { %677 = vst [vmem:[#allocation1] ss:$4 sm:$0xff] %v4755_v24  ;;  %586 = vrot.lane.b32.xlu2 %v584_v59, %s6813_s30 }
 0x10f   :  { %679 = vst [vmem:[#allocation1 + $0x1] ss:$4 sm:$0xff] %v4758_v25 }
 0x110   :  { %681 = vst [vmem:[#allocation1 + $0x2] ss:$4 sm:$0xff] %v4761_v26  ;;  %v585_v60 = vld.sshfl [vmem:[#allocation1 + $0x20] sm:$0xff pattern:$0x73625140] }
 0x111   :  { %683 = vst [vmem:[#allocation1 + $0x3] ss:$4 sm:$0xff] %v4764_v27  ;;  %588 = vrot.lane.b32.xlu1 %v585_v60, %s6813_s30  ;;  %v102_v27 = vld [vmem:[%s6835_s24] sm:$0xff] }
 0x112   :  { %685 = vst [vmem:[#allocation1 + $0x20] ss:$4 sm:$0xff] %v4770_v29 }
 0x113   :  { %687 = vst [vmem:[#allocation1 + $0x21] ss:$4 sm:$0xff] %v4773_v30 }
 0x114   :  { %689 = vst [vmem:[#allocation1 + $0x22] ss:$4 sm:$0xff] %v4776_v31 }
 0x116   :  { %569 = vrot.lane.b32.xlu2 %v566_v58, %s6815_s6 }
 0x118   :  { %v4895_v61 = vld.sshfl [vmem:[#allocation1] sm:$0xff pattern:$0x73625140] }
 0x119   :  { %728 = vst [vmem:[#allocation1] ss:$4 sm:$0xff] %v4794_v36  ;;  %567 = vrot.lane.b32.xlu1 %v565_v57, %s6815_s6  ;;  %v4367_v57 = vpack.i.bf16 %v4839_v49, %v4851_v51  ;;  %s6840_s6 = sld [smem:[#allocation11_spill]] }
 0x11a   :  { %730 = vst [vmem:[#allocation1 + $0x1] ss:$4 sm:$0xff] %v4787_v34 }
 0x11b   :  { %732 = vst [vmem:[#allocation1 + $0x2] ss:$4 sm:$0xff] %v4798_v37  ;;  %v4901_v62 = vld.sshfl [vmem:[#allocation1 + $0x20] sm:$0xff pattern:$0x73625140]  ;;  %v104_v37 = vld [vmem:[%s6835_s24 + $0x10] sm:$0xff] }
 0x11c   :  { %734 = vst [vmem:[#allocation1 + $0x3] ss:$4 sm:$0xff] %v4801_v39 }
 0x11d   :  { %736 = vst [vmem:[#allocation1 + $0x20] ss:$4 sm:$0xff] %v4810_v42  ;;  %v105_v42 = vld [vmem:[%s6835_s24 + $0x18] sm:$0x3f] }
 0x11e   :  { %738 = vst [vmem:[#allocation1 + $0x21] ss:$4 sm:$0xff] %v4806_v41  ;;  %449 = vrot.lane.b32.xlu2 %v446_v52, %s6811_s2 }
 0x11f   :  { %740 = vst [vmem:[#allocation1 + $0x22] ss:$4 sm:$0xff] %v4813_v43 }
 0x12e   :  { %v224_v63 = vpop.permute.xlu1 %223 }
 0x12f   :  { %4220 = vmatpush.xpose.msk.msra.mxu1 %vm225_vm1, %v224_v63 }
 0x136   :  { %v222_v0 = vpop.permute.xlu1 %221 }
 0x137   :  { %4221 = vmatpush.xpose.msk.msra.mxu1 %vm225_vm1, %v222_v0 }
 0x13a   :  { %4222 = vmatmul.msk.f32.vlgmr.msra.gmra.mxu1 %vm225_vm1, %v4780_v32  ;;  %v103_v32 = vld [vmem:[%s6835_s24 + $0x8] sm:$0x3f] }
 0x142   :  { %v290_v1 = vpop.permute.xlu0 %289  ;;  %4223 = vmatmul.msk.f32.gmra.mxu1 %vm225_vm1, %v4789_v35 }
 0x143   :  { %4224 = vmatpush.xpose.msk.msra.mxu2 %vm225_vm1, %v290_v1 }
 0x14a   :  { %v288_v4 = vpop.permute.xlu0 %287 }
 0x14b   :  { %4225 = vmatpush.xpose.msk.msra.mxu2 %vm225_vm1, %v288_v4 }
 0x14e   :  { %4226 = vmatmul.msk.f32.vlgmr.msra.gmra.mxu2 %vm225_vm1, %v4819_v45 }
 0x155   :  { %v520_v8 = vpop.permute.xlu2 %519 }
 0x156   :  { %4234 = vmatpush.xpose.msk.msrb.mxu1 %vm225_vm1, %v520_v8  ;;  %4227 = vmatmul.msk.f32.gmra.mxu2 %vm225_vm1, %v4826_v46 }
 0x15d   :  { %v518_v15 = vpop.permute.xlu2 %517 }
 0x15e   :  { %4235 = vmatpush.xpose.msk.msrb.mxu1 %vm225_vm1, %v518_v15 }
 0x15f   :  { %v499_v19 = vpop.permute.xlu0 %498 }
 0x161   :  { %4236 = vmatmul.msk.f32.vlgmr.msrb.gmra.mxu1 %vm225_vm1, %v499_v19 }
 0x167   :  { %v501_v20 = vpop.permute.xlu0 %500 }
 0x168   :  { %v587_v21 = vpop.permute.xlu2 %586 }
 0x169   :  { %4237 = vmatmul.msk.f32.gmra.mxu1 %vm225_vm1, %v501_v20 }
 0x170   :  { %v570_v22 = vpop.permute.xlu2 %569 }
 0x178   :  { %v450_v23 = vpop.permute.xlu2 %449 }
 0x179   :  { %4231 = vmatpush.msk.msra.mxu3 %vm406_vm2, %v450_v23 }
 0x183   :  { %v589_v24 = vpop.permute.xlu1 %588 }
 0x184   :  { %4238 = vmatpush.xpose.msk.msrb.mxu2 %vm225_vm1, %v589_v24 }
 0x188   :  { %4239 = vmatpush.xpose.msk.msrb.mxu2 %vm225_vm1, %v587_v21 }
 0x18b   :  { %v568_v25 = vpop.permute.xlu1 %567 }
 0x18c   :  { %4240 = vmatmul.msk.f32.vlgmr.msrb.gmra.mxu2 %vm225_vm1, %v568_v25 }
 0x194   :  { %4241 = vmatmul.msk.f32.gmra.mxu2 %vm225_vm1, %v570_v22 }
 0x1b7   :  { %v251_v26 = vpop.f32.mrf.mxu1 }
 0x1b8   :  { %v322_v28 = vmul.f32 0.25, %v251_v26 }
 0x1ba   :  { %v326_v29 = vadd.f32 %v322_v28, %v102_v27 }
 0x1bc   :  { %v331_v30 = vsel %vm330_vm3, %v326_v29, -inf }
 0x1bd   :  { %332 = vmax.xlane.f32.xlu2 %v331_v30 }
 0x1bf   :  { %v254_v31 = vpop.f32.mrf.mxu1 }
 0x1c0   :  { %v323_v33 = vmul.f32 0.25, %v254_v31 }
 0x1c2   :  { %v327_v34 = vadd.f32 %v323_v33, %v103_v32 }
 0x1c4   :  { %v335_v35 = vsel %vm334_vm4, %v327_v34, -inf }
 0x1c5   :  { %336 = vmax.xlane.f32.xlu0 %v335_v35 }
 0x1d1   :  { %v316_v36 = vpop.f32.mrf.mxu2 }
 0x1d2   :  { %v324_v38 = vmul.f32 0.25, %v316_v36 }
 0x1d4   :  { %v328_v39 = vadd.f32 %v324_v38, %v104_v37 }
 0x1d6   :  { %v338_v40 = vsel %vm330_vm3, %v328_v39, -inf }
 0x1d7   :  { %339 = vmax.xlane.f32.xlu0 %v338_v40 }
 0x1d9   :  { %v319_v41 = vpop.f32.mrf.mxu2 }
 0x1da   :  { %v325_v43 = vmul.f32 0.25, %v319_v41 }
 0x1dc   :  { %v329_v44 = vadd.f32 %v325_v43, %v105_v42 }
 0x1de   :  { %v546_v45 = vpop.f32.mrf.mxu1  ;;  %v341_v46 = vsel %vm334_vm4, %v329_v44, -inf }
 0x1df   :  { %v621_v47 = vmul.f32 0.25, %v546_v45  ;;  %342 = vmax.xlane.f32.xlu1 %v341_v46 }
 0x1e1   :  { %v625_v48 = vadd.f32 %v621_v47, %v102_v27 }
 0x1e3   :  { %v629_v52 = vsel %vm330_vm3, %v625_v48, -inf }
 0x1e4   :  { %630 = vmax.xlane.f32.xlu2 %v629_v52 }
 0x1e6   :  { %v549_v53 = vpop.f32.mrf.mxu1 }
 0x1e7   :  { %v622_v54 = vmul.f32 0.25, %v549_v53 }
 0x1e9   :  { %v626_v55 = vadd.f32 %v622_v54, %v103_v32 }
 0x1eb   :  { %v632_v56 = vsel %vm334_vm4, %v626_v55, -inf  ;;  %694 = vrot.lane.b32.xlu0 %v4901_v62, %s6809_s25 }
 0x1ec   :  { %633 = vmax.xlane.f32.xlu1 %v632_v56 }
 0x205   :  { %4368 = vrot.lane.b32.xlu1 %v4367_v57, %s6811_s2 }
 0x20f   :  { %v615_v58 = vpop.f32.mrf.mxu2 }
 0x210   :  { %v623_v59 = vmul.f32 0.25, %v615_v58 }
 0x212   :  { %v4952_v60 = vadd.f32 %v623_v59, %v104_v37 }
 0x214   :  { %v635_v63 = vsel %vm330_vm3, %v4952_v60, -inf }
 0x215   :  { %636 = vmax.xlane.f32.xlu2 %v635_v63 }
 0x217   :  { %v618_v0 = vpop.f32.mrf.mxu2 }
 0x218   :  { %v624_v1 = vmul.f32 0.25, %v618_v0 }
 0x21a   :  { %v628_v4 = vadd.f32 %v624_v1, %v105_v42 }
 0x21c   :  { %v638_v8 = vsel %vm334_vm4, %v628_v4, -inf }
 0x21d   :  { %639 = vmax.xlane.f32.xlu0 %v638_v8  ;;  %v741_v8 = vld.sshfl [vmem:[#allocation1] sm:$0xff pattern:$0x73625140] }
 0x22d   :  { %397 = vrot.lane.b32.xlu2 %v4845_v50, %s6811_s2  ;;  %s6838_s2 = sld [smem:[#allocation8_spill]] }
 0x230   :  { %v333_v49 = vpop.xlane.xlu2 %332 }
 0x231   :  { %v344_v51 = vsub.f32 %v326_v29, %v333_v49 }
 0x233   :  { %v348_v62 = vmul.f32 1.442695, %v344_v51 }
 0x235   :  { %4396 = vpow2.f32 %v348_v62 }
 0x238   :  { %v337_v15 = vpop.xlane.xlu0 %336 }
 0x239   :  { %v345_v19 = vsub.f32 %v327_v34, %v337_v15 }
 0x23b   :  { %v4959_v20 = vpop.eup %4396  ;;  %v350_v21 = vmul.f32 1.442695, %v345_v19 }
 0x23c   :  { %v356_v22 = vsel %vm330_vm3, %v4959_v20, 0.0 }
 0x23d   :  { %4398 = vpow2.f32 %v350_v21  ;;  %357 = vadd.xlane.f32.xlu0 %v356_v22 }
 0x243   :  { %v4963_v23 = vpop.eup %4398 }
 0x244   :  { %v359_v24 = vsel %vm334_vm4, %v4963_v23, 0.0 }
 0x245   :  { %360 = vadd.xlane.f32.xlu1 %v359_v24 }
 0x24a   :  { %v340_v50 = vpop.xlane.xlu0 %339 }
 0x24b   :  { %v346_v25 = vsub.f32 %v328_v39, %v340_v50 }
 0x24d   :  { %v352_v26 = vmul.f32 1.442695, %v346_v25 }
 0x24f   :  { %4400 = vpow2.f32 %v352_v26 }
 0x252   :  { %v343_v27 = vpop.xlane.xlu1 %342 }
 0x253   :  { %v347_v28 = vsub.f32 %v329_v44, %v343_v27  ;;  %v742_v44 = vld.sshfl [vmem:[#allocation1 + $0x20] sm:$0xff pattern:$0x73625140] }
 0x255   :  { %v4967_v29 = vpop.eup %4400  ;;  %v354_v30 = vmul.f32 1.442695, %v347_v28 }
 0x256   :  { %v362_v31 = vsel %vm330_vm3, %v4967_v29, 0.0 }
 0x257   :  { %v631_v32 = vpop.xlane.xlu2 %630  ;;  %4402 = vpow2.f32 %v354_v30  ;;  %363 = vadd.xlane.f32.xlu1 %v362_v31 }
 0x258   :  { %v641_v33 = vsub.f32 %v625_v48, %v631_v32 }
 0x25a   :  { %v645_v34 = vmul.f32 1.442695, %v641_v33 }
 0x25c   :  { %4404 = vpow2.f32 %v645_v34 }
 0x25d   :  { %v4403_v35 = vpop.eup %4402  ;;  %v695_v47 = vpop.permute.xlu0 %694 }
 0x25e   :  { %v365_v36 = vsel %vm334_vm4, %v4403_v35, 0.0 }
 0x25f   :  { %v634_v37 = vpop.xlane.xlu1 %633  ;;  %366 = vadd.xlane.f32.xlu0 %v365_v36 }
 0x260   :  { %v642_v38 = vsub.f32 %v626_v55, %v634_v37 }
 0x262   :  { %v647_v39 = vmul.f32 1.442695, %v642_v38  ;;  %v4405_v40 = vpop.eup %4404 }
 0x263   :  { %v653_v41 = vsel %vm330_vm3, %v4405_v40, 0.0 }
 0x264   :  { %4406 = vpow2.f32 %v647_v39 }
 0x267   :  { %654 = vadd.xlane.f32.xlu0 %v653_v41 }
 0x26a   :  { %v4973_v42 = vpop.eup %4406 }
 0x26b   :  { %v656_v43 = vsel %vm334_vm4, %v4973_v42, 0.0 }
 0x26c   :  { %657 = vadd.xlane.f32.xlu2 %v656_v43 }
 0x270   :  { %745 = vrot.lane.b32.xlu1 %v742_v44, %s6809_s25 }
 0x277   :  { %v4369_v45 = vpop.permute.xlu1 %4368 }
 0x278   :  { %v4370_v46 = vunpack.i.l.bf16 %v4369_v45  ;;  %v4371_v54 = vunpack.i.h.bf16 %v4369_v45 }
 0x27a   :  { %475 = vmatpush.msra.mxu3 %v4370_v46 }
 0x27b   :  { %692 = vrot.lane.b32.xlu0 %v4895_v61, %s6809_s25 }
 0x27c   :  { %4242 = vmatpush.msk.msrb.mxu3 %vm406_vm2, %v695_v47 }
 0x288   :  { %v637_v48 = vpop.xlane.xlu2 %636 }
 0x289   :  { %v643_v56 = vsub.f32 %v4952_v60, %v637_v48 }
 0x28b   :  { %v649_v58 = vmul.f32 1.442695, %v643_v56 }
 0x290   :  { %v398_v52 = vpop.permute.xlu2 %397  ;;  %v640_v53 = vpop.xlane.xlu0 %639 }
 0x291   :  { %4228 = vmatpush.msk.msrb.mxu0 %vm406_vm2, %v398_v52  ;;  %v644_v55 = vsub.f32 %v628_v4, %v640_v53 }
 0x293   :  { %424 = vmatpush.msrb.mxu0 %v4371_v54  ;;  %v651_v57 = vmul.f32 1.442695, %v644_v55 }
 0x295   :  { %4408 = vpow2.f32 %v651_v57  ;;  %v824_v57 = vld [vmem:[%s6837_s3 + $0x18] sm:$0xff] }
 0x296   :  { %4410 = vpow2.f32 %v649_v58  ;;  %v823_v58 = vld [vmem:[%s6837_s3 + $0x10] sm:$0xff]  ;;  %874 = vmatpush.msra.mxu1 %v824_v57 }
 0x298   :  { %875 = vmatpush.msra.mxu1 %v823_v58 }
 0x29b   :  { %v4409_v59 = vpop.eup %4408 }
 0x29c   :  { %v662_v63 = vsel %vm334_vm4, %v4409_v59, 0.0  ;;  %v4411_v0 = vpop.eup %4410 }
 0x29d   :  { %663 = vadd.xlane.f32.xlu2 %v662_v63  ;;  %v659_v61 = vsel %vm330_vm3, %v4411_v0, 0.0  ;;  %v821_v63 = vld [vmem:[%s6837_s3] sm:$0xff] }
 0x2a5   :  { %660 = vadd.xlane.f32.xlu0 %v659_v61 }
 0x2b0   :  { %v358_v1 = vpop.xlane.xlu0 %357 }
 0x2b1   :  { %4412 = vrcp.f32 %v358_v1 }
 0x2b5   :  { %743 = vrot.lane.b32.xlu2 %v741_v8, %s6809_s25 }
 0x2b7   :  { %v4413_v4 = vpop.eup %4412 }
 0x2b8   :  { %v361_v60 = vpop.xlane.xlu1 %360  ;;  %v372_v49 = vmul.f32 %v4413_v4, %v4959_v20 }
 0x2b9   :  { %4414 = vrcp.f32 %v361_v60 }
 0x2ba   :  { %4229 = vmatmul.msk.f32.vlgmr.msrb.gmra.mxu0 %vm330_vm3, %v372_v49 }
 0x2bf   :  { %v4415_v51 = vpop.eup %4414 }
 0x2c0   :  { %v373_v62 = vmul.f32 %v4415_v51, %v4963_v23 }
 0x2c2   :  { %4230 = vmatmul.msk.f32.gmra.mxu0 %vm330_vm3, %v373_v62 }
 0x2ca   :  { %v364_v15 = vpop.xlane.xlu1 %363 }
 0x2cb   :  { %4416 = vrcp.f32 %v364_v15 }
 0x2d1   :  { %v4417_v19 = vpop.eup %4416 }
 0x2d2   :  { %v367_v21 = vpop.xlane.xlu0 %366  ;;  %v374_v22 = vmul.f32 %v4417_v19, %v4967_v29 }
 0x2d3   :  { %4418 = vrcp.f32 %v367_v21 }
 0x2d4   :  { %4232 = vmatmul.msk.f32.vlgmr.msra.gmra.mxu3 %vm330_vm3, %v374_v22 }
 0x2d9   :  { %v4419_v24 = vpop.eup %4418 }
 0x2da   :  { %v655_v50 = vpop.xlane.xlu0 %654  ;;  %v375_v20 = vmul.f32 %v4419_v24, %v4403_v35 }
 0x2db   :  { %4420 = vrcp.f32 %v655_v50 }
 0x2dc   :  { %4233 = vmatmul.msk.f32.gmra.mxu3 %vm330_vm3, %v375_v20 }
 0x2df   :  { %v658_v25 = vpop.xlane.xlu2 %657 }
 0x2e0   :  { %4422 = vrcp.f32 %v658_v25 }
 0x2e1   :  { %v4421_v23 = vpop.eup %4420 }
 0x2e2   :  { %v746_v26 = vpop.permute.xlu1 %745  ;;  %v669_v27 = vmul.f32 %v4421_v23, %v4405_v40 }
 0x2e3   :  { %4245 = vmatpush.msk.msra.mxu0 %vm406_vm2, %v746_v26 }
 0x2e4   :  { %v673_v28 = vadd.f32 %v669_v27, %v372_v49 }
 0x2e6   :  { %v4423_v30 = vpop.eup %4422  ;;  %v779_v31 = vmul.f32 0.5, %v673_v28 }
 0x2e7   :  { %v670_v29 = vmul.f32 %v4423_v30, %v4973_v42 }
 0x2e8   :  { %783 = vst.msk [vmem:[%s6836_s5] sm:$0xff] %vm330_vm3, %v779_v31  ;;  %v4378_v31 = vld [vmem:[%s6838_s2] ss:$0 sm:$0xff] }
 0x2e9   :  { %v674_v32 = vadd.f32 %v670_v29, %v373_v62 }
 0x2eb   :  { %v780_v33 = vmul.f32 0.5, %v674_v32 }
 0x2ed   :  { %v693_v34 = vpop.permute.xlu0 %692  ;;  %784 = vst.msk [vmem:[%s6836_s5 + $0x8] sm:$0x3f] %vm334_vm4, %v780_v33 }
 0x2ee   :  { %720 = vmatpush.msrb.mxu3 %v693_v34 }
 0x2ef   :  { %4243 = vmatmul.msk.f32.vlgmr.msrb.gmra.mxu3 %vm330_vm3, %v669_v27 }
 0x2f7   :  { %4244 = vmatmul.msk.f32.gmra.mxu3 %vm330_vm3, %v670_v29 }
 0x310   :  { %v664_v35 = vpop.xlane.xlu2 %663 }
 0x311   :  { %4424 = vrcp.f32 %v664_v35 }
 0x317   :  { %v4425_v36 = vpop.eup %4424 }
 0x318   :  { %v744_v37 = vpop.permute.xlu2 %743  ;;  %v661_v38 = vpop.xlane.xlu0 %660  ;;  %v672_v39 = vmul.f32 %v4425_v36, %v4409_v59  ;;  %v822_v59 = vld [vmem:[%s6837_s3 + $0x8] sm:$0xff] }
 0x319   :  { %771 = vmatpush.msra.mxu0 %v744_v37  ;;  %4426 = vrcp.f32 %v661_v38  ;;  %876 = vmatpush.msra.mxu1 %v822_v59 }
 0x31a   :  { %v676_v40 = vadd.f32 %v672_v39, %v375_v20 }
 0x31b   :  { %877 = vmatpush.msra.mxu1 %v821_v63 }
 0x31c   :  { %v782_v41 = vmul.f32 0.5, %v676_v40 }
 0x31e   :  { %786 = vst.msk [vmem:[%s6836_s5 + $0x18] sm:$0x3f] %vm334_vm4, %v782_v41 }
 0x31f   :  { %v4427_v42 = vpop.eup %4426 }
 0x320   :  { %v671_v43 = vmul.f32 %v4427_v42, %v4411_v0 }
 0x322   :  { %v675_v44 = vadd.f32 %v671_v43, %v374_v22  ;;  %4246 = vmatmul.msk.f32.vlgmr.msra.gmra.mxu0 %vm330_vm3, %v671_v43 }
 0x324   :  { %v781_v45 = vmul.f32 0.5, %v675_v44 }
 0x326   :  { %785 = vst.msk [vmem:[%s6836_s5 + $0x10] sm:$0xff] %vm330_vm3, %v781_v45 }
 0x32a   :  { %4247 = vmatmul.msk.f32.gmra.mxu0 %vm330_vm3, %v672_v39 }
 0x337   :  { %v426_v53 = vpop.f32.mrf.mxu0 }
 0x33f   :  { %v429_v54 = vpop.f32.mrf.mxu0 }
 0x357   :  { %v477_v46 = vpop.f32.mrf.mxu3 }
 0x35f   :  { %v480_v47 = vpop.f32.mrf.mxu3 }
 0x372   :  { %v722_v48 = vpop.f32.mrf.mxu3 }
 0x373   :  { %791 = vrot.lane.b32.xlu1 %v722_v48, %s6817_s26 }
 0x37a   :  { %v725_v52 = vpop.f32.mrf.mxu3 }
 0x37b   :  { %793 = vrot.lane.b32.xlu0 %v725_v52, %s6817_s26 }
 0x39f   :  { %v773_v55 = vpop.f32.mrf.mxu0 }
 0x3a0   :  { %795 = vrot.lane.b32.xlu1 %v773_v55, %s6817_s26 }
 0x3a7   :  { %v776_v56 = vpop.f32.mrf.mxu0 }
 0x3a8   :  { %797 = vrot.lane.b32.xlu2 %v776_v56, %s6817_s26 }
 0x3e5   :  { %v792_v0 = vpop.permute.xlu1 %791 }
 0x3e6   :  { %v803_v61 = vsel %vm225_vm1, %v426_v53, %v792_v0 }
 0x3e7   :  { %v811_v1 = vrot.slane %v803_v61, 2  ;;  %v812_v8 = vrot.slane %v803_v61, 4  ;;  %v813_v4 = vrot.slane %v803_v61, 6  ;;  %829 = vst [vmem:[#allocation1] ss:$4 sm:$0xff] %v803_v61 }
 0x3e9   :  { %831 = vst [vmem:[#allocation1 + $0x1] ss:$4 sm:$0xff] %v811_v1  ;;  %v4552_v1 = vmov 32.0  }
 0x3ea   :  { %833 = vst [vmem:[#allocation1 + $0x2] ss:$4 sm:$0xff] %v812_v8  ;;  %4428 = vrcp.f32 %v4552_v1 }
 0x3eb   :  { %835 = vst [vmem:[#allocation1 + $0x3] ss:$4 sm:$0xff] %v813_v4 }
 0x3ed   :  { %v794_v60 = vpop.permute.xlu0 %793 }
 0x3ee   :  { %v804_v49 = vsel %vm225_vm1, %v429_v54, %v794_v60  ;;  %v4553_v60 = vmov 269488144  }
 0x3ef   :  { %v814_v51 = vrot.slane %v804_v49, 2  ;;  %v815_v62 = vrot.slane %v804_v49, 4  ;;  %837 = vst [vmem:[#allocation1 + $0x20] ss:$4 sm:$0xff] %v804_v49  ;;  %v1001_v49 = vunpack.c.l.s4 %v4553_v60 }
 0x3f1   :  { %839 = vst [vmem:[#allocation1 + $0x21] ss:$4 sm:$0xff] %v814_v51  ;;  %v4554_v51 = vmov 842150450  }
 0x3f2   :  { %v844_v15 = vld.sshfl [vmem:[#allocation1] sm:$0xff pattern:$0x73625140]  ;;  %841 = vst [vmem:[#allocation1 + $0x22] ss:$4 sm:$0xff] %v815_v62  ;;  %v1005_v62 = vunpack.c.l.s4 %v4554_v51 }
 0x3f3   :  { %4248 = vmatmul.msk.f32.vlgmr.msra.gmra.mxu1 %vm139_vm0, %v844_v15  ;;  %v4555_v15 = vmov 1414812756  }
 0x402   :  { %v798_v19 = vpop.permute.xlu2 %797 }
 0x403   :  { %v806_v21 = vsel %vm225_vm1, %v480_v47, %v798_v19  ;;  %v1009_v19 = vunpack.c.l.s4 %v4555_v15 }
 0x404   :  { %849 = vst [vmem:[#allocation1 + $0x3] ss:$4 sm:$0xff] %v806_v21  ;;  %v819_v23 = vrot.slane %v806_v21, 2  ;;  %v820_v26 = vrot.slane %v806_v21, 4  ;;  %v4556_v21 = vmov 1987475062  }
 0x412   :  { %v796_v22 = vpop.permute.xlu1 %795 }
 0x413   :  { %v805_v24 = vsel %vm225_vm1, %v477_v46, %v796_v22  ;;  %v1013_v22 = vunpack.c.l.s4 %v4556_v21 }
 0x414   :  { %v816_v50 = vrot.slane %v805_v24, 2  ;;  %v817_v20 = vrot.slane %v805_v24, 4  ;;  %v818_v25 = vrot.slane %v805_v24, 6  ;;  %843 = vst [vmem:[#allocation1 + $0x23] ss:$4 sm:$0xff] %v805_v24 }
 0x416   :  { %846 = vst [vmem:[#allocation1] ss:$4 sm:$0xff] %v816_v50  ;;  %v5114_v50 = vunpack.c.0.s8 %v1001_v49 }
 0x417   :  { %847 = vst [vmem:[#allocation1 + $0x1] ss:$4 sm:$0xff] %v817_v20  ;;  %v5116_v20 = vunpack.c.0.s8 %v1005_v62 }
 0x418   :  { %848 = vst [vmem:[#allocation1 + $0x2] ss:$4 sm:$0xff] %v818_v25  ;;  %v5118_v25 = vunpack.c.0.s8 %v1009_v19 }
 0x41b   :  { %v845_v27 = vld.sshfl [vmem:[#allocation1 + $0x20] sm:$0xff pattern:$0x73625140] }
 0x41c   :  { %850 = vst [vmem:[#allocation1 + $0x20] ss:$4 sm:$0xff] %v819_v23  ;;  %4249 = vmatmul.msk.f32.gmra.mxu1 %vm139_vm0, %v845_v27  ;;  %v5120_v23 = vunpack.c.0.s8 %v1013_v22 }
 0x41d   :  { %851 = vst [vmem:[#allocation1 + $0x21] ss:$4 sm:$0xff] %v820_v26 }
 0x41f   :  { %v852_v28 = vld.sshfl [vmem:[#allocation1] sm:$0xff pattern:$0x73625140] }
 0x424   :  { %4250 = vmatmul.msk.f32.gmra.mxu1 %vm139_vm0, %v852_v28  ;;  %v853_v30 = vld.sshfl [vmem:[#allocation1 + $0x20] sm:$0xff pattern:$0x73625140] }
 0x42c   :  { %4251 = vmatmul.msk.f32.gmra.mxu1 %vm139_vm0, %v853_v30 }
 0x470   :  { %v879_v29 = vpop.f32.mrf.mxu1 }
 0x471   :  { %v880_v32 = vadd.f32 %v4378_v31, %v879_v29 }
 0x473   :  { %v895_v33 = vrot.slane %v880_v32, 2  ;;  %v896_v34 = vrot.slane %v880_v32, 4  ;;  %v897_v35 = vrot.slane %v880_v32, 6  ;;  %v5043_v36 = vadd.f32 %v880_v32, %v4691_v2 }
 0x475   :  { %v5047_v37 = vadd.f32 %v895_v33, %v82_v5  ;;  %v5051_v38 = vadd.f32 %v896_v34, %v83_v6  ;;  %v5055_v39 = vadd.f32 %v897_v35, %v84_v7  ;;  %943 = vst [vmem:[#allocation1] ss:$4 sm:$0xff] %v5043_v36 }
 0x477   :  { %945 = vst [vmem:[#allocation1 + $0x1] ss:$4 sm:$0xff] %v5047_v37 }
 0x478   :  { %947 = vst [vmem:[#allocation1 + $0x2] ss:$4 sm:$0xff] %v5051_v38 }
 0x479   :  { %949 = vst [vmem:[#allocation1 + $0x3] ss:$4 sm:$0xff] %v5055_v39 }
 0x480   :  { %v958_v40 = vld.sshfl [vmem:[#allocation1] sm:$0xff pattern:$0x73625140] }
 0x481   :  { %v972_v5 = vsel %vm139_vm0, %v958_v40, 0.0 }
 0x482   :  { %973 = vadd.xlane.f32.xlu1 %v972_v5 }
 0x499   :  { %v882_v41 = vpop.f32.mrf.mxu1 }
 0x49a   :  { %v883_v42 = vadd.f32 %v4378_v31, %v882_v41 }
 0x49c   :  { %v898_v6 = vrot.slane %v883_v42, 2  ;;  %v899_v43 = vrot.slane %v883_v42, 4  ;;  %v900_v44 = vrot.slane %v883_v42, 6  ;;  %v5063_v2 = vadd.f32 %v883_v42, %v4696_v3 }
 0x49e   :  { %v5067_v7 = vadd.f32 %v898_v6, %v85_v9  ;;  %v5071_v45 = vadd.f32 %v899_v43, %v86_v10  ;;  %v5074_v46 = vadd.f32 %v900_v44, %v4719_v11  ;;  %951 = vst [vmem:[#allocation1 + $0x20] ss:$4 sm:$0xff] %v5063_v2 }
 0x4a0   :  { %953 = vst [vmem:[#allocation1 + $0x21] ss:$4 sm:$0xff] %v5067_v7 }
 0x4a1   :  { %955 = vst [vmem:[#allocation1 + $0x22] ss:$4 sm:$0xff] %v5071_v45  ;;  %v885_v47 = vpop.f32.mrf.mxu1 }
 0x4a2   :  { %957 = vst [vmem:[#allocation1 + $0x23] ss:$4 sm:$0xff] %v5074_v46  ;;  %v886_v48 = vadd.f32 %v4378_v31, %v885_v47 }
 0x4a4   :  { %v901_v52 = vrot.slane %v886_v48, 2  ;;  %v902_v9 = vrot.slane %v886_v48, 4  ;;  %v903_v53 = vrot.slane %v886_v48, 6  ;;  %v5082_v3 = vadd.f32 %v886_v48, %v87_v12 }
 0x4a6   :  { %v5086_v10 = vadd.f32 %v901_v52, %v88_v13  ;;  %v5090_v54 = vadd.f32 %v902_v9, %v89_v14  ;;  %v5093_v55 = vadd.f32 %v903_v53, %v4733_v16  ;;  %960 = vst [vmem:[#allocation1] ss:$4 sm:$0xff] %v5082_v3 }
 0x4a8   :  { %961 = vst [vmem:[#allocation1 + $0x1] ss:$4 sm:$0xff] %v5086_v10 }
 0x4a9   :  { %v959_v56 = vld.sshfl [vmem:[#allocation1 + $0x20] sm:$0xff pattern:$0x73625140]  ;;  %962 = vst [vmem:[#allocation1 + $0x2] ss:$4 sm:$0xff] %v5090_v54  ;;  %v888_v12 = vpop.f32.mrf.mxu1 }
 0x4aa   :  { %963 = vst [vmem:[#allocation1 + $0x3] ss:$4 sm:$0xff] %v5093_v55  ;;  %v975_v13 = vsel %vm139_vm0, %v959_v56, 0.0  ;;  %v889_v57 = vadd.f32 %v4378_v31, %v888_v12 }
 0x4ab   :  { %976 = vadd.xlane.f32.xlu2 %v975_v13 }
 0x4ac   :  { %v904_v11 = vrot.slane %v889_v57, 2  ;;  %v5102_v14 = vadd.f32 %v889_v57, %v90_v17  ;;  %v4429_v17 = vpop.eup %4428 }
 0x4ad   :  { %v986_v8 = vmul.f32 32.0, %v4429_v17  ;;  %vm990_vm6 = vweird.f32 %v4429_v17 }
 0x4ae   :  { %v5106_v58 = vadd.f32 %v904_v11, %v91_v18  ;;  %964 = vst [vmem:[#allocation1 + $0x20] ss:$4 sm:$0xff] %v5102_v14 }
 0x4af   :  { %v987_v16 = vsub.f32 1.0, %v986_v8 }
 0x4b0   :  { %965 = vst [vmem:[#allocation1 + $0x21] ss:$4 sm:$0xff] %v5106_v58 }
 0x4b1   :  { %v966_v59 = vld.sshfl [vmem:[#allocation1] sm:$0xff pattern:$0x73625140]  ;;  %v988_v18 = vmul.f32 %v4429_v17, %v987_v16 }
 0x4b2   :  { %v978_v63 = vsel %vm139_vm0, %v966_v59, 0.0 }
 0x4b3   :  { %979 = vadd.xlane.f32.xlu0 %v978_v63  ;;  %v989_v4 = vadd.f32 %v4429_v17, %v988_v18 }
 0x4b5   :  { %v5112_v24 = vsel %vm990_vm6, %v4429_v17, %v989_v4 }
 0x4b7   :  { %v967_v0 = vld.sshfl [vmem:[#allocation1 + $0x20] sm:$0xff pattern:$0x73625140] }
 0x4b8   :  { %v982_v61 = vsel %vm981_vm5, %v967_v0, 0.0 }
 0x4b9   :  { %983 = vadd.xlane.f32.xlu1 %v982_v61 }
 0x4f5   :  { %v974_v26 = vpop.xlane.xlu1 %973 }
 0x4f6   :  { %v992_v27 = vmul.f32 %v5112_v24, %v974_v26 }
 0x4f8   :  { %v1003_v28 = vperm.slane %v992_v27, %v5114_v50  ;;  %v1007_v30 = vperm.slane %v992_v27, %v5116_v20  ;;  %v1011_v31 = vperm.slane %v992_v27, %v5118_v25  ;;  %v1015_v29 = vperm.slane %v992_v27, %v5120_v23 }
 0x4fa   :  { %v5128_v32 = vsub.f32 %v5043_v36, %v1003_v28  ;;  %v5131_v33 = vsub.f32 %v5047_v37, %v1007_v30  ;;  %v5134_v34 = vsub.f32 %v5051_v38, %v1011_v31  ;;  %v5137_v35 = vsub.f32 %v5055_v39, %v1015_v29  ;;  %v1340_v28 = vld [vmem:[%s6785_s8 + $0x18] sm:$0xff]  ;;  %v1339_v30 = vld [vmem:[%s6785_s8 + $0x10] sm:$0xff]  ;;  %v1338_v29 = vld [vmem:[%s6785_s8 + $0x8] sm:$0xff] }
 0x4fb   :  { %1404 = vmatpush.msra.mxu2 %v1340_v28 }
 0x4fc   :  { %v1084_v40 = vmul.f32 %v5128_v32, %v5128_v32  ;;  %v1085_v5 = vmul.f32 %v5131_v33, %v5131_v33  ;;  %v1086_v41 = vmul.f32 %v5134_v34, %v5134_v34  ;;  %v1087_v36 = vmul.f32 %v5137_v35, %v5137_v35 }
 0x4fd   :  { %1405 = vmatpush.msra.mxu2 %v1339_v30 }
 0x4fe   :  { %1112 = vst [vmem:[#allocation1] ss:$4 sm:$0xff] %v1084_v40 }
 0x4ff   :  { %1114 = vst [vmem:[#allocation1 + $0x1] ss:$4 sm:$0xff] %v1085_v5  ;;  %v1337_v5 = vld [vmem:[%s6785_s8] sm:$0xff]  ;;  %1406 = vmatpush.msra.mxu2 %v1338_v29 }
 0x500   :  { %1116 = vst [vmem:[#allocation1 + $0x2] ss:$4 sm:$0xff] %v1086_v41 }
 0x501   :  { %1118 = vst [vmem:[#allocation1 + $0x3] ss:$4 sm:$0xff] %v1087_v36  ;;  %1407 = vmatpush.msra.mxu2 %v1337_v5 }
 0x508   :  { %v1127_v37 = vld.sshfl [vmem:[#allocation1] sm:$0xff pattern:$0x73625140] }
 0x509   :  { %v1141_v38 = vsel %vm139_vm0, %v1127_v37, 0.0  ;;  %v5230_v37 = vld [vmem:[%s6839_s4] ss:$0 sm:$0xff] }
 0x50a   :  { %1142 = vadd.xlane.f32.xlu2 %v1141_v38 }
 0x51e   :  { %v977_v39 = vpop.xlane.xlu2 %976 }
 0x51f   :  { %v993_v42 = vmul.f32 %v5112_v24, %v977_v39  ;;  %v5235_v39 = vld [vmem:[%s6840_s6] ss:$0 sm:$0xff] }
 0x521   :  { %v1019_v6 = vperm.slane %v993_v42, %v5114_v50  ;;  %v1023_v43 = vperm.slane %v993_v42, %v5116_v20  ;;  %v1027_v44 = vperm.slane %v993_v42, %v5118_v25  ;;  %v1031_v47 = vperm.slane %v993_v42, %v5120_v23 }
 0x523   :  { %v5154_v48 = vsub.f32 %v5063_v2, %v1019_v6  ;;  %v5157_v52 = vsub.f32 %v5067_v7, %v1023_v43  ;;  %v5160_v9 = vsub.f32 %v5071_v45, %v1027_v44  ;;  %v5163_v53 = vsub.f32 %v5074_v46, %v1031_v47 }
 0x524   :  { %v5238_v6 = vrot.slane %v5230_v37, 2  ;;  %v5241_v43 = vrot.slane %v5230_v37, 4  ;;  %v5244_v44 = vrot.slane %v5230_v37, 6 }
 0x525   :  { %v1088_v56 = vmul.f32 %v5154_v48, %v5154_v48  ;;  %v1089_v12 = vmul.f32 %v5157_v52, %v5157_v52  ;;  %v1090_v13 = vmul.f32 %v5160_v9, %v5160_v9  ;;  %v1091_v2 = vmul.f32 %v5163_v53, %v5163_v53 }
 0x526   :  { %v980_v7 = vpop.xlane.xlu0 %979 }
 0x527   :  { %1120 = vst [vmem:[#allocation1 + $0x20] ss:$4 sm:$0xff] %v1088_v56  ;;  %v994_v45 = vmul.f32 %v5112_v24, %v980_v7  ;;  %v5251_v7 = vrot.slane %v5235_v39, 2 }
 0x528   :  { %1122 = vst [vmem:[#allocation1 + $0x21] ss:$4 sm:$0xff] %v1089_v12 }
 0x529   :  { %1124 = vst [vmem:[#allocation1 + $0x22] ss:$4 sm:$0xff] %v1090_v13  ;;  %v1035_v46 = vperm.slane %v994_v45, %v5114_v50  ;;  %v1039_v57 = vperm.slane %v994_v45, %v5116_v20  ;;  %v1043_v11 = vperm.slane %v994_v45, %v5118_v25  ;;  %v1047_v59 = vperm.slane %v994_v45, %v5120_v23 }
 0x52a   :  { %1126 = vst [vmem:[#allocation1 + $0x23] ss:$4 sm:$0xff] %v1091_v2  ;;  %v5254_v45 = vrot.slane %v5235_v39, 4 }
 0x52b   :  { %v5179_v63 = vsub.f32 %v5082_v3, %v1035_v46  ;;  %v5182_v0 = vsub.f32 %v5086_v10, %v1039_v57  ;;  %v5185_v61 = vsub.f32 %v5090_v54, %v1043_v11  ;;  %v5188_v1 = vsub.f32 %v5093_v55, %v1047_v59 }
 0x52c   :  { %v984_v17 = vpop.xlane.xlu1 %983 }
 0x52d   :  { %v1092_v8 = vmul.f32 %v5179_v63, %v5179_v63  ;;  %v1093_v16 = vmul.f32 %v5182_v0, %v5182_v0  ;;  %v1094_v3 = vmul.f32 %v5185_v61, %v5185_v61  ;;  %v1095_v10 = vmul.f32 %v5188_v1, %v5188_v1 }
 0x52e   :  { %v995_v18 = vmul.f32 %v5112_v24, %v984_v17  ;;  %v5261_v17 = vrot.slane %v5235_v39, 6 }
 0x52f   :  { %1129 = vst [vmem:[#allocation1] ss:$4 sm:$0xff] %v1092_v8 }
 0x530   :  { %1130 = vst [vmem:[#allocation1 + $0x1] ss:$4 sm:$0xff] %v1093_v16  ;;  %v1051_v54 = vperm.slane %v995_v18, %v5114_v50  ;;  %v1055_v55 = vperm.slane %v995_v18, %v5116_v20 }
 0x531   :  { %v1128_v4 = vld.sshfl [vmem:[#allocation1 + $0x20] sm:$0xff pattern:$0x73625140]  ;;  %1131 = vst [vmem:[#allocation1 + $0x2] ss:$4 sm:$0xff] %v1094_v3 }
 0x532   :  { %1132 = vst [vmem:[#allocation1 + $0x3] ss:$4 sm:$0xff] %v1095_v10  ;;  %v5202_v60 = vsub.f32 %v5102_v14, %v1051_v54  ;;  %v5205_v49 = vsub.f32 %v5106_v58, %v1055_v55  ;;  %v1144_v51 = vsel %vm139_vm0, %v1128_v4, 0.0 }
 0x533   :  { %1145 = vadd.xlane.f32.xlu0 %v1144_v51 }
 0x534   :  { %v1096_v62 = vmul.f32 %v5202_v60, %v5202_v60  ;;  %v1097_v15 = vmul.f32 %v5205_v49, %v5205_v49 }
 0x536   :  { %1133 = vst [vmem:[#allocation1 + $0x20] ss:$4 sm:$0xff] %v1096_v62 }
 0x537   :  { %1134 = vst [vmem:[#allocation1 + $0x21] ss:$4 sm:$0xff] %v1097_v15 }
 0x539   :  { %v1135_v19 = vld.sshfl [vmem:[#allocation1] sm:$0xff pattern:$0x73625140] }
 0x53a   :  { %v1147_v21 = vsel %vm139_vm0, %v1135_v19, 0.0 }
 0x53b   :  { %1148 = vadd.xlane.f32.xlu1 %v1147_v21 }
 0x53e   :  { %v1136_v14 = vld.sshfl [vmem:[#allocation1 + $0x20] sm:$0xff pattern:$0x73625140] }
 0x53f   :  { %v1150_v22 = vsel %vm981_vm5, %v1136_v14, 0.0 }
 0x540   :  { %1151 = vadd.xlane.f32.xlu2 %v1150_v22 }
 0x57d   :  { %v1143_v58 = vpop.xlane.xlu2 %1142 }
 0x57e   :  { %v1153_v26 = vmul.f32 %v1143_v58, %v5112_v24 }
 0x580   :  { %v1157_v27 = vadd.f32 1e-05, %v1153_v26 }
 0x582   :  { %4430 = vrsqrt.f32 %v1157_v27  ;;  %vm1167_vm8 = vweird.f32 %v1157_v27 }
 0x588   :  { %v4431_v31 = vpop.eup %4430 }
 0x589   :  { %v1162_v40 = vmul.f32 %v4431_v31, %v1157_v27  ;;  %vm1168_vm7 = vweird.f32 %v4431_v31 }
 0x58a   :  { %vm1169_vm9 = vmor %vm1167_vm8, %vm1168_vm7 }
 0x58b   :  { %v1163_v41 = vmul.f32 %v4431_v31, %v1162_v40 }
 0x58d   :  { %v1164_v36 = vmul.f32 0.5, %v1163_v41 }
 0x58f   :  { %v1165_v38 = vsub.f32 1.5, %v1164_v36 }
 0x591   :  { %v1166_v42 = vmul.f32 %v4431_v31, %v1165_v38 }
 0x593   :  { %v1170_v47 = vsel %vm1169_vm9, %v4431_v31, %v1166_v42  ;;  %vm1437_vm9 = vcmask 523264  }
 0x594   :  { %v1208_v56 = vperm.slane %v1170_v47, %v5114_v50  ;;  %v1212_v12 = vperm.slane %v1170_v47, %v5116_v20  ;;  %v1216_v13 = vperm.slane %v1170_v47, %v5118_v25  ;;  %v1220_v2 = vperm.slane %v1170_v47, %v5120_v23 }
 0x596   :  { %v1275_v46 = vmul.f32 %v1208_v56, %v5128_v32  ;;  %v1276_v57 = vmul.f32 %v1212_v12, %v5131_v33  ;;  %v1277_v11 = vmul.f32 %v1216_v13, %v5134_v34  ;;  %v1278_v59 = vmul.f32 %v1220_v2, %v5137_v35 }
 0x598   :  { %v1299_v8 = vmul.f32 %v5230_v37, %v1275_v46  ;;  %v1300_v16 = vmul.f32 %v5238_v6, %v1276_v57  ;;  %v1301_v3 = vmul.f32 %v5241_v43, %v1277_v11  ;;  %v1302_v10 = vmul.f32 %v5244_v44, %v1278_v59  ;;  %v1432_v59 = vld [vmem:[%s6786_s10 + $0x38] sm:$0xff] }
 0x599   :  { %1458 = vmatpush.msra.mxu3 %v1432_v59 }
 0x59a   :  { %v5268_v18 = vadd.f32 %v5235_v39, %v1299_v8  ;;  %v5271_v32 = vadd.f32 %v5251_v7, %v1300_v16  ;;  %v5274_v33 = vadd.f32 %v5254_v45, %v1301_v3  ;;  %v5277_v34 = vadd.f32 %v5261_v17, %v1302_v10  ;;  %v1431_v8 = vld [vmem:[%s6786_s10 + $0x30] sm:$0xff] }
 0x59b   :  { %1459 = vmatpush.msra.mxu3 %v1431_v8 }
 0x59c   :  { %1359 = vst [vmem:[#allocation1] ss:$4 sm:$0xff] %v5268_v18 }
 0x59d   :  { %1361 = vst [vmem:[#allocation1 + $0x1] ss:$4 sm:$0xff] %v5271_v32 }
 0x59e   :  { %1363 = vst [vmem:[#allocation1 + $0x2] ss:$4 sm:$0xff] %v5274_v33 }
 0x59f   :  { %1365 = vst [vmem:[#allocation1 + $0x3] ss:$4 sm:$0xff] %v5277_v34 }
 0x5a6   :  { %v1374_v35 = vld.sshfl [vmem:[#allocation1] sm:$0xff pattern:$0x73625140]  ;;  %v1146_v54 = vpop.xlane.xlu0 %1145 }
 0x5a7   :  { %4252 = vmatmul.msk.f32.vlgmr.msra.gmra.mxu2 %vm139_vm0, %v1374_v35  ;;  %v1154_v55 = vmul.f32 %v1146_v54, %v5112_v24 }
 0x5a9   :  { %v1158_v4 = vadd.f32 1e-05, %v1154_v55  ;;  %v1430_v55 = vld [vmem:[%s6786_s10 + $0x28] sm:$0xff] }
 0x5aa   :  { %1460 = vmatpush.msra.mxu3 %v1430_v55  ;;  %v4382_v55 = vld [vmem:[%s6787_s11] ss:$0 sm:$0xff] }
 0x5ab   :  { %4432 = vrsqrt.f32 %v1158_v4  ;;  %vm1177_vm11 = vweird.f32 %v1158_v4 }
 0x5ae   :  { %v1149_v51 = vpop.xlane.xlu1 %1148 }
 0x5af   :  { %v1155_v62 = vmul.f32 %v1149_v51, %v5112_v24 }
 0x5b1   :  { %v4433_v15 = vpop.eup %4432  ;;  %v1159_v19 = vadd.f32 1e-05, %v1155_v62 }
 0x5b2   :  { %v1172_v21 = vmul.f32 %v4433_v15, %v1158_v4  ;;  %vm1178_vm10 = vweird.f32 %v4433_v15 }
 0x5b3   :  { %4434 = vrsqrt.f32 %v1159_v19  ;;  %v1152_v14 = vpop.xlane.xlu2 %1151  ;;  %vm1179_vm12 = vmor %vm1177_vm11, %vm1178_vm10  ;;  %vm1187_vm14 = vweird.f32 %v1159_v19 }
 0x5b4   :  { %v1173_v22 = vmul.f32 %v4433_v15, %v1172_v21  ;;  %v1156_v58 = vmul.f32 %v1152_v14, %v5112_v24 }
 0x5b6   :  { %v1174_v26 = vmul.f32 0.5, %v1173_v22  ;;  %v5287_v27 = vadd.f32 1e-05, %v1156_v58  ;;  %v1429_v22 = vld [vmem:[%s6786_s10 + $0x20] sm:$0xff] }
 0x5b7   :  { %1461 = vmatpush.msra.mxu3 %v1429_v22 }
 0x5b8   :  { %v1175_v28 = vsub.f32 1.5, %v1174_v26  ;;  %4436 = vrsqrt.f32 %v5287_v27  ;;  %vm1197_vm7 = vweird.f32 %v5287_v27 }
 0x5b9   :  { %v4435_v30 = vpop.eup %4434 }
 0x5ba   :  { %v1176_v31 = vmul.f32 %v4433_v15, %v1175_v28  ;;  %v1182_v29 = vmul.f32 %v4435_v30, %v1159_v19  ;;  %vm1188_vm13 = vweird.f32 %v4435_v30 }
 0x5bb   :  { %vm1189_vm15 = vmor %vm1187_vm14, %vm1188_vm13 }
 0x5bc   :  { %v1180_v40 = vsel %vm1179_vm12, %v4433_v15, %v1176_v31  ;;  %v1183_v5 = vmul.f32 %v4435_v30, %v1182_v29  ;;  %v1428_v29 = vld [vmem:[%s6786_s10 + $0x18] sm:$0xff] }
 0x5bd   :  { %v1224_v41 = vperm.slane %v1180_v40, %v5114_v50  ;;  %v1228_v36 = vperm.slane %v1180_v40, %v5116_v20  ;;  %v1232_v38 = vperm.slane %v1180_v40, %v5118_v25  ;;  %v1236_v42 = vperm.slane %v1180_v40, %v5120_v23  ;;  %1462 = vmatpush.msra.mxu3 %v1428_v29 }
 0x5be   :  { %v4437_v47 = vpop.eup %4436  ;;  %v1184_v56 = vmul.f32 0.5, %v1183_v5 }
 0x5bf   :  { %v1279_v12 = vmul.f32 %v1224_v41, %v5154_v48  ;;  %v1280_v13 = vmul.f32 %v1228_v36, %v5157_v52  ;;  %v1281_v2 = vmul.f32 %v1232_v38, %v5160_v9  ;;  %v1282_v46 = vmul.f32 %v1236_v42, %v5163_v53 }
 0x5c0   :  { %v1185_v57 = vsub.f32 1.5, %v1184_v56  ;;  %v1192_v11 = vmul.f32 %v4437_v47, %v5287_v27  ;;  %vm1198_vm6 = vweird.f32 %v4437_v47 }
 0x5c1   :  { %v1303_v48 = vmul.f32 %v5230_v37, %v1279_v12  ;;  %v1304_v52 = vmul.f32 %v5238_v6, %v1280_v13  ;;  %v1305_v9 = vmul.f32 %v5241_v43, %v1281_v2  ;;  %v1306_v53 = vmul.f32 %v5244_v44, %v1282_v46  ;;  %vm1199_vm8 = vmor %vm1197_vm7, %vm1198_vm6 }
 0x5c2   :  { %v1186_v16 = vmul.f32 %v4435_v30, %v1185_v57  ;;  %v1193_v3 = vmul.f32 %v4437_v47, %v1192_v11 }
 0x5c3   :  { %v5310_v10 = vadd.f32 %v5235_v39, %v1303_v48  ;;  %v5313_v35 = vadd.f32 %v5251_v7, %v1304_v52  ;;  %v5316_v54 = vadd.f32 %v5254_v45, %v1305_v9  ;;  %v5323_v4 = vadd.f32 %v5261_v17, %v1306_v53 }
 0x5c4   :  { %v1190_v51 = vsel %vm1189_vm15, %v4435_v30, %v1186_v16  ;;  %v1194_v62 = vmul.f32 0.5, %v1193_v3 }
 0x5c5   :  { %1367 = vst [vmem:[#allocation1 + $0x20] ss:$4 sm:$0xff] %v5310_v10  ;;  %v1240_v15 = vperm.slane %v1190_v51, %v5114_v50  ;;  %v1244_v19 = vperm.slane %v1190_v51, %v5116_v20  ;;  %v1248_v21 = vperm.slane %v1190_v51, %v5118_v25  ;;  %v1252_v14 = vperm.slane %v1190_v51, %v5120_v23 }
 0x5c6   :  { %1369 = vst [vmem:[#allocation1 + $0x21] ss:$4 sm:$0xff] %v5313_v35  ;;  %v1195_v58 = vsub.f32 1.5, %v1194_v62 }
 0x5c7   :  { %1371 = vst [vmem:[#allocation1 + $0x22] ss:$4 sm:$0xff] %v5316_v54  ;;  %v1283_v26 = vmul.f32 %v1240_v15, %v5179_v63  ;;  %v1284_v28 = vmul.f32 %v1244_v19, %v5182_v0  ;;  %v1285_v30 = vmul.f32 %v1248_v21, %v5185_v61  ;;  %v1286_v31 = vmul.f32 %v1252_v14, %v5188_v1 }
 0x5c8   :  { %1373 = vst [vmem:[#allocation1 + $0x23] ss:$4 sm:$0xff] %v5323_v4  ;;  %v1196_v40 = vmul.f32 %v4437_v47, %v1195_v58 }
 0x5c9   :  { %v1307_v5 = vmul.f32 %v5230_v37, %v1283_v26  ;;  %v1308_v63 = vmul.f32 %v5238_v6, %v1284_v28  ;;  %v1309_v0 = vmul.f32 %v5241_v43, %v1285_v30  ;;  %v1310_v61 = vmul.f32 %v5244_v44, %v1286_v31 }
 0x5ca   :  { %v1200_v1 = vsel %vm1199_vm8, %v4437_v47, %v1196_v40 }
 0x5cb   :  { %v5350_v41 = vadd.f32 %v5235_v39, %v1307_v5  ;;  %v5353_v36 = vadd.f32 %v5251_v7, %v1308_v63  ;;  %v5356_v27 = vadd.f32 %v5254_v45, %v1309_v0  ;;  %v5359_v38 = vadd.f32 %v5261_v17, %v1310_v61 }
 0x5cc   :  { %v1256_v43 = vperm.slane %v1200_v1, %v5114_v50  ;;  %v1260_v44 = vperm.slane %v1200_v1, %v5116_v20 }
 0x5cd   :  { %1376 = vst [vmem:[#allocation1] ss:$4 sm:$0xff] %v5350_v41 }
 0x5ce   :  { %1377 = vst [vmem:[#allocation1 + $0x1] ss:$4 sm:$0xff] %v5353_v36  ;;  %v1287_v42 = vmul.f32 %v1256_v43, %v5202_v60  ;;  %v1288_v47 = vmul.f32 %v1260_v44, %v5205_v49 }
 0x5cf   :  { %v1375_v56 = vld.sshfl [vmem:[#allocation1 + $0x20] sm:$0xff pattern:$0x73625140]  ;;  %1378 = vst [vmem:[#allocation1 + $0x2] ss:$4 sm:$0xff] %v5356_v27 }
 0x5d0   :  { %1379 = vst [vmem:[#allocation1 + $0x3] ss:$4 sm:$0xff] %v5359_v38  ;;  %v1311_v45 = vmul.f32 %v5230_v37, %v1287_v42  ;;  %v1312_v17 = vmul.f32 %v5238_v6, %v1288_v47  ;;  %4253 = vmatmul.msk.f32.gmra.mxu2 %vm139_vm0, %v1375_v56  ;;  %v1427_v37 = vld [vmem:[%s6786_s10 + $0x10] sm:$0xff]  ;;  %v1425_v6 = vld [vmem:[%s6786_s10] sm:$0xff] }
 0x5d1   :  { %1463 = vmatpush.msra.mxu3 %v1427_v37 }
 0x5d2   :  { %v5373_v12 = vadd.f32 %v5235_v39, %v1311_v45  ;;  %v5376_v13 = vadd.f32 %v5251_v7, %v1312_v17  ;;  %v1426_v39 = vld [vmem:[%s6786_s10 + $0x8] sm:$0xff]  ;;  %v4381_v7 = vld [vmem:[%s6784_s9] ss:$0 sm:$0xff] }
 0x5d3   :  { %1464 = vmatpush.msra.mxu3 %v1426_v39 }
 0x5d4   :  { %1380 = vst [vmem:[#allocation1 + $0x20] ss:$4 sm:$0xff] %v5373_v12 }
 0x5d5   :  { %1381 = vst [vmem:[#allocation1 + $0x21] ss:$4 sm:$0xff] %v5376_v13  ;;  %1465 = vmatpush.msra.mxu3 %v1425_v6 }
 0x5d7   :  { %v1382_v60 = vld.sshfl [vmem:[#allocation1] sm:$0xff pattern:$0x73625140] }
 0x5d8   :  { %4254 = vmatmul.msk.f32.gmra.mxu2 %vm139_vm0, %v1382_v60 }
 0x5dc   :  { %v1383_v49 = vld.sshfl [vmem:[#allocation1 + $0x20] sm:$0xff pattern:$0x73625140] }
 0x5e0   :  { %4255 = vmatmul.msk.f32.gmra.mxu2 %vm139_vm0, %v1383_v49 }
 0x62a   :  { %v1409_v2 = vpop.f32.mrf.mxu2 }
 0x62b   :  { %v1410_v46 = vadd.f32 %v4381_v7, %v1409_v2 }
 0x62d   :  { %v1421_v57 = vmax.f32 %v1410_v46, 0.0 }
 0x62f   :  { %4256 = vmatmul.msk.f32.vlgmr.msra.gmra.mxu3 %vm1437_vm9, %v1421_v57 }
 0x653   :  { %v1412_v11 = vpop.f32.mrf.mxu2 }
 0x654   :  { %v1413_v59 = vadd.f32 %v4381_v7, %v1412_v11 }
 0x656   :  { %v1422_v8 = vmax.f32 %v1413_v59, 0.0 }
 0x658   :  { %4257 = vmatmul.msk.f32.gmra.mxu3 %vm1437_vm9, %v1422_v8 }
 0x65b   :  { %v1415_v48 = vpop.f32.mrf.mxu2 }
 0x65c   :  { %v1416_v52 = vadd.f32 %v4381_v7, %v1415_v48 }
 0x65e   :  { %v1423_v9 = vmax.f32 %v1416_v52, 0.0 }
 0x660   :  { %4258 = vmatmul.msk.f32.gmra.mxu3 %vm1437_vm9, %v1423_v9 }
 0x663   :  { %v1418_v53 = vpop.f32.mrf.mxu2 }
 0x664   :  { %v1419_v16 = vadd.f32 %v4381_v7, %v1418_v53 }
 0x666   :  { %v1424_v3 = vmax.f32 %v1419_v16, 0.0 }
 0x668   :  { %4259 = vmatmul.msk.f32.gmra.mxu3 %vm1437_vm9, %v1424_v3 }
 0x6b2   :  { %v1467_v51 = vpop.f32.mrf.mxu3 }
 0x6b3   :  { %v1468_v62 = vadd.f32 %v4382_v55, %v1467_v51 }
 0x6b5   :  { %v1483_v15 = vrot.slane %v1468_v62, 2  ;;  %v1484_v19 = vrot.slane %v1468_v62, 4  ;;  %v1485_v21 = vrot.slane %v1468_v62, 6  ;;  %v1503_v14 = vadd.f32 %v1468_v62, %v5268_v18 }
 0x6b7   :  { %v1504_v22 = vadd.f32 %v1483_v15, %v5271_v32  ;;  %v1505_v58 = vadd.f32 %v1484_v19, %v5274_v33  ;;  %v1506_v26 = vadd.f32 %v1485_v21, %v5277_v34  ;;  %1531 = vst [vmem:[#allocation1] ss:$4 sm:$0xff] %v1503_v14 }
 0x6b9   :  { %1533 = vst [vmem:[#allocation1 + $0x1] ss:$4 sm:$0xff] %v1504_v22 }
 0x6ba   :  { %1535 = vst [vmem:[#allocation1 + $0x2] ss:$4 sm:$0xff] %v1505_v58 }
 0x6bb   :  { %1537 = vst [vmem:[#allocation1 + $0x3] ss:$4 sm:$0xff] %v1506_v26 }
 0x6c2   :  { %v1546_v28 = vld.sshfl [vmem:[#allocation1] sm:$0xff pattern:$0x73625140] }
 0x6c3   :  { %v1560_v30 = vsel %vm139_vm0, %v1546_v28, 0.0 }
 0x6c4   :  { %1561 = vadd.xlane.f32.xlu0 %v1560_v30 }
 0x6db   :  { %v1470_v31 = vpop.f32.mrf.mxu3 }
 0x6dc   :  { %v1471_v29 = vadd.f32 %v4382_v55, %v1470_v31 }
 0x6de   :  { %v1486_v40 = vrot.slane %v1471_v29, 2  ;;  %v1487_v5 = vrot.slane %v1471_v29, 4  ;;  %v1488_v63 = vrot.slane %v1471_v29, 6  ;;  %v5407_v18 = vadd.f32 %v1471_v29, %v5310_v10 }
 0x6e0   :  { %v5410_v32 = vadd.f32 %v1486_v40, %v5313_v35  ;;  %v5413_v33 = vadd.f32 %v1487_v5, %v5316_v54  ;;  %v5416_v34 = vadd.f32 %v1488_v63, %v5323_v4  ;;  %1539 = vst [vmem:[#allocation1 + $0x20] ss:$4 sm:$0xff] %v5407_v18 }
 0x6e2   :  { %1541 = vst [vmem:[#allocation1 + $0x21] ss:$4 sm:$0xff] %v5410_v32 }
 0x6e3   :  { %1543 = vst [vmem:[#allocation1 + $0x22] ss:$4 sm:$0xff] %v5413_v33  ;;  %v1473_v0 = vpop.f32.mrf.mxu3 }
 0x6e4   :  { %1545 = vst [vmem:[#allocation1 + $0x23] ss:$4 sm:$0xff] %v5416_v34  ;;  %v1474_v10 = vadd.f32 %v4382_v55, %v1473_v0 }
 0x6e6   :  { %v1489_v61 = vrot.slane %v1474_v10, 2  ;;  %v1490_v1 = vrot.slane %v1474_v10, 4  ;;  %v1491_v35 = vrot.slane %v1474_v10, 6  ;;  %v5423_v43 = vadd.f32 %v1474_v10, %v5350_v41 }
 0x6e8   :  { %v5426_v54 = vadd.f32 %v1489_v61, %v5353_v36  ;;  %v5429_v4 = vadd.f32 %v1490_v1, %v5356_v27  ;;  %v5432_v44 = vadd.f32 %v1491_v35, %v5359_v38  ;;  %1548 = vst [vmem:[#allocation1] ss:$4 sm:$0xff] %v5423_v43 }
 0x6ea   :  { %1549 = vst [vmem:[#allocation1 + $0x1] ss:$4 sm:$0xff] %v5426_v54 }
 0x6eb   :  { %v1547_v42 = vld.sshfl [vmem:[#allocation1 + $0x20] sm:$0xff pattern:$0x73625140]  ;;  %1550 = vst [vmem:[#allocation1 + $0x2] ss:$4 sm:$0xff] %v5429_v4  ;;  %v1476_v47 = vpop.f32.mrf.mxu3 }
 0x6ec   :  { %1551 = vst [vmem:[#allocation1 + $0x3] ss:$4 sm:$0xff] %v5432_v44  ;;  %v1563_v41 = vsel %vm139_vm0, %v1547_v42, 0.0  ;;  %v1477_v36 = vadd.f32 %v4382_v55, %v1476_v47 }
 0x6ed   :  { %1564 = vadd.xlane.f32.xlu1 %v1563_v41 }
 0x6ee   :  { %v1492_v56 = vrot.slane %v1477_v36, 2  ;;  %v5440_v27 = vadd.f32 %v1477_v36, %v5373_v12 }
 0x6f0   :  { %v5443_v38 = vadd.f32 %v1492_v56, %v5376_v13  ;;  %1552 = vst [vmem:[#allocation1 + $0x20] ss:$4 sm:$0xff] %v5440_v27 }
 0x6f2   :  { %1553 = vst [vmem:[#allocation1 + $0x21] ss:$4 sm:$0xff] %v5443_v38 }
 0x6f3   :  { %v1554_v45 = vld.sshfl [vmem:[#allocation1] sm:$0xff pattern:$0x73625140] }
 0x6f4   :  { %v1566_v17 = vsel %vm139_vm0, %v1554_v45, 0.0 }
 0x6f5   :  { %1567 = vadd.xlane.f32.xlu2 %v1566_v17 }
 0x6f9   :  { %v1555_v60 = vld.sshfl [vmem:[#allocation1 + $0x20] sm:$0xff pattern:$0x73625140] }
 0x6fa   :  { %v1569_v49 = vsel %vm981_vm5, %v1555_v60, 0.0 }
 0x6fb   :  { %1570 = vadd.xlane.f32.xlu0 %v1569_v49 }
 0x737   :  { %v1562_v37 = vpop.xlane.xlu0 %1561 }
 0x738   :  { %v1572_v39 = vmul.f32 %v1562_v37, %v5112_v24 }
 0x73a   :  { %v1583_v12 = vperm.slane %v1572_v39, %v5114_v50  ;;  %v1587_v13 = vperm.slane %v1572_v39, %v5116_v20  ;;  %v1591_v6 = vperm.slane %v1572_v39, %v5118_v25  ;;  %v1595_v7 = vperm.slane %v1572_v39, %v5120_v23 }
 0x73c   :  { %v5454_v2 = vsub.f32 %v1503_v14, %v1583_v12  ;;  %v5456_v46 = vsub.f32 %v1504_v22, %v1587_v13  ;;  %v5458_v57 = vsub.f32 %v1505_v58, %v1591_v6  ;;  %v5460_v11 = vsub.f32 %v1506_v26, %v1595_v7  ;;  %v4263_v12 = vld [vmem:[%s6832_s27 + $0x38] sm:$0xff]  ;;  %v4262_v13 = vld [vmem:[%s6832_s27 + $0x30] sm:$0xff]  ;;  %v4261_v7 = vld [vmem:[%s6832_s27 + $0x28] sm:$0xff] }
 0x73d   :  { %1986 = vmatpush.msrb.mxu0 %v4263_v12 }
 0x73e   :  { %v1664_v59 = vmul.f32 %v5454_v2, %v5454_v2  ;;  %v1665_v8 = vmul.f32 %v5456_v46, %v5456_v46  ;;  %v1666_v48 = vmul.f32 %v5458_v57, %v5458_v57  ;;  %v1667_v52 = vmul.f32 %v5460_v11, %v5460_v11 }
 0x73f   :  { %1987 = vmatpush.msrb.mxu0 %v4262_v13 }
 0x740   :  { %1692 = vst [vmem:[#allocation1] ss:$4 sm:$0xff] %v1664_v59 }
 0x741   :  { %1694 = vst [vmem:[#allocation1 + $0x1] ss:$4 sm:$0xff] %v1665_v8  ;;  %v4260_v8 = vld [vmem:[%s6832_s27 + $0x20] sm:$0xff]  ;;  %1988 = vmatpush.msrb.mxu0 %v4261_v7 }
 0x742   :  { %1696 = vst [vmem:[#allocation1 + $0x2] ss:$4 sm:$0xff] %v1666_v48 }
 0x743   :  { %1698 = vst [vmem:[#allocation1 + $0x3] ss:$4 sm:$0xff] %v1667_v52  ;;  %1989 = vmatpush.msrb.mxu0 %v4260_v8 }
 0x74a   :  { %v1707_v9 = vld.sshfl [vmem:[#allocation1] sm:$0xff pattern:$0x73625140] }
 0x74b   :  { %v1721_v53 = vsel %vm139_vm0, %v1707_v9, 0.0  ;;  %v5553_v9 = vld [vmem:[%s6788_s12] ss:$0 sm:$0xff] }
 0x74c   :  { %1722 = vadd.xlane.f32.xlu1 %v1721_v53 }
 0x760   :  { %v1565_v16 = vpop.xlane.xlu1 %1564 }
 0x761   :  { %v1573_v3 = vmul.f32 %v1565_v16, %v5112_v24  ;;  %v5558_v16 = vld [vmem:[%s6789_s13] ss:$0 sm:$0xff] }
 0x763   :  { %v1599_v55 = vperm.slane %v1573_v3, %v5114_v50  ;;  %v1603_v51 = vperm.slane %v1573_v3, %v5116_v20  ;;  %v1607_v62 = vperm.slane %v1573_v3, %v5118_v25  ;;  %v1611_v15 = vperm.slane %v1573_v3, %v5120_v23 }
 0x765   :  { %v5477_v19 = vsub.f32 %v5407_v18, %v1599_v55  ;;  %v5480_v21 = vsub.f32 %v5410_v32, %v1603_v51  ;;  %v5483_v14 = vsub.f32 %v5413_v33, %v1607_v62  ;;  %v5486_v22 = vsub.f32 %v5416_v34, %v1611_v15 }
 0x766   :  { %v5561_v55 = vrot.slane %v5553_v9, 2  ;;  %v5564_v51 = vrot.slane %v5553_v9, 4  ;;  %v5567_v62 = vrot.slane %v5553_v9, 6 }
 0x767   :  { %v1668_v58 = vmul.f32 %v5477_v19, %v5477_v19  ;;  %v1669_v26 = vmul.f32 %v5480_v21, %v5480_v21  ;;  %v1670_v28 = vmul.f32 %v5483_v14, %v5483_v14  ;;  %v1671_v30 = vmul.f32 %v5486_v22, %v5486_v22 }
 0x768   :  { %v1568_v31 = vpop.xlane.xlu2 %1567 }
 0x769   :  { %1700 = vst [vmem:[#allocation1 + $0x20] ss:$4 sm:$0xff] %v1668_v58  ;;  %v1574_v29 = vmul.f32 %v1568_v31, %v5112_v24  ;;  %v5574_v31 = vrot.slane %v5558_v16, 2 }
 0x76a   :  { %1702 = vst [vmem:[#allocation1 + $0x21] ss:$4 sm:$0xff] %v1669_v26 }
 0x76b   :  { %1704 = vst [vmem:[#allocation1 + $0x22] ss:$4 sm:$0xff] %v1670_v28  ;;  %v1615_v40 = vperm.slane %v1574_v29, %v5114_v50  ;;  %v1619_v5 = vperm.slane %v1574_v29, %v5116_v20  ;;  %v1623_v63 = vperm.slane %v1574_v29, %v5118_v25  ;;  %v1627_v18 = vperm.slane %v1574_v29, %v5120_v23 }
 0x76c   :  { %1706 = vst [vmem:[#allocation1 + $0x23] ss:$4 sm:$0xff] %v1671_v30  ;;  %v5577_v29 = vrot.slane %v5558_v16, 4 }
 0x76d   :  { %v5502_v32 = vsub.f32 %v5423_v43, %v1615_v40  ;;  %v5505_v33 = vsub.f32 %v5426_v54, %v1619_v5  ;;  %v5508_v34 = vsub.f32 %v5429_v4, %v1623_v63  ;;  %v5511_v0 = vsub.f32 %v5432_v44, %v1627_v18 }
 0x76e   :  { %v1571_v10 = vpop.xlane.xlu0 %1570 }
 0x76f   :  { %v1672_v61 = vmul.f32 %v5502_v32, %v5502_v32  ;;  %v1673_v1 = vmul.f32 %v5505_v33, %v5505_v33  ;;  %v1674_v35 = vmul.f32 %v5508_v34, %v5508_v34  ;;  %v1675_v43 = vmul.f32 %v5511_v0, %v5511_v0 }
 0x770   :  { %v1575_v54 = vmul.f32 %v1571_v10, %v5112_v24  ;;  %v5584_v10 = vrot.slane %v5558_v16, 6 }
 0x771   :  { %1709 = vst [vmem:[#allocation1] ss:$4 sm:$0xff] %v1672_v61 }
 0x772   :  { %1710 = vst [vmem:[#allocation1 + $0x1] ss:$4 sm:$0xff] %v1673_v1  ;;  %v1631_v4 = vperm.slane %v1575_v54, %v5114_v50  ;;  %v1635_v44 = vperm.slane %v1575_v54, %v5116_v20 }
 0x773   :  { %v1708_v42 = vld.sshfl [vmem:[#allocation1 + $0x20] sm:$0xff pattern:$0x73625140]  ;;  %1711 = vst [vmem:[#allocation1 + $0x2] ss:$4 sm:$0xff] %v1674_v35 }
 0x774   :  { %1712 = vst [vmem:[#allocation1 + $0x3] ss:$4 sm:$0xff] %v1675_v43  ;;  %v5525_v47 = vsub.f32 %v5440_v27, %v1631_v4  ;;  %v5528_v41 = vsub.f32 %v5443_v38, %v1635_v44  ;;  %v1724_v36 = vsel %vm139_vm0, %v1708_v42, 0.0 }
 0x775   :  { %1725 = vadd.xlane.f32.xlu2 %v1724_v36 }
 0x776   :  { %v1676_v56 = vmul.f32 %v5525_v47, %v5525_v47  ;;  %v1677_v45 = vmul.f32 %v5528_v41, %v5528_v41 }
 0x778   :  { %1713 = vst [vmem:[#allocation1 + $0x20] ss:$4 sm:$0xff] %v1676_v56 }
 0x779   :  { %1714 = vst [vmem:[#allocation1 + $0x21] ss:$4 sm:$0xff] %v1677_v45 }
 0x77b   :  { %v1715_v17 = vld.sshfl [vmem:[#allocation1] sm:$0xff pattern:$0x73625140] }
 0x77c   :  { %v1727_v60 = vsel %vm139_vm0, %v1715_v17, 0.0 }
 0x77d   :  { %1728 = vadd.xlane.f32.xlu0 %v1727_v60 }
 0x780   :  { %v1716_v27 = vld.sshfl [vmem:[#allocation1 + $0x20] sm:$0xff pattern:$0x73625140] }
 0x781   :  { %v1730_v49 = vsel %vm981_vm5, %v1716_v27, 0.0 }
 0x782   :  { %1731 = vadd.xlane.f32.xlu1 %v1730_v49 }
 0x7bf   :  { %v1723_v38 = vpop.xlane.xlu1 %1722 }
 0x7c0   :  { %v1733_v37 = vmul.f32 %v1723_v38, %v5112_v24 }
 0x7c2   :  { %v1737_v39 = vadd.f32 1e-05, %v1733_v37 }
 0x7c4   :  { %4438 = vrsqrt.f32 %v1737_v39  ;;  %vm1747_vm11 = vweird.f32 %v1737_v39 }
 0x7ca   :  { %v4439_v6 = vpop.eup %4438 }
 0x7cb   :  { %v1742_v59 = vmul.f32 %v4439_v6, %v1737_v39  ;;  %vm1748_vm10 = vweird.f32 %v4439_v6 }
 0x7cc   :  { %vm1749_vm12 = vmor %vm1747_vm11, %vm1748_vm10 }
 0x7cd   :  { %v1743_v48 = vmul.f32 %v4439_v6, %v1742_v59 }
 0x7cf   :  { %v1744_v52 = vmul.f32 0.5, %v1743_v48 }
 0x7d1   :  { %v1745_v53 = vsub.f32 1.5, %v1744_v52 }
 0x7d3   :  { %v1746_v3 = vmul.f32 %v4439_v6, %v1745_v53 }
 0x7d5   :  { %v1750_v15 = vsel %vm1749_vm12, %v4439_v6, %v1746_v3 }
 0x7d6   :  { %v1788_v58 = vperm.slane %v1750_v15, %v5114_v50  ;;  %v1792_v26 = vperm.slane %v1750_v15, %v5116_v20  ;;  %v1796_v28 = vperm.slane %v1750_v15, %v5118_v25  ;;  %v1800_v30 = vperm.slane %v1750_v15, %v5120_v23 }
 0x7d8   :  { %v1855_v40 = vmul.f32 %v1788_v58, %v5454_v2  ;;  %v1856_v5 = vmul.f32 %v1792_v26, %v5456_v46  ;;  %v1857_v63 = vmul.f32 %v1796_v28, %v5458_v57  ;;  %v1858_v18 = vmul.f32 %v1800_v30, %v5460_v11 }
 0x7da   :  { %v1879_v61 = vmul.f32 %v5553_v9, %v1855_v40  ;;  %v1880_v1 = vmul.f32 %v5561_v55, %v1856_v5  ;;  %v1881_v35 = vmul.f32 %v5564_v51, %v1857_v63  ;;  %v1882_v43 = vmul.f32 %v5567_v62, %v1858_v18 }
 0x7dc   :  { %v5591_v54 = vadd.f32 %v5558_v16, %v1879_v61  ;;  %v5594_v2 = vadd.f32 %v5574_v31, %v1880_v1  ;;  %v5597_v46 = vadd.f32 %v5577_v29, %v1881_v35  ;;  %v5600_v57 = vadd.f32 %v5584_v10, %v1882_v43 }
 0x7de   :  { %1941 = vst [vmem:[#allocation1] ss:$4 sm:$0xff] %v5591_v54 }
 0x7df   :  { %1943 = vst [vmem:[#allocation1 + $0x1] ss:$4 sm:$0xff] %v5594_v2 }
 0x7e0   :  { %1945 = vst [vmem:[#allocation1 + $0x2] ss:$4 sm:$0xff] %v5597_v46 }
 0x7e1   :  { %1947 = vst [vmem:[#allocation1 + $0x3] ss:$4 sm:$0xff] %v5600_v57 }
 0x7e8   :  { %v1956_v11 = vld.sshfl [vmem:[#allocation1] sm:$0xff pattern:$0x73625140]  ;;  %v1726_v4 = vpop.xlane.xlu2 %1725 }
 0x7e9   :  { %4265 = vmatmul.msk.f32.vlgmr.msrb.gmra.mxu0 %vm139_vm0, %v1956_v11  ;;  %v1734_v44 = vmul.f32 %v1726_v4, %v5112_v24 }
 0x7eb   :  { %v1738_v42 = vadd.f32 1e-05, %v1734_v44 }
 0x7ed   :  { %4440 = vrsqrt.f32 %v1738_v42  ;;  %vm1757_vm14 = vweird.f32 %v1738_v42 }
 0x7f0   :  { %v1729_v36 = vpop.xlane.xlu0 %1728 }
 0x7f1   :  { %v1735_v56 = vmul.f32 %v1729_v36, %v5112_v24 }
 0x7f3   :  { %v4441_v45 = vpop.eup %4440  ;;  %v1739_v17 = vadd.f32 1e-05, %v1735_v56 }
 0x7f4   :  { %v1752_v60 = vmul.f32 %v4441_v45, %v1738_v42  ;;  %vm1758_vm13 = vweird.f32 %v4441_v45 }
 0x7f5   :  { %4442 = vrsqrt.f32 %v1739_v17  ;;  %v1732_v27 = vpop.xlane.xlu1 %1731  ;;  %vm1759_vm15 = vmor %vm1757_vm14, %vm1758_vm13  ;;  %vm1767_vm7 = vweird.f32 %v1739_v17 }
 0x7f6   :  { %v1753_v49 = vmul.f32 %v4441_v45, %v1752_v60  ;;  %v1736_v38 = vmul.f32 %v1732_v27, %v5112_v24 }
 0x7f8   :  { %v1754_v37 = vmul.f32 0.5, %v1753_v49  ;;  %v1740_v39 = vadd.f32 1e-05, %v1736_v38 }
 0x7fa   :  { %v1755_v12 = vsub.f32 1.5, %v1754_v37  ;;  %4444 = vrsqrt.f32 %v1740_v39  ;;  %vm1777_vm11 = vweird.f32 %v1740_v39 }
 0x7fb   :  { %v4443_v13 = vpop.eup %4442 }
 0x7fc   :  { %v1756_v6 = vmul.f32 %v4441_v45, %v1755_v12  ;;  %v1762_v7 = vmul.f32 %v4443_v13, %v1739_v17  ;;  %vm1768_vm6 = vweird.f32 %v4443_v13 }
 0x7fd   :  { %vm1769_vm8 = vmor %vm1767_vm7, %vm1768_vm6 }
 0x7fe   :  { %v1760_v59 = vsel %vm1759_vm15, %v4441_v45, %v1756_v6  ;;  %v1763_v8 = vmul.f32 %v4443_v13, %v1762_v7 }
 0x7ff   :  { %v1804_v48 = vperm.slane %v1760_v59, %v5114_v50  ;;  %v1808_v52 = vperm.slane %v1760_v59, %v5116_v20  ;;  %v1812_v53 = vperm.slane %v1760_v59, %v5118_v25  ;;  %v1816_v3 = vperm.slane %v1760_v59, %v5120_v23 }
 0x800   :  { %v4445_v15 = vpop.eup %4444  ;;  %v1764_v58 = vmul.f32 0.5, %v1763_v8 }
 0x801   :  { %v1859_v26 = vmul.f32 %v1804_v48, %v5477_v19  ;;  %v1860_v28 = vmul.f32 %v1808_v52, %v5480_v21  ;;  %v1861_v30 = vmul.f32 %v1812_v53, %v5483_v14  ;;  %v1862_v40 = vmul.f32 %v1816_v3, %v5486_v22 }
 0x802   :  { %v1765_v5 = vsub.f32 1.5, %v1764_v58  ;;  %v1772_v63 = vmul.f32 %v4445_v15, %v1740_v39  ;;  %vm1778_vm10 = vweird.f32 %v4445_v15 }
 0x803   :  { %v1883_v18 = vmul.f32 %v5553_v9, %v1859_v26  ;;  %v1884_v61 = vmul.f32 %v5561_v55, %v1860_v28  ;;  %v1885_v1 = vmul.f32 %v5564_v51, %v1861_v30  ;;  %v1886_v35 = vmul.f32 %v5567_v62, %v1862_v40  ;;  %vm1779_vm12 = vmor %vm1777_vm11, %vm1778_vm10 }
 0x804   :  { %v1766_v43 = vmul.f32 %v4443_v13, %v1765_v5  ;;  %v1773_v19 = vmul.f32 %v4445_v15, %v1772_v63 }
 0x805   :  { %v5623_v21 = vadd.f32 %v5558_v16, %v1883_v18  ;;  %v5626_v14 = vadd.f32 %v5574_v31, %v1884_v61  ;;  %v5629_v22 = vadd.f32 %v5577_v29, %v1885_v1  ;;  %v5632_v11 = vadd.f32 %v5584_v10, %v1886_v35 }
 0x806   :  { %v1770_v4 = vsel %vm1769_vm8, %v4443_v13, %v1766_v43  ;;  %v1774_v44 = vmul.f32 0.5, %v1773_v19 }
 0x807   :  { %1949 = vst [vmem:[#allocation1 + $0x20] ss:$4 sm:$0xff] %v5623_v21  ;;  %v1820_v42 = vperm.slane %v1770_v4, %v5114_v50  ;;  %v1824_v36 = vperm.slane %v1770_v4, %v5116_v20  ;;  %v1828_v56 = vperm.slane %v1770_v4, %v5118_v25  ;;  %v1832_v45 = vperm.slane %v1770_v4, %v5120_v23 }
 0x808   :  { %1951 = vst [vmem:[#allocation1 + $0x21] ss:$4 sm:$0xff] %v5626_v14  ;;  %v1775_v17 = vsub.f32 1.5, %v1774_v44 }
 0x809   :  { %1953 = vst [vmem:[#allocation1 + $0x22] ss:$4 sm:$0xff] %v5629_v22  ;;  %v1863_v60 = vmul.f32 %v1820_v42, %v5502_v32  ;;  %v1864_v27 = vmul.f32 %v1824_v36, %v5505_v33  ;;  %v1865_v49 = vmul.f32 %v1828_v56, %v5508_v34  ;;  %v1866_v38 = vmul.f32 %v1832_v45, %v5511_v0 }
 0x80a   :  { %1955 = vst [vmem:[#allocation1 + $0x23] ss:$4 sm:$0xff] %v5632_v11  ;;  %v1776_v37 = vmul.f32 %v4445_v15, %v1775_v17 }
 0x80b   :  { %v1887_v12 = vmul.f32 %v5553_v9, %v1863_v60  ;;  %v1888_v13 = vmul.f32 %v5561_v55, %v1864_v27  ;;  %v1889_v6 = vmul.f32 %v5564_v51, %v1865_v49  ;;  %v1890_v7 = vmul.f32 %v5567_v62, %v1866_v38 }
 0x80c   :  { %v1780_v32 = vsel %vm1779_vm12, %v4445_v15, %v1776_v37 }
 0x80d   :  { %v5651_v33 = vadd.f32 %v5558_v16, %v1887_v12  ;;  %v5654_v34 = vadd.f32 %v5574_v31, %v1888_v13  ;;  %v5657_v0 = vadd.f32 %v5577_v29, %v1889_v6  ;;  %v5660_v39 = vadd.f32 %v5584_v10, %v1890_v7 }
 0x80e   :  { %v1836_v59 = vperm.slane %v1780_v32, %v5114_v50  ;;  %v1840_v51 = vperm.slane %v1780_v32, %v5116_v20 }
 0x80f   :  { %1958 = vst [vmem:[#allocation1] ss:$4 sm:$0xff] %v5651_v33 }
 0x810   :  { %1959 = vst [vmem:[#allocation1 + $0x1] ss:$4 sm:$0xff] %v5654_v34  ;;  %v1867_v62 = vmul.f32 %v1836_v59, %v5525_v47  ;;  %v1868_v8 = vmul.f32 %v1840_v51, %v5528_v41 }
 0x811   :  { %v1957_v48 = vld.sshfl [vmem:[#allocation1 + $0x20] sm:$0xff pattern:$0x73625140]  ;;  %1960 = vst [vmem:[#allocation1 + $0x2] ss:$4 sm:$0xff] %v5657_v0 }
 0x812   :  { %1961 = vst [vmem:[#allocation1 + $0x3] ss:$4 sm:$0xff] %v5660_v39  ;;  %v1891_v29 = vmul.f32 %v5553_v9, %v1867_v62  ;;  %v1892_v10 = vmul.f32 %v5561_v55, %v1868_v8  ;;  %4266 = vmatmul.msk.f32.gmra.mxu0 %vm139_vm0, %v1957_v48  ;;  %v4385_v9 = vld [vmem:[%s6834_s29 + $0x1] ss:$0 sm:$0xff]  ;;  %s6841_s29 = smov 96  }
 0x814   :  { %v5674_v52 = vadd.f32 %v5558_v16, %v1891_v29  ;;  %v5677_v53 = vadd.f32 %v5574_v31, %v1892_v10 }
 0x816   :  { %1962 = vst [vmem:[#allocation1 + $0x20] ss:$4 sm:$0xff] %v5674_v52 }
 0x817   :  { %1963 = vst [vmem:[#allocation1 + $0x21] ss:$4 sm:$0xff] %v5677_v53 }
 0x819   :  { %v1964_v47 = vld.sshfl [vmem:[#allocation1] sm:$0xff pattern:$0x73625140] }
 0x81a   :  { %4267 = vmatmul.msk.f32.gmra.mxu0 %vm139_vm0, %v1964_v47 }
 0x81e   :  { %v1965_v41 = vld.sshfl [vmem:[#allocation1 + $0x20] sm:$0xff pattern:$0x73625140] }
 0x822   :  { %4268 = vmatmul.msk.f32.gmra.mxu0 %vm139_vm0, %v1965_v41 }
 0x866   :  { %v1991_v55 = vpop.f32.mrf.mxu0 }
 0x867   :  { %v5686_v16 = vadd.f32 %v4385_v9, %v1991_v55 }
 0x869   :  { %v5689_v31 = vrot.slane %v5686_v16, 2  ;;  %v5692_v3 = vrot.slane %v5686_v16, 4  ;;  %v5695_v15 = vrot.slane %v5686_v16, 6  ;;  %2017 = vst [vmem:[#allocation1] ss:$4 sm:$0xff] %v5686_v16 }
 0x86b   :  { %2019 = vst [vmem:[#allocation1 + $0x1] ss:$4 sm:$0xff] %v5689_v31 }
 0x86c   :  { %2021 = vst [vmem:[#allocation1 + $0x2] ss:$4 sm:$0xff] %v5692_v3 }
 0x86d   :  { %2023 = vst [vmem:[#allocation1 + $0x3] ss:$4 sm:$0xff] %v5695_v15 }
 0x874   :  { %v5701_v58 = vld.sshfl [vmem:[#allocation1] sm:$0xff pattern:$0x73625140] }
 0x875   :  { %2032 = vst [vmem:[#allocation1] ss:$4 sm:$0xff] %v5686_v16 }
 0x876   :  { %2034 = vst [vmem:[#allocation1 + $0x1] ss:$4 sm:$0xff] %v5689_v31 }
 0x877   :  { %2036 = vst [vmem:[#allocation1 + $0x2] ss:$4 sm:$0xff] %v5692_v3 }
 0x878   :  { %2038 = vst [vmem:[#allocation1 + $0x3] ss:$4 sm:$0xff] %v5695_v15 }
 0x87f   :  { %v2045_v26 = vld.sshfl [vmem:[#allocation1] sm:$0xff pattern:$0x73625140] }
 0x880   :  { %2047 = vrot.lane.b32.xlu0 %v2045_v26, %s6841_s29 }
 0x88f   :  { %v1994_v28 = vpop.f32.mrf.mxu0 }
 0x890   :  { %v5708_v30 = vadd.f32 %v4385_v9, %v1994_v28 }
 0x892   :  { %v5711_v40 = vrot.slane %v5708_v30, 2  ;;  %v5714_v5 = vrot.slane %v5708_v30, 4  ;;  %v5717_v63 = vrot.slane %v5708_v30, 6  ;;  %2025 = vst [vmem:[#allocation1 + $0x20] ss:$4 sm:$0xff] %v5708_v30 }
 0x894   :  { %2027 = vst [vmem:[#allocation1 + $0x21] ss:$4 sm:$0xff] %v5711_v40 }
 0x895   :  { %2029 = vst [vmem:[#allocation1 + $0x22] ss:$4 sm:$0xff] %v5714_v5 }
 0x896   :  { %2082 = vst [vmem:[#allocation1] ss:$4 sm:$0xff] %v5717_v63 }
 0x897   :  { %v1997_v18 = vpop.f32.mrf.mxu0 }
 0x898   :  { %v5723_v61 = vadd.f32 %v4385_v9, %v1997_v18 }
 0x89a   :  { %v5726_v1 = vrot.slane %v5723_v61, 2  ;;  %2084 = vst [vmem:[#allocation1 + $0x1] ss:$4 sm:$0xff] %v5723_v61  ;;  %v5732_v43 = vrot.slane %v5723_v61, 4  ;;  %v5740_v4 = vrot.slane %v5723_v61, 6 }
 0x89c   :  { %v5729_v35 = vld.sshfl [vmem:[#allocation1 + $0x20] sm:$0xff pattern:$0x73625140]  ;;  %2086 = vst [vmem:[#allocation1 + $0x2] ss:$4 sm:$0xff] %v5726_v1 }
 0x89d   :  { %2040 = vst [vmem:[#allocation1 + $0x20] ss:$4 sm:$0xff] %v5708_v30 }
 0x89e   :  { %2042 = vst [vmem:[#allocation1 + $0x21] ss:$4 sm:$0xff] %v5711_v40 }
 0x89f   :  { %2044 = vst [vmem:[#allocation1 + $0x22] ss:$4 sm:$0xff] %v5714_v5  ;;  %v2000_v19 = vpop.f32.mrf.mxu0 }
 0x8a0   :  { %2088 = vst [vmem:[#allocation1 + $0x3] ss:$4 sm:$0xff] %v5732_v43  ;;  %v5742_v44 = vadd.f32 %v4385_v9, %v2000_v19 }
 0x8a2   :  { %v5751_v56 = vrot.slane %v5742_v44, 2 }
 0x8a6   :  { %v2046_v42 = vld.sshfl [vmem:[#allocation1 + $0x20] sm:$0xff pattern:$0x73625140] }
 0x8a7   :  { %2090 = vst [vmem:[#allocation1 + $0x20] ss:$4 sm:$0xff] %v5740_v4  ;;  %v5745_v36 = vld.sshfl [vmem:[#allocation1] sm:$0xff pattern:$0x73625140]  ;;  %2049 = vrot.lane.b32.xlu2 %v2046_v42, %s6841_s29  ;;  %v4544_v42 = vld [vmem:[%s6835_s24 + $0x10] sm:$0xff] }
 0x8a8   :  { %2097 = vst [vmem:[#allocation1] ss:$4 sm:$0xff] %v5717_v63 }
 0x8a9   :  { %2099 = vst [vmem:[#allocation1 + $0x1] ss:$4 sm:$0xff] %v5723_v61 }
 0x8aa   :  { %2101 = vst [vmem:[#allocation1 + $0x2] ss:$4 sm:$0xff] %v5726_v1 }
 0x8ab   :  { %2103 = vst [vmem:[#allocation1 + $0x3] ss:$4 sm:$0xff] %v5732_v43 }
 0x8ac   :  { %2092 = vst [vmem:[#allocation1 + $0x21] ss:$4 sm:$0xff] %v5742_v44 }
 0x8ad   :  { %2094 = vst [vmem:[#allocation1 + $0x22] ss:$4 sm:$0xff] %v5751_v56 }
 0x8b2   :  { %v2110_v45 = vld.sshfl [vmem:[#allocation1] sm:$0xff pattern:$0x73625140] }
 0x8b3   :  { %2203 = vst [vmem:[#allocation1] ss:$4 sm:$0xff] %v5686_v16  ;;  %2112 = vrot.lane.b32.xlu0 %v2110_v45, %s6841_s29 }
 0x8b4   :  { %2205 = vst [vmem:[#allocation1 + $0x1] ss:$4 sm:$0xff] %v5689_v31  ;;  %v5760_v17 = vld.sshfl [vmem:[#allocation1 + $0x20] sm:$0xff pattern:$0x73625140] }
 0x8b5   :  { %2207 = vst [vmem:[#allocation1 + $0x2] ss:$4 sm:$0xff] %v5692_v3 }
 0x8b6   :  { %2209 = vst [vmem:[#allocation1 + $0x3] ss:$4 sm:$0xff] %v5695_v15 }
 0x8b7   :  { %2105 = vst [vmem:[#allocation1 + $0x20] ss:$4 sm:$0xff] %v5740_v4 }
 0x8b8   :  { %2107 = vst [vmem:[#allocation1 + $0x21] ss:$4 sm:$0xff] %v5742_v44 }
 0x8b9   :  { %2109 = vst [vmem:[#allocation1 + $0x22] ss:$4 sm:$0xff] %v5751_v56 }
 0x8bd   :  { %v5767_v60 = vld.sshfl [vmem:[#allocation1] sm:$0xff pattern:$0x73625140] }
 0x8be   :  { %2254 = vst [vmem:[#allocation1] ss:$4 sm:$0xff] %v5717_v63 }
 0x8bf   :  { %2256 = vst [vmem:[#allocation1 + $0x1] ss:$4 sm:$0xff] %v5723_v61 }
 0x8c0   :  { %2258 = vst [vmem:[#allocation1 + $0x2] ss:$4 sm:$0xff] %v5726_v1  ;;  %v2111_v27 = vld.sshfl [vmem:[#allocation1 + $0x20] sm:$0xff pattern:$0x73625140] }
 0x8c1   :  { %2260 = vst [vmem:[#allocation1 + $0x3] ss:$4 sm:$0xff] %v5732_v43  ;;  %2114 = vrot.lane.b32.xlu1 %v2111_v27, %s6841_s29  ;;  %v4545_v27 = vld [vmem:[%s6835_s24 + $0x18] sm:$0x3f]  ;;  %s6846_s29 = smov 16  }
 0x8c2   :  { %2211 = vst [vmem:[#allocation1 + $0x20] ss:$4 sm:$0xff] %v5708_v30 }
 0x8c3   :  { %2213 = vst [vmem:[#allocation1 + $0x21] ss:$4 sm:$0xff] %v5711_v40 }
 0x8c4   :  { %2215 = vst [vmem:[#allocation1 + $0x22] ss:$4 sm:$0xff] %v5714_v5 }
 0x8c8   :  { %v5777_v49 = vld.sshfl [vmem:[#allocation1] sm:$0xff pattern:$0x73625140] }
 0x8c9   :  { %2305 = vst [vmem:[#allocation1] ss:$4 sm:$0xff] %v5686_v16 }
 0x8ca   :  { %2307 = vst [vmem:[#allocation1 + $0x1] ss:$4 sm:$0xff] %v5689_v31 }
 0x8cb   :  { %2309 = vst [vmem:[#allocation1 + $0x2] ss:$4 sm:$0xff] %v5692_v3  ;;  %v2217_v38 = vld.sshfl [vmem:[#allocation1 + $0x20] sm:$0xff pattern:$0x73625140] }
 0x8cc   :  { %2311 = vst [vmem:[#allocation1 + $0x3] ss:$4 sm:$0xff] %v5695_v15 }
 0x8cd   :  { %2262 = vst [vmem:[#allocation1 + $0x20] ss:$4 sm:$0xff] %v5740_v4 }
 0x8ce   :  { %2264 = vst [vmem:[#allocation1 + $0x21] ss:$4 sm:$0xff] %v5742_v44 }
 0x8cf   :  { %2266 = vst [vmem:[#allocation1 + $0x22] ss:$4 sm:$0xff] %v5751_v56 }
 0x8d3   :  { %v2318_v37 = vld.sshfl [vmem:[#allocation1] sm:$0xff pattern:$0x73625140] }
 0x8d4   :  { %2324 = vst [vmem:[#allocation1] ss:$4 sm:$0xff] %v5686_v16  ;;  %2320 = vrot.lane.b32.xlu0 %v2318_v37, %s6842_s28 }
 0x8d5   :  { %2326 = vst [vmem:[#allocation1 + $0x1] ss:$4 sm:$0xff] %v5689_v31 }
 0x8d6   :  { %2328 = vst [vmem:[#allocation1 + $0x2] ss:$4 sm:$0xff] %v5692_v3  ;;  %v5790_v12 = vld.sshfl [vmem:[#allocation1 + $0x20] sm:$0xff pattern:$0x73625140] }
 0x8d7   :  { %2330 = vst [vmem:[#allocation1 + $0x3] ss:$4 sm:$0xff] %v5695_v15 }
 0x8d8   :  { %2313 = vst [vmem:[#allocation1 + $0x20] ss:$4 sm:$0xff] %v5708_v30 }
 0x8d9   :  { %2315 = vst [vmem:[#allocation1 + $0x21] ss:$4 sm:$0xff] %v5711_v40 }
 0x8da   :  { %2317 = vst [vmem:[#allocation1 + $0x22] ss:$4 sm:$0xff] %v5714_v5 }
 0x8de   :  { %v2337_v13 = vld.sshfl [vmem:[#allocation1] sm:$0xff pattern:$0x73625140] }
 0x8df   :  { %2374 = vst [vmem:[#allocation1] ss:$4 sm:$0xff] %v5717_v63  ;;  %2339 = vrot.lane.b32.xlu1 %v2337_v13, %s6843_s22 }
 0x8e0   :  { %2376 = vst [vmem:[#allocation1 + $0x1] ss:$4 sm:$0xff] %v5723_v61 }
 0x8e1   :  { %2378 = vst [vmem:[#allocation1 + $0x2] ss:$4 sm:$0xff] %v5726_v1  ;;  %v2319_v6 = vld.sshfl [vmem:[#allocation1 + $0x20] sm:$0xff pattern:$0x73625140] }
 0x8e2   :  { %2380 = vst [vmem:[#allocation1 + $0x3] ss:$4 sm:$0xff] %v5732_v43  ;;  %2322 = vrot.lane.b32.xlu0 %v2319_v6, %s6842_s28 }
 0x8e3   :  { %2332 = vst [vmem:[#allocation1 + $0x20] ss:$4 sm:$0xff] %v5708_v30 }
 0x8e4   :  { %2334 = vst [vmem:[#allocation1 + $0x21] ss:$4 sm:$0xff] %v5711_v40 }
 0x8e5   :  { %2336 = vst [vmem:[#allocation1 + $0x22] ss:$4 sm:$0xff] %v5714_v5 }
 0x8e9   :  { %v2387_v7 = vld.sshfl [vmem:[#allocation1] sm:$0xff pattern:$0x73625140] }
 0x8ea   :  { %2393 = vst [vmem:[#allocation1] ss:$4 sm:$0xff] %v5717_v63  ;;  %2220 = vrot.lane.b32.xlu0 %v2217_v38, %s6844_s1 }
 0x8eb   :  { %2395 = vst [vmem:[#allocation1 + $0x1] ss:$4 sm:$0xff] %v5723_v61 }
 0x8ec   :  { %2397 = vst [vmem:[#allocation1 + $0x2] ss:$4 sm:$0xff] %v5726_v1  ;;  %v2338_v32 = vld.sshfl [vmem:[#allocation1 + $0x20] sm:$0xff pattern:$0x73625140] }
 0x8ed   :  { %2399 = vst [vmem:[#allocation1 + $0x3] ss:$4 sm:$0xff] %v5732_v43  ;;  %2341 = vrot.lane.b32.xlu2 %v2338_v32, %s6843_s22 }
 0x8ee   :  { %2382 = vst [vmem:[#allocation1 + $0x20] ss:$4 sm:$0xff] %v5740_v4 }
 0x8ef   :  { %2384 = vst [vmem:[#allocation1 + $0x21] ss:$4 sm:$0xff] %v5742_v44 }
 0x8f0   :  { %2386 = vst [vmem:[#allocation1 + $0x22] ss:$4 sm:$0xff] %v5751_v56 }
 0x8f2   :  { %v2048_v29 = vpop.permute.xlu0 %2047 }
 0x8f4   :  { %v2406_v59 = vld.sshfl [vmem:[#allocation1] sm:$0xff pattern:$0x73625140] }
 0x8f5   :  { %2499 = vst [vmem:[#allocation1] ss:$4 sm:$0xff] %v5686_v16  ;;  %2408 = vrot.lane.b32.xlu1 %v2406_v59, %s6843_s22 }
 0x8f6   :  { %2501 = vst [vmem:[#allocation1 + $0x1] ss:$4 sm:$0xff] %v5689_v31 }
 0x8f7   :  { %2503 = vst [vmem:[#allocation1 + $0x2] ss:$4 sm:$0xff] %v5692_v3  ;;  %v2388_v51 = vld.sshfl [vmem:[#allocation1 + $0x20] sm:$0xff pattern:$0x73625140] }
 0x8f8   :  { %2505 = vst [vmem:[#allocation1 + $0x3] ss:$4 sm:$0xff] %v5695_v15 }
 0x8f9   :  { %2401 = vst [vmem:[#allocation1 + $0x20] ss:$4 sm:$0xff] %v5740_v4 }
 0x8fa   :  { %2403 = vst [vmem:[#allocation1 + $0x21] ss:$4 sm:$0xff] %v5742_v44 }
 0x8fb   :  { %2405 = vst [vmem:[#allocation1 + $0x22] ss:$4 sm:$0xff] %v5751_v56 }
 0x8fd   :  { %2391 = vrot.lane.b32.xlu1 %v2388_v51, %s6842_s28 }
 0x8ff   :  { %v5823_v62 = vld.sshfl [vmem:[#allocation1] sm:$0xff pattern:$0x73625140] }
 0x900   :  { %2550 = vst [vmem:[#allocation1] ss:$4 sm:$0xff] %v5717_v63 }
 0x901   :  { %2552 = vst [vmem:[#allocation1 + $0x1] ss:$4 sm:$0xff] %v5723_v61  ;;  %v2050_v8 = vpop.permute.xlu2 %2049 }
 0x902   :  { %2554 = vst [vmem:[#allocation1 + $0x2] ss:$4 sm:$0xff] %v5726_v1  ;;  %v2407_v48 = vld.sshfl [vmem:[#allocation1 + $0x20] sm:$0xff pattern:$0x73625140]  ;;  %4269 = vmatpush.xpose.msk.msrb.mxu1 %vm225_vm1, %v2050_v8 }
 0x903   :  { %2556 = vst [vmem:[#allocation1 + $0x3] ss:$4 sm:$0xff] %v5732_v43  ;;  %2410 = vrot.lane.b32.xlu2 %v2407_v48, %s6843_s22  ;;  %s6845_s22 = smov 48  }
 0x904   :  { %2507 = vst [vmem:[#allocation1 + $0x20] ss:$4 sm:$0xff] %v5708_v30 }
 0x905   :  { %2509 = vst [vmem:[#allocation1 + $0x21] ss:$4 sm:$0xff] %v5711_v40 }
 0x906   :  { %2511 = vst [vmem:[#allocation1 + $0x22] ss:$4 sm:$0xff] %v5714_v5  ;;  %4270 = vmatpush.xpose.msk.msrb.mxu1 %vm225_vm1, %v2048_v29  ;;  %v4542_v5 = vld [vmem:[%s6835_s24] sm:$0xff] }
 0x909   :  { %4271 = vmatmul.msk.f32.vlgmr.msrb.gmra.mxu1 %vm225_vm1, %v5701_v58 }
 0x90b   :  { %2389 = vrot.lane.b32.xlu2 %v2387_v7, %s6842_s28 }
 0x90d   :  { %v2513_v10 = vld.sshfl [vmem:[#allocation1 + $0x20] sm:$0xff pattern:$0x73625140] }
 0x90e   :  { %2558 = vst [vmem:[#allocation1 + $0x20] ss:$4 sm:$0xff] %v5740_v4 }
 0x90f   :  { %2560 = vst [vmem:[#allocation1 + $0x21] ss:$4 sm:$0xff] %v5742_v44 }
 0x910   :  { %2562 = vst [vmem:[#allocation1 + $0x22] ss:$4 sm:$0xff] %v5751_v56 }
 0x911   :  { %4272 = vmatmul.msk.f32.gmra.mxu1 %vm225_vm1, %v5729_v35  ;;  %v4543_v35 = vld [vmem:[%s6835_s24 + $0x8] sm:$0x3f] }
 0x925   :  { %v2113_v41 = vpop.permute.xlu0 %2112 }
 0x933   :  { %v2115_v47 = vpop.permute.xlu1 %2114 }
 0x934   :  { %4273 = vmatpush.xpose.msk.msrb.mxu2 %vm225_vm1, %v2115_v47 }
 0x938   :  { %4274 = vmatpush.xpose.msk.msrb.mxu2 %vm225_vm1, %v2113_v41 }
 0x93b   :  { %4275 = vmatmul.msk.f32.vlgmr.msrb.gmra.mxu2 %vm225_vm1, %v5745_v36 }
 0x943   :  { %4276 = vmatmul.msk.f32.gmra.mxu2 %vm225_vm1, %v5760_v17 }
 0x946   :  { %v2321_v55 = vpop.permute.xlu0 %2320 }
 0x947   :  { %v2342_v9 = vpop.permute.xlu2 %2341 }
 0x948   :  { %4283 = vmatpush.xpose.msk.msra.mxu1 %vm225_vm1, %v2342_v9 }
 0x951   :  { %v2340_v16 = vpop.permute.xlu1 %2339 }
 0x952   :  { %4284 = vmatpush.xpose.msk.msra.mxu1 %vm225_vm1, %v2340_v16 }
 0x954   :  { %v2323_v31 = vpop.permute.xlu0 %2322 }
 0x955   :  { %4285 = vmatmul.msk.f32.vlgmr.msra.gmra.mxu1 %vm225_vm1, %v2321_v55  ;;  %v4372_v55 = vpack.i.bf16 %v5777_v49, %v5767_v60 }
 0x95c   :  { %v2221_v3 = vpop.permute.xlu0 %2220 }
 0x95d   :  { %v2411_v15 = vpop.permute.xlu2 %2410  ;;  %4277 = vmatpush.msk.msrb.mxu3 %vm406_vm2, %v2221_v3  ;;  %4286 = vmatmul.msk.f32.gmra.mxu1 %vm225_vm1, %v2323_v31 }
 0x95e   :  { %4287 = vmatpush.xpose.msk.msra.mxu2 %vm225_vm1, %v2411_v15 }
 0x965   :  { %v2390_v26 = vpop.permute.xlu2 %2389 }
 0x967   :  { %v2409_v58 = vpop.permute.xlu1 %2408 }
 0x968   :  { %4288 = vmatpush.xpose.msk.msra.mxu2 %vm225_vm1, %v2409_v58 }
 0x96b   :  { %4289 = vmatmul.msk.f32.vlgmr.msra.gmra.mxu2 %vm225_vm1, %v2390_v26 }
 0x96f   :  { %v2392_v28 = vpop.permute.xlu1 %2391 }
 0x973   :  { %4290 = vmatmul.msk.f32.gmra.mxu2 %vm225_vm1, %v2392_v28 }
 0x986   :  { %v2076_v30 = vpop.f32.mrf.mxu1 }
 0x987   :  { %v2147_v40 = vmul.f32 0.25, %v2076_v30 }
 0x989   :  { %v2151_v63 = vadd.f32 %v4542_v5, %v2147_v40 }
 0x98b   :  { %v2155_v18 = vsel %vm330_vm3, %v2151_v63, -inf }
 0x98c   :  { %2156 = vmax.xlane.f32.xlu0 %v2155_v18 }
 0x98e   :  { %v2079_v61 = vpop.f32.mrf.mxu1 }
 0x98f   :  { %v2148_v1 = vmul.f32 0.25, %v2079_v61 }
 0x991   :  { %v2152_v43 = vadd.f32 %v4543_v35, %v2148_v1 }
 0x993   :  { %v2158_v19 = vsel %vm334_vm4, %v2152_v43, -inf }
 0x994   :  { %2159 = vmax.xlane.f32.xlu2 %v2158_v19 }
 0x9be   :  { %v2141_v4 = vpop.f32.mrf.mxu2 }
 0x9bf   :  { %v2149_v44 = vmul.f32 0.25, %v2141_v4 }
 0x9c1   :  { %v2153_v36 = vadd.f32 %v4544_v42, %v2149_v44 }
 0x9c3   :  { %v2161_v56 = vsel %vm330_vm3, %v2153_v36, -inf }
 0x9c4   :  { %2162 = vmax.xlane.f32.xlu1 %v2161_v56 }
 0x9c6   :  { %v2144_v45 = vpop.f32.mrf.mxu2 }
 0x9c7   :  { %v2150_v17 = vmul.f32 0.25, %v2144_v45 }
 0x9c9   :  { %v2154_v38 = vadd.f32 %v4545_v27, %v2150_v17 }
 0x9cb   :  { %v2164_v37 = vsel %vm334_vm4, %v2154_v38, -inf }
 0x9cc   :  { %2165 = vmax.xlane.f32.xlu2 %v2164_v37 }
 0x9d2   :  { %v2368_v13 = vpop.f32.mrf.mxu1 }
 0x9d3   :  { %v2443_v6 = vmul.f32 0.25, %v2368_v13 }
 0x9d5   :  { %v2447_v7 = vadd.f32 %v4542_v5, %v2443_v6 }
 0x9d7   :  { %v2451_v32 = vsel %vm330_vm3, %v2447_v7, -inf }
 0x9d8   :  { %2452 = vmax.xlane.f32.xlu0 %v2451_v32 }
 0x9da   :  { %v2371_v59 = vpop.f32.mrf.mxu1 }
 0x9db   :  { %v2444_v51 = vmul.f32 0.25, %v2371_v59  ;;  %v2564_v59 = vld.sshfl [vmem:[#allocation1 + $0x20] sm:$0xff pattern:$0x73625140] }
 0x9dd   :  { %v2448_v8 = vadd.f32 %v4543_v35, %v2444_v51 }
 0x9df   :  { %v2454_v48 = vsel %vm334_vm4, %v2448_v8, -inf }
 0x9e0   :  { %2455 = vmax.xlane.f32.xlu1 %v2454_v48 }
 0x9e4   :  { %2516 = vrot.lane.b32.xlu2 %v2513_v10, %s6845_s22 }
 0x9ee   :  { %v2437_v29 = vpop.f32.mrf.mxu2 }
 0x9ef   :  { %v2445_v47 = vmul.f32 0.25, %v2437_v29 }
 0x9f1   :  { %v5877_v41 = vadd.f32 %v4544_v42, %v2445_v47 }
 0x9f3   :  { %v2457_v9 = vsel %vm330_vm3, %v5877_v41, -inf }
 0x9f4   :  { %2458 = vmax.xlane.f32.xlu0 %v2457_v9 }
 0x9f6   :  { %v2440_v16 = vpop.f32.mrf.mxu2 }
 0x9f7   :  { %v2446_v31 = vmul.f32 0.25, %v2440_v16 }
 0x9f9   :  { %4373 = vrot.lane.b32.xlu1 %v4372_v55, %s6844_s1  ;;  %v2450_v10 = vadd.f32 %v4545_v27, %v2446_v31 }
 0x9fb   :  { %v2460_v26 = vsel %vm334_vm4, %v2450_v10, -inf }
 0x9ff   :  { %v2157_v28 = vpop.xlane.xlu0 %2156 }
 0xa00   :  { %v2167_v30 = vsub.f32 %v2151_v63, %v2157_v28 }
 0xa02   :  { %v2171_v49 = vmul.f32 1.442695, %v2167_v30 }
 0xa07   :  { %v2160_v3 = vpop.xlane.xlu2 %2159 }
 0xa08   :  { %2271 = vrot.lane.b32.xlu0 %v5790_v12, %s6844_s1  ;;  %v2168_v15 = vsub.f32 %v2152_v43, %v2160_v3 }
 0xa0a   :  { %v2173_v58 = vmul.f32 1.442695, %v2168_v15 }
 0xa0c   :  { %4446 = vpow2.f32 %v2173_v58 }
 0xa0d   :  { %2461 = vmax.xlane.f32.xlu2 %v2460_v26  ;;  %4448 = vpow2.f32 %v2171_v49 }
 0xa12   :  { %v5887_v40 = vpop.eup %4446 }
 0xa13   :  { %v2182_v60 = vsel %vm334_vm4, %v5887_v40, 0.0  ;;  %v4449_v5 = vpop.eup %4448 }
 0xa14   :  { %v2179_v12 = vsel %vm330_vm3, %v4449_v5, 0.0 }
 0xa15   :  { %2183 = vadd.xlane.f32.xlu2 %v2182_v60 }
 0xa23   :  { %2180 = vadd.xlane.f32.xlu1 %v2179_v12 }
 0xa37   :  { %v2163_v18 = vpop.xlane.xlu1 %2162 }
 0xa38   :  { %v2169_v61 = vsub.f32 %v2153_v36, %v2163_v18 }
 0xa3a   :  { %v2175_v1 = vmul.f32 1.442695, %v2169_v61 }
 0xa3c   :  { %4450 = vpow2.f32 %v2175_v1 }
 0xa3f   :  { %v2166_v35 = vpop.xlane.xlu2 %2165 }
 0xa40   :  { %v2170_v43 = vsub.f32 %v2154_v38, %v2166_v35 }
 0xa42   :  { %v5892_v19 = vpop.eup %4450  ;;  %v2177_v63 = vmul.f32 1.442695, %v2170_v43 }
 0xa43   :  { %v2185_v4 = vsel %vm330_vm3, %v5892_v19, 0.0 }
 0xa44   :  { %4452 = vpow2.f32 %v2177_v63  ;;  %2186 = vadd.xlane.f32.xlu2 %v2185_v4 }
 0xa47   :  { %v2517_v48 = vpop.permute.xlu2 %2516 }
 0xa4a   :  { %v5896_v44 = vpop.eup %4452 }
 0xa4b   :  { %v2453_v42 = vpop.xlane.xlu0 %2452  ;;  %v2188_v56 = vsel %vm334_vm4, %v5896_v44, 0.0 }
 0xa4c   :  { %v2463_v45 = vsub.f32 %v2447_v7, %v2453_v42  ;;  %2189 = vadd.xlane.f32.xlu0 %v2188_v56 }
 0xa4e   :  { %v2467_v36 = vmul.f32 1.442695, %v2463_v45 }
 0xa50   :  { %4454 = vpow2.f32 %v2467_v36 }
 0xa53   :  { %v2456_v17 = vpop.xlane.xlu1 %2455 }
 0xa54   :  { %v2464_v27 = vsub.f32 %v2448_v8, %v2456_v17 }
 0xa56   :  { %v4455_v38 = vpop.eup %4454  ;;  %v2469_v37 = vmul.f32 1.442695, %v2464_v27 }
 0xa57   :  { %v2475_v13 = vsel %vm330_vm3, %v4455_v38, 0.0 }
 0xa58   :  { %4456 = vpow2.f32 %v2469_v37  ;;  %2476 = vadd.xlane.f32.xlu2 %v2475_v13 }
 0xa5e   :  { %v5901_v6 = vpop.eup %4456 }
 0xa5f   :  { %v2478_v32 = vsel %vm334_vm4, %v5901_v6, 0.0 }
 0xa60   :  { %2479 = vadd.xlane.f32.xlu1 %v2478_v32  ;;  %2567 = vrot.lane.b32.xlu0 %v2564_v59, %s6845_s22 }
 0xa67   :  { %v2459_v8 = vpop.xlane.xlu0 %2458 }
 0xa68   :  { %v2465_v31 = vsub.f32 %v5877_v41, %v2459_v8  ;;  %v2563_v41 = vld.sshfl [vmem:[#allocation1] sm:$0xff pattern:$0x73625140] }
 0xa6a   :  { %v2471_v15 = vmul.f32 1.442695, %v2465_v31 }
 0xa6b   :  { %v4374_v7 = vpop.permute.xlu1 %4373 }
 0xa6c   :  { %v4375_v51 = vunpack.i.l.bf16 %v4374_v7  ;;  %v4376_v47 = vunpack.i.h.bf16 %v4374_v7 }
 0xa6e   :  { %2246 = vmatpush.msrb.mxu3 %v4375_v51 }
 0xa70   :  { %4291 = vmatpush.msk.msra.mxu3 %vm406_vm2, %v2517_v48  ;;  %2514 = vrot.lane.b32.xlu2 %v5823_v62, %s6845_s22 }
 0xa7a   :  { %v2272_v29 = vpop.permute.xlu0 %2271 }
 0xa7b   :  { %4280 = vmatpush.msk.msra.mxu0 %vm406_vm2, %v2272_v29 }
 0xa7d   :  { %2297 = vmatpush.msra.mxu0 %v4376_v47 }
 0xa80   :  { %v2462_v9 = vpop.xlane.xlu2 %2461 }
 0xa81   :  { %v2466_v55 = vsub.f32 %v2450_v10, %v2462_v9 }
 0xa83   :  { %v2473_v16 = vmul.f32 1.442695, %v2466_v55 }
 0xa85   :  { %4458 = vpow2.f32 %v2473_v16 }
 0xa86   :  { %4460 = vpow2.f32 %v2471_v15 }
 0xa88   :  { %v2184_v30 = vpop.xlane.xlu2 %2183 }
 0xa8b   :  { %v4459_v3 = vpop.eup %4458 }
 0xa8c   :  { %v2484_v58 = vsel %vm334_vm4, %v4459_v3, 0.0  ;;  %v4461_v26 = vpop.eup %4460 }
 0xa8d   :  { %2485 = vadd.xlane.f32.xlu1 %v2484_v58  ;;  %v2481_v28 = vsel %vm330_vm3, %v4461_v26, 0.0 }
 0xa96   :  { %v2181_v62 = vpop.xlane.xlu1 %2180 }
 0xa97   :  { %4462 = vrcp.f32 %v2181_v62  ;;  %v4304_v62 = vld [vmem:[%s6837_s3 + $0x38] sm:$0xff] }
 0xa98   :  { %4464 = vrcp.f32 %v2184_v30  ;;  %2699 = vmatpush.msrb.mxu1 %v4304_v62  ;;  %v4302_v30 = vld [vmem:[%s6837_s3 + $0x28] sm:$0xff] }
 0xa99   :  { %2482 = vadd.xlane.f32.xlu2 %v2481_v28  ;;  %v4303_v28 = vld [vmem:[%s6837_s3 + $0x30] sm:$0xff] }
 0xa9a   :  { %2700 = vmatpush.msrb.mxu1 %v4303_v28 }
 0xa9c   :  { %2701 = vmatpush.msrb.mxu1 %v4302_v30 }
 0xa9d   :  { %v4463_v60 = vpop.eup %4462 }
 0xa9e   :  { %v2195_v10 = vmul.f32 %v4463_v60, %v4449_v5  ;;  %v4465_v49 = vpop.eup %4464 }
 0xa9f   :  { %v2196_v12 = vmul.f32 %v4465_v49, %v5887_v40  ;;  %v4301_v49 = vld [vmem:[%s6837_s3 + $0x20] sm:$0xff] }
 0xaa0   :  { %4278 = vmatmul.msk.f32.vlgmr.msrb.gmra.mxu3 %vm330_vm3, %v2195_v10  ;;  %2702 = vmatpush.msrb.mxu1 %v4301_v49 }
 0xaa6   :  { %2565 = vrot.lane.b32.xlu1 %v2563_v41, %s6845_s22 }
 0xaa8   :  { %4279 = vmatmul.msk.f32.gmra.mxu3 %vm330_vm3, %v2196_v12 }
 0xab7   :  { %v2187_v18 = vpop.xlane.xlu2 %2186 }
 0xab8   :  { %4466 = vrcp.f32 %v2187_v18 }
 0xabe   :  { %v4467_v61 = vpop.eup %4466 }
 0xabf   :  { %v2197_v1 = vmul.f32 %v4467_v61, %v5892_v19  ;;  %v2190_v35 = vpop.xlane.xlu0 %2189 }
 0xac0   :  { %4468 = vrcp.f32 %v2190_v35 }
 0xac1   :  { %4281 = vmatmul.msk.f32.vlgmr.msra.gmra.mxu0 %vm330_vm3, %v2197_v1 }
 0xac6   :  { %v4469_v5 = vpop.eup %4468 }
 0xac7   :  { %v2198_v43 = vmul.f32 %v4469_v5, %v5896_v44 }
 0xac9   :  { %4282 = vmatmul.msk.f32.gmra.mxu0 %vm330_vm3, %v2198_v43 }
 0xacb   :  { %v2477_v63 = vpop.xlane.xlu2 %2476 }
 0xacc   :  { %4470 = vrcp.f32 %v2477_v63 }
 0xad2   :  { %v4471_v40 = vpop.eup %4470  ;;  %v2568_v4 = vpop.permute.xlu0 %2567 }
 0xad3   :  { %v2491_v42 = vmul.f32 %v4471_v40, %v4455_v38  ;;  %v2480_v56 = vpop.xlane.xlu1 %2479  ;;  %v2515_v45 = vpop.permute.xlu2 %2514  ;;  %4294 = vmatpush.msk.msrb.mxu0 %vm406_vm2, %v2568_v4 }
 0xad4   :  { %4472 = vrcp.f32 %v2480_v56  ;;  %2542 = vmatpush.msra.mxu3 %v2515_v45 }
 0xad5   :  { %v2495_v19 = vadd.f32 %v2491_v42, %v2195_v10  ;;  %4292 = vmatmul.msk.f32.vlgmr.msra.gmra.mxu3 %vm330_vm3, %v2491_v42 }
 0xad7   :  { %v2601_v36 = vmul.f32 0.5, %v2495_v19 }
 0xad9   :  { %4297 = vst.msk [vmem:[%s6836_s5 + $0x20] sm:$0xff] %vm330_vm3, %v2601_v36 }
 0xada   :  { %v4473_v44 = vpop.eup %4472 }
 0xadb   :  { %v2492_v17 = vmul.f32 %v4473_v44, %v5901_v6 }
 0xadd   :  { %v2496_v27 = vadd.f32 %v2492_v17, %v2196_v12  ;;  %4293 = vmatmul.msk.f32.gmra.mxu3 %vm330_vm3, %v2492_v17 }
 0xadf   :  { %v2602_v38 = vmul.f32 0.5, %v2496_v27 }
 0xae1   :  { %4298 = vst.msk [vmem:[%s6836_s5 + $0x28] sm:$0x3f] %vm334_vm4, %v2602_v38 }
 0xb00   :  { %v2486_v37 = vpop.xlane.xlu1 %2485 }
 0xb01   :  { %4474 = vrcp.f32 %v2486_v37  ;;  %v4386_v37 = vld [vmem:[%s6838_s2 + $0x1] ss:$0 sm:$0xff] }
 0xb07   :  { %v4475_v13 = vpop.eup %4474 }
 0xb08   :  { %v2494_v32 = vmul.f32 %v4475_v13, %v4459_v3 }
 0xb0a   :  { %v2498_v59 = vadd.f32 %v2494_v32, %v2198_v43 }
 0xb0c   :  { %v2483_v7 = vpop.xlane.xlu2 %2482  ;;  %v2604_v51 = vmul.f32 0.5, %v2498_v59 }
 0xb0d   :  { %4476 = vrcp.f32 %v2483_v7 }
 0xb0e   :  { %4300 = vst.msk [vmem:[%s6836_s5 + $0x38] sm:$0x3f] %vm334_vm4, %v2604_v51 }
 0xb13   :  { %v4477_v6 = vpop.eup %4476 }
 0xb14   :  { %v2493_v48 = vmul.f32 %v4477_v6, %v4461_v26 }
 0xb16   :  { %v2497_v8 = vadd.f32 %v2493_v48, %v2197_v1 }
 0xb18   :  { %v2603_v29 = vmul.f32 0.5, %v2497_v8  ;;  %v2566_v47 = vpop.permute.xlu1 %2565 }
 0xb19   :  { %2593 = vmatpush.msrb.mxu0 %v2566_v47 }
 0xb1a   :  { %4299 = vst.msk [vmem:[%s6836_s5 + $0x30] sm:$0xff] %vm330_vm3, %v2603_v29  ;;  %4295 = vmatmul.msk.f32.vlgmr.msrb.gmra.mxu0 %vm330_vm3, %v2493_v48 }
 0xb22   :  { %4296 = vmatmul.msk.f32.gmra.mxu0 %vm330_vm3, %v2494_v32 }
 0xb23   :  { %v2248_v9 = vpop.f32.mrf.mxu3 }
 0xb2b   :  { %v2251_v55 = vpop.f32.mrf.mxu3 }
 0xb3e   :  { %v2299_v3 = vpop.f32.mrf.mxu0 }
 0xb46   :  { %v2302_v15 = vpop.f32.mrf.mxu0 }
 0xb58   :  { %v2544_v16 = vpop.f32.mrf.mxu3 }
 0xb59   :  { %2614 = vrot.lane.b32.xlu0 %v2544_v16, %s6846_s29 }
 0xb60   :  { %v2547_v31 = vpop.f32.mrf.mxu3 }
 0xb61   :  { %2616 = vrot.lane.b32.xlu2 %v2547_v31, %s6846_s29 }
 0xb97   :  { %v2595_v58 = vpop.f32.mrf.mxu0 }
 0xb98   :  { %2618 = vrot.lane.b32.xlu0 %v2595_v58, %s6846_s29 }
 0xb9f   :  { %v2598_v26 = vpop.f32.mrf.mxu0 }
 0xba0   :  { %2620 = vrot.lane.b32.xlu0 %v2598_v26, %s6846_s29 }
 0xbbb   :  { %v2617_v60 = vpop.permute.xlu2 %2616 }
 0xbbc   :  { %v2627_v10 = vsel %vm225_vm1, %v2251_v55, %v2617_v60 }
 0xbbd   :  { %v2637_v41 = vrot.slane %v2627_v10, 2  ;;  %v2638_v12 = vrot.slane %v2627_v10, 4  ;;  %2662 = vst [vmem:[#allocation1 + $0x20] ss:$4 sm:$0xff] %v2627_v10 }
 0xbbf   :  { %2664 = vst [vmem:[#allocation1 + $0x21] ss:$4 sm:$0xff] %v2637_v41 }
 0xbc0   :  { %2666 = vst [vmem:[#allocation1 + $0x22] ss:$4 sm:$0xff] %v2638_v12 }
 0xbcb   :  { %v2615_v18 = vpop.permute.xlu0 %2614 }
 0xbcc   :  { %v2626_v61 = vsel %vm225_vm1, %v2248_v9, %v2615_v18 }
 0xbcd   :  { %v2634_v1 = vrot.slane %v2626_v61, 2  ;;  %v2635_v35 = vrot.slane %v2626_v61, 4  ;;  %v2636_v5 = vrot.slane %v2626_v61, 6  ;;  %2654 = vst [vmem:[#allocation1] ss:$4 sm:$0xff] %v2626_v61 }
 0xbcf   :  { %2656 = vst [vmem:[#allocation1 + $0x1] ss:$4 sm:$0xff] %v2634_v1 }
 0xbd0   :  { %2658 = vst [vmem:[#allocation1 + $0x2] ss:$4 sm:$0xff] %v2635_v35 }
 0xbd1   :  { %2660 = vst [vmem:[#allocation1 + $0x3] ss:$4 sm:$0xff] %v2636_v5 }
 0xbd8   :  { %v2669_v43 = vld.sshfl [vmem:[#allocation1] sm:$0xff pattern:$0x73625140] }
 0xbd9   :  { %4306 = vmatmul.msk.f32.vlgmr.msrb.gmra.mxu1 %vm139_vm0, %v2669_v43 }
 0xc0a   :  { %v2619_v63 = vpop.permute.xlu0 %2618 }
 0xc0b   :  { %v2628_v40 = vsel %vm225_vm1, %v2299_v3, %v2619_v63 }
 0xc0c   :  { %v2639_v4 = vrot.slane %v2628_v40, 2  ;;  %v2640_v42 = vrot.slane %v2628_v40, 4  ;;  %v2641_v56 = vrot.slane %v2628_v40, 6  ;;  %2668 = vst [vmem:[#allocation1 + $0x23] ss:$4 sm:$0xff] %v2628_v40 }
 0xc0e   :  { %2671 = vst [vmem:[#allocation1] ss:$4 sm:$0xff] %v2639_v4 }
 0xc0f   :  { %2672 = vst [vmem:[#allocation1 + $0x1] ss:$4 sm:$0xff] %v2640_v42 }
 0xc10   :  { %2673 = vst [vmem:[#allocation1 + $0x2] ss:$4 sm:$0xff] %v2641_v56 }
 0xc12   :  { %v2621_v45 = vpop.permute.xlu0 %2620 }
 0xc13   :  { %v2670_v19 = vld.sshfl [vmem:[#allocation1 + $0x20] sm:$0xff pattern:$0x73625140]  ;;  %v2629_v36 = vsel %vm225_vm1, %v2302_v15, %v2621_v45 }
 0xc14   :  { %v2642_v44 = vrot.slane %v2629_v36, 2  ;;  %v2643_v17 = vrot.slane %v2629_v36, 4  ;;  %2674 = vst [vmem:[#allocation1 + $0x3] ss:$4 sm:$0xff] %v2629_v36  ;;  %4307 = vmatmul.msk.f32.gmra.mxu1 %vm139_vm0, %v2670_v19 }
 0xc16   :  { %2675 = vst [vmem:[#allocation1 + $0x20] ss:$4 sm:$0xff] %v2642_v44 }
 0xc17   :  { %2676 = vst [vmem:[#allocation1 + $0x21] ss:$4 sm:$0xff] %v2643_v17 }
 0xc1b   :  { %v2677_v27 = vld.sshfl [vmem:[#allocation1] sm:$0xff pattern:$0x73625140] }
 0xc1c   :  { %4308 = vmatmul.msk.f32.gmra.mxu1 %vm139_vm0, %v2677_v27 }
 0xc1e   :  { %v2678_v38 = vld.sshfl [vmem:[#allocation1 + $0x20] sm:$0xff pattern:$0x73625140] }
 0xc24   :  { %4309 = vmatmul.msk.f32.gmra.mxu1 %vm139_vm0, %v2678_v38 }
 0xc56   :  { %v2704_v13 = vpop.f32.mrf.mxu1 }
 0xc57   :  { %v2705_v32 = vadd.f32 %v4386_v37, %v2704_v13 }
 0xc59   :  { %v2720_v59 = vrot.slane %v2705_v32, 2  ;;  %v2721_v7 = vrot.slane %v2705_v32, 4  ;;  %v2722_v51 = vrot.slane %v2705_v32, 6  ;;  %v2740_v6 = vadd.f32 %v2705_v32, %v5591_v54 }
 0xc5b   :  { %v2741_v48 = vadd.f32 %v2720_v59, %v5594_v2  ;;  %v2742_v8 = vadd.f32 %v2721_v7, %v5597_v46  ;;  %v2743_v29 = vadd.f32 %v2722_v51, %v5600_v57  ;;  %2768 = vst [vmem:[#allocation1] ss:$4 sm:$0xff] %v2740_v6 }
 0xc5d   :  { %2770 = vst [vmem:[#allocation1 + $0x1] ss:$4 sm:$0xff] %v2741_v48 }
 0xc5e   :  { %2772 = vst [vmem:[#allocation1 + $0x2] ss:$4 sm:$0xff] %v2742_v8 }
 0xc5f   :  { %2774 = vst [vmem:[#allocation1 + $0x3] ss:$4 sm:$0xff] %v2743_v29 }
 0xc66   :  { %v2783_v47 = vld.sshfl [vmem:[#allocation1] sm:$0xff pattern:$0x73625140] }
 0xc67   :  { %v2797_v9 = vsel %vm139_vm0, %v2783_v47, 0.0 }
 0xc68   :  { %2798 = vadd.xlane.f32.xlu1 %v2797_v9 }
 0xc91   :  { %v2707_v55 = vpop.f32.mrf.mxu1 }
 0xc92   :  { %v2708_v16 = vadd.f32 %v4386_v37, %v2707_v55 }
 0xc94   :  { %v2723_v31 = vrot.slane %v2708_v16, 2  ;;  %v2724_v3 = vrot.slane %v2708_v16, 4  ;;  %v2725_v15 = vrot.slane %v2708_v16, 6  ;;  %v5976_v54 = vadd.f32 %v2708_v16, %v5623_v21 }
 0xc96   :  { %v5979_v2 = vadd.f32 %v2723_v31, %v5626_v14  ;;  %v5982_v46 = vadd.f32 %v2724_v3, %v5629_v22  ;;  %v5985_v57 = vadd.f32 %v2725_v15, %v5632_v11  ;;  %2776 = vst [vmem:[#allocation1 + $0x20] ss:$4 sm:$0xff] %v5976_v54 }
 0xc98   :  { %2778 = vst [vmem:[#allocation1 + $0x21] ss:$4 sm:$0xff] %v5979_v2 }
 0xc99   :  { %2780 = vst [vmem:[#allocation1 + $0x22] ss:$4 sm:$0xff] %v5982_v46  ;;  %v2710_v58 = vpop.f32.mrf.mxu1 }
 0xc9a   :  { %2782 = vst [vmem:[#allocation1 + $0x23] ss:$4 sm:$0xff] %v5985_v57  ;;  %v2711_v21 = vadd.f32 %v4386_v37, %v2710_v58 }
 0xc9c   :  { %v2726_v26 = vrot.slane %v2711_v21, 2  ;;  %v2727_v62 = vrot.slane %v2711_v21, 4  ;;  %v2728_v14 = vrot.slane %v2711_v21, 6  ;;  %v5992_v28 = vadd.f32 %v2711_v21, %v5651_v33 }
 0xc9e   :  { %v5995_v22 = vadd.f32 %v2726_v26, %v5654_v34  ;;  %v5998_v11 = vadd.f32 %v2727_v62, %v5657_v0  ;;  %v6001_v30 = vadd.f32 %v2728_v14, %v5660_v39  ;;  %2785 = vst [vmem:[#allocation1] ss:$4 sm:$0xff] %v5992_v28 }
 0xca0   :  { %2786 = vst [vmem:[#allocation1 + $0x1] ss:$4 sm:$0xff] %v5995_v22 }
 0xca1   :  { %2787 = vst [vmem:[#allocation1 + $0x2] ss:$4 sm:$0xff] %v5998_v11  ;;  %v2784_v60 = vld.sshfl [vmem:[#allocation1 + $0x20] sm:$0xff pattern:$0x73625140]  ;;  %v2713_v10 = vpop.f32.mrf.mxu1 }
 0xca2   :  { %2788 = vst [vmem:[#allocation1 + $0x3] ss:$4 sm:$0xff] %v6001_v30  ;;  %v2800_v33 = vsel %vm139_vm0, %v2784_v60, 0.0  ;;  %v2714_v34 = vadd.f32 %v4386_v37, %v2713_v10 }
 0xca3   :  { %2801 = vadd.xlane.f32.xlu0 %v2800_v33 }
 0xca4   :  { %v2729_v49 = vrot.slane %v2714_v34, 2  ;;  %v6009_v0 = vadd.f32 %v2714_v34, %v5674_v52 }
 0xca6   :  { %v6012_v39 = vadd.f32 %v2729_v49, %v5677_v53  ;;  %2789 = vst [vmem:[#allocation1 + $0x20] ss:$4 sm:$0xff] %v6009_v0 }
 0xca8   :  { %2790 = vst [vmem:[#allocation1 + $0x21] ss:$4 sm:$0xff] %v6012_v39 }
 0xca9   :  { %v2791_v41 = vld.sshfl [vmem:[#allocation1] sm:$0xff pattern:$0x73625140] }
 0xcaa   :  { %v2803_v12 = vsel %vm139_vm0, %v2791_v41, 0.0 }
 0xcab   :  { %2804 = vadd.xlane.f32.xlu2 %v2803_v12 }
 0xcaf   :  { %v2792_v18 = vld.sshfl [vmem:[#allocation1 + $0x20] sm:$0xff pattern:$0x73625140] }
 0xcb0   :  { %v2806_v61 = vsel %vm981_vm5, %v2792_v18, 0.0 }
 0xcb1   :  { %2807 = vadd.xlane.f32.xlu1 %v2806_v61 }
 0xcdb   :  { %v2799_v1 = vpop.xlane.xlu1 %2798 }
 0xcdc   :  { %v2809_v35 = vmul.f32 %v2799_v1, %v5112_v24 }
 0xcde   :  { %v2820_v52 = vperm.slane %v2809_v35, %v5114_v50  ;;  %v2824_v53 = vperm.slane %v2809_v35, %v5116_v20  ;;  %v2828_v5 = vperm.slane %v2809_v35, %v5118_v25  ;;  %v2832_v43 = vperm.slane %v2809_v35, %v5120_v23  ;;  %v4315_v35 = vld [vmem:[%s6785_s8 + $0x38] sm:$0xff] }
 0xcdf   :  { %3225 = vmatpush.msrb.mxu2 %v4315_v35 }
 0xce0   :  { %v6023_v63 = vsub.f32 %v2740_v6, %v2820_v52  ;;  %v6025_v40 = vsub.f32 %v2741_v48, %v2824_v53  ;;  %v6027_v4 = vsub.f32 %v2742_v8, %v2828_v5  ;;  %v6029_v42 = vsub.f32 %v2743_v29, %v2832_v43  ;;  %v4314_v52 = vld [vmem:[%s6785_s8 + $0x30] sm:$0xff]  ;;  %v4313_v5 = vld [vmem:[%s6785_s8 + $0x28] sm:$0xff]  ;;  %v4312_v43 = vld [vmem:[%s6785_s8 + $0x20] sm:$0xff] }
 0xce1   :  { %3226 = vmatpush.msrb.mxu2 %v4314_v52 }
 0xce2   :  { %v2901_v56 = vmul.f32 %v6023_v63, %v6023_v63  ;;  %v2902_v45 = vmul.f32 %v6025_v40, %v6025_v40  ;;  %v2903_v19 = vmul.f32 %v6027_v4, %v6027_v4  ;;  %v2904_v36 = vmul.f32 %v6029_v42, %v6029_v42 }
 0xce3   :  { %3227 = vmatpush.msrb.mxu2 %v4313_v5 }
 0xce4   :  { %2929 = vst [vmem:[#allocation1] ss:$4 sm:$0xff] %v2901_v56 }
 0xce5   :  { %2931 = vst [vmem:[#allocation1 + $0x1] ss:$4 sm:$0xff] %v2902_v45  ;;  %3228 = vmatpush.msrb.mxu2 %v4312_v43 }
 0xce6   :  { %2933 = vst [vmem:[#allocation1 + $0x2] ss:$4 sm:$0xff] %v2903_v19 }
 0xce7   :  { %2935 = vst [vmem:[#allocation1 + $0x3] ss:$4 sm:$0xff] %v2904_v36 }
 0xcee   :  { %v2944_v44 = vld.sshfl [vmem:[#allocation1] sm:$0xff pattern:$0x73625140] }
 0xcef   :  { %v2958_v17 = vsel %vm139_vm0, %v2944_v44, 0.0  ;;  %v6122_v44 = vld [vmem:[%s6839_s4 + $0x1] ss:$0 sm:$0xff] }
 0xcf0   :  { %2959 = vadd.xlane.f32.xlu0 %v2958_v17 }
 0xd16   :  { %v2802_v27 = vpop.xlane.xlu0 %2801 }
 0xd17   :  { %v2810_v38 = vmul.f32 %v2802_v27, %v5112_v24  ;;  %v6127_v27 = vld [vmem:[%s6840_s6 + $0x1] ss:$0 sm:$0xff] }
 0xd19   :  { %v2836_v37 = vperm.slane %v2810_v38, %v5114_v50  ;;  %v2840_v13 = vperm.slane %v2810_v38, %v5116_v20  ;;  %v2844_v32 = vperm.slane %v2810_v38, %v5118_v25  ;;  %v2848_v59 = vperm.slane %v2810_v38, %v5120_v23 }
 0xd1b   :  { %v6046_v7 = vsub.f32 %v5976_v54, %v2836_v37  ;;  %v6049_v51 = vsub.f32 %v5979_v2, %v2840_v13  ;;  %v6052_v6 = vsub.f32 %v5982_v46, %v2844_v32  ;;  %v6055_v48 = vsub.f32 %v5985_v57, %v2848_v59 }
 0xd1c   :  { %v6130_v37 = vrot.slane %v6122_v44, 2  ;;  %v6133_v13 = vrot.slane %v6122_v44, 4  ;;  %v6136_v32 = vrot.slane %v6122_v44, 6 }
 0xd1d   :  { %v2905_v8 = vmul.f32 %v6046_v7, %v6046_v7  ;;  %v2906_v29 = vmul.f32 %v6049_v51, %v6049_v51  ;;  %v2907_v47 = vmul.f32 %v6052_v6, %v6052_v6  ;;  %v2908_v9 = vmul.f32 %v6055_v48, %v6055_v48 }
 0xd1e   :  { %v2805_v55 = vpop.xlane.xlu2 %2804 }
 0xd1f   :  { %2937 = vst [vmem:[#allocation1 + $0x20] ss:$4 sm:$0xff] %v2905_v8  ;;  %v2811_v16 = vmul.f32 %v2805_v55, %v5112_v24  ;;  %v6143_v55 = vrot.slane %v6127_v27, 2 }
 0xd20   :  { %2939 = vst [vmem:[#allocation1 + $0x21] ss:$4 sm:$0xff] %v2906_v29 }
 0xd21   :  { %2941 = vst [vmem:[#allocation1 + $0x22] ss:$4 sm:$0xff] %v2907_v47  ;;  %v2852_v31 = vperm.slane %v2811_v16, %v5114_v50  ;;  %v2856_v3 = vperm.slane %v2811_v16, %v5116_v20  ;;  %v2860_v15 = vperm.slane %v2811_v16, %v5118_v25  ;;  %v2864_v54 = vperm.slane %v2811_v16, %v5120_v23 }
 0xd22   :  { %2943 = vst [vmem:[#allocation1 + $0x23] ss:$4 sm:$0xff] %v2908_v9  ;;  %v6146_v16 = vrot.slane %v6127_v27, 4 }
 0xd23   :  { %v6071_v2 = vsub.f32 %v5992_v28, %v2852_v31  ;;  %v6074_v46 = vsub.f32 %v5995_v22, %v2856_v3  ;;  %v6077_v57 = vsub.f32 %v5998_v11, %v2860_v15  ;;  %v6080_v58 = vsub.f32 %v6001_v30, %v2864_v54 }
 0xd24   :  { %v2808_v21 = vpop.xlane.xlu1 %2807 }
 0xd25   :  { %v2909_v26 = vmul.f32 %v6071_v2, %v6071_v2  ;;  %v2910_v62 = vmul.f32 %v6074_v46, %v6074_v46  ;;  %v2911_v14 = vmul.f32 %v6077_v57, %v6077_v57  ;;  %v2912_v28 = vmul.f32 %v6080_v58, %v6080_v58 }
 0xd26   :  { %v2812_v22 = vmul.f32 %v2808_v21, %v5112_v24  ;;  %v6153_v21 = vrot.slane %v6127_v27, 6 }
 0xd27   :  { %2946 = vst [vmem:[#allocation1] ss:$4 sm:$0xff] %v2909_v26 }
 0xd28   :  { %2947 = vst [vmem:[#allocation1 + $0x1] ss:$4 sm:$0xff] %v2910_v62  ;;  %v2868_v11 = vperm.slane %v2812_v22, %v5114_v50  ;;  %v2872_v30 = vperm.slane %v2812_v22, %v5116_v20 }
 0xd29   :  { %2948 = vst [vmem:[#allocation1 + $0x2] ss:$4 sm:$0xff] %v2911_v14  ;;  %v2945_v60 = vld.sshfl [vmem:[#allocation1 + $0x20] sm:$0xff pattern:$0x73625140] }
 0xd2a   :  { %2949 = vst [vmem:[#allocation1 + $0x3] ss:$4 sm:$0xff] %v2912_v28  ;;  %v6094_v10 = vsub.f32 %v6009_v0, %v2868_v11  ;;  %v6097_v33 = vsub.f32 %v6012_v39, %v2872_v30  ;;  %v2961_v34 = vsel %vm139_vm0, %v2945_v60, 0.0 }
 0xd2b   :  { %2962 = vadd.xlane.f32.xlu1 %v2961_v34 }
 0xd2c   :  { %v2913_v49 = vmul.f32 %v6094_v10, %v6094_v10  ;;  %v2914_v41 = vmul.f32 %v6097_v33, %v6097_v33 }
 0xd2e   :  { %2950 = vst [vmem:[#allocation1 + $0x20] ss:$4 sm:$0xff] %v2913_v49 }
 0xd2f   :  { %2951 = vst [vmem:[#allocation1 + $0x21] ss:$4 sm:$0xff] %v2914_v41 }
 0xd31   :  { %v2952_v12 = vld.sshfl [vmem:[#allocation1] sm:$0xff pattern:$0x73625140] }
 0xd32   :  { %v2964_v18 = vsel %vm139_vm0, %v2952_v12, 0.0 }
 0xd33   :  { %2965 = vadd.xlane.f32.xlu2 %v2964_v18 }
 0xd36   :  { %v2953_v0 = vld.sshfl [vmem:[#allocation1 + $0x20] sm:$0xff pattern:$0x73625140] }
 0xd37   :  { %v2967_v61 = vsel %vm981_vm5, %v2953_v0, 0.0 }
 0xd38   :  { %2968 = vadd.xlane.f32.xlu0 %v2967_v61 }
 0xd63   :  { %v2960_v39 = vpop.xlane.xlu0 %2959 }
 0xd64   :  { %v2970_v1 = vmul.f32 %v2960_v39, %v5112_v24 }
 0xd66   :  { %v2974_v53 = vadd.f32 1e-05, %v2970_v1 }
 0xd68   :  { %4478 = vrsqrt.f32 %v2974_v53  ;;  %vm2984_vm2 = vweird.f32 %v2974_v53 }
 0xd6e   :  { %v4479_v56 = vpop.eup %4478 }
 0xd6f   :  { %v2979_v45 = vmul.f32 %v4479_v56, %v2974_v53  ;;  %vm2985_vm1 = vweird.f32 %v4479_v56 }
 0xd70   :  { %vm2986_vm3 = vmor %vm2984_vm2, %vm2985_vm1 }
 0xd71   :  { %v2980_v19 = vmul.f32 %v4479_v56, %v2979_v45 }
 0xd73   :  { %v2981_v36 = vmul.f32 0.5, %v2980_v19 }
 0xd75   :  { %v2982_v17 = vsub.f32 1.5, %v2981_v36 }
 0xd77   :  { %v2983_v38 = vmul.f32 %v4479_v56, %v2982_v17 }
 0xd79   :  { %v2987_v59 = vsel %vm2986_vm3, %v4479_v56, %v2983_v38 }
 0xd7a   :  { %v3025_v8 = vperm.slane %v2987_v59, %v5114_v50  ;;  %v3029_v29 = vperm.slane %v2987_v59, %v5116_v20  ;;  %v3033_v47 = vperm.slane %v2987_v59, %v5118_v25  ;;  %v3037_v9 = vperm.slane %v2987_v59, %v5120_v23 }
 0xd7c   :  { %v3092_v31 = vmul.f32 %v3025_v8, %v6023_v63  ;;  %v3093_v3 = vmul.f32 %v3029_v29, %v6025_v40  ;;  %v3094_v15 = vmul.f32 %v3033_v47, %v6027_v4  ;;  %v3095_v54 = vmul.f32 %v3037_v9, %v6029_v42 }
 0xd7e   :  { %v3117_v26 = vmul.f32 %v6122_v44, %v3092_v31  ;;  %v3118_v62 = vmul.f32 %v6130_v37, %v3093_v3  ;;  %v3119_v14 = vmul.f32 %v6133_v13, %v3094_v15  ;;  %v3120_v28 = vmul.f32 %v6136_v32, %v3095_v54  ;;  %v4328_v54 = vld [vmem:[%s6786_s10 + $0x78] sm:$0xff] }
 0xd7f   :  { %3280 = vmatpush.msrb.mxu3 %v4328_v54 }
 0xd80   :  { %v6160_v22 = vadd.f32 %v6127_v27, %v3117_v26  ;;  %v6163_v63 = vadd.f32 %v6143_v55, %v3118_v62  ;;  %v6166_v40 = vadd.f32 %v6146_v16, %v3119_v14  ;;  %v6169_v4 = vadd.f32 %v6153_v21, %v3120_v28  ;;  %v4327_v26 = vld [vmem:[%s6786_s10 + $0x70] sm:$0xff] }
 0xd81   :  { %3281 = vmatpush.msrb.mxu3 %v4327_v26 }
 0xd82   :  { %3180 = vst [vmem:[#allocation1] ss:$4 sm:$0xff] %v6160_v22 }
 0xd83   :  { %3182 = vst [vmem:[#allocation1 + $0x1] ss:$4 sm:$0xff] %v6163_v63 }
 0xd84   :  { %3184 = vst [vmem:[#allocation1 + $0x2] ss:$4 sm:$0xff] %v6166_v40 }
 0xd85   :  { %3186 = vst [vmem:[#allocation1 + $0x3] ss:$4 sm:$0xff] %v6169_v4 }
 0xd8c   :  { %v3195_v42 = vld.sshfl [vmem:[#allocation1] sm:$0xff pattern:$0x73625140] }
 0xd8d   :  { %4317 = vmatmul.msk.f32.vlgmr.msrb.gmra.mxu2 %vm139_vm0, %v3195_v42 }
 0xd9e   :  { %v2963_v11 = vpop.xlane.xlu1 %2962 }
 0xd9f   :  { %v2971_v30 = vmul.f32 %v2963_v11, %v5112_v24 }
 0xda1   :  { %v2975_v60 = vadd.f32 1e-05, %v2971_v30  ;;  %v4326_v30 = vld [vmem:[%s6786_s10 + $0x68] sm:$0xff] }
 0xda2   :  { %3282 = vmatpush.msrb.mxu3 %v4326_v30  ;;  %v4390_v30 = vld [vmem:[%s6787_s11 + $0x1] ss:$0 sm:$0xff] }
 0xda3   :  { %4480 = vrsqrt.f32 %v2975_v60  ;;  %vm2994_vm13 = vweird.f32 %v2975_v60 }
 0xda6   :  { %v2966_v34 = vpop.xlane.xlu2 %2965 }
 0xda7   :  { %v2972_v49 = vmul.f32 %v2966_v34, %v5112_v24 }
 0xda9   :  { %v4481_v41 = vpop.eup %4480  ;;  %v2976_v12 = vadd.f32 1e-05, %v2972_v49 }
 0xdaa   :  { %v2989_v18 = vmul.f32 %v4481_v41, %v2975_v60  ;;  %vm2995_vm4 = vweird.f32 %v4481_v41 }
 0xdab   :  { %4482 = vrsqrt.f32 %v2976_v12  ;;  %v2969_v0 = vpop.xlane.xlu0 %2968  ;;  %vm2996_vm14 = vmor %vm2994_vm13, %vm2995_vm4  ;;  %vm3004_vm6 = vweird.f32 %v2976_v12 }
 0xdac   :  { %v2990_v61 = vmul.f32 %v4481_v41, %v2989_v18  ;;  %v2973_v39 = vmul.f32 %v2969_v0, %v5112_v24 }
 0xdae   :  { %v2991_v1 = vmul.f32 0.5, %v2990_v61  ;;  %v6179_v35 = vadd.f32 1e-05, %v2973_v39  ;;  %v4325_v61 = vld [vmem:[%s6786_s10 + $0x60] sm:$0xff] }
 0xdaf   :  { %3283 = vmatpush.msrb.mxu3 %v4325_v61 }
 0xdb0   :  { %v2992_v52 = vsub.f32 1.5, %v2991_v1  ;;  %4484 = vrsqrt.f32 %v6179_v35  ;;  %vm3014_vm10 = vweird.f32 %v6179_v35 }
 0xdb1   :  { %v4483_v53 = vpop.eup %4482 }
 0xdb2   :  { %v2993_v5 = vmul.f32 %v4481_v41, %v2992_v52  ;;  %v2999_v43 = vmul.f32 %v4483_v53, %v2976_v12  ;;  %vm3005_vm15 = vweird.f32 %v4483_v53 }
 0xdb3   :  { %vm3006_vm7 = vmor %vm3004_vm6, %vm3005_vm15 }
 0xdb4   :  { %v2997_v56 = vsel %vm2996_vm14, %v4481_v41, %v2993_v5  ;;  %v3000_v45 = vmul.f32 %v4483_v53, %v2999_v43  ;;  %v4324_v43 = vld [vmem:[%s6786_s10 + $0x58] sm:$0xff] }
 0xdb5   :  { %v3041_v19 = vperm.slane %v2997_v56, %v5114_v50  ;;  %v3045_v36 = vperm.slane %v2997_v56, %v5116_v20  ;;  %v3049_v17 = vperm.slane %v2997_v56, %v5118_v25  ;;  %v3053_v38 = vperm.slane %v2997_v56, %v5120_v23  ;;  %3284 = vmatpush.msrb.mxu3 %v4324_v43 }
 0xdb6   :  { %v4485_v59 = vpop.eup %4484  ;;  %v3001_v8 = vmul.f32 0.5, %v3000_v45 }
 0xdb7   :  { %v3096_v29 = vmul.f32 %v3041_v19, %v6046_v7  ;;  %v3097_v47 = vmul.f32 %v3045_v36, %v6049_v51  ;;  %v3098_v9 = vmul.f32 %v3049_v17, %v6052_v6  ;;  %v3099_v31 = vmul.f32 %v3053_v38, %v6055_v48 }
 0xdb8   :  { %v3002_v3 = vsub.f32 1.5, %v3001_v8  ;;  %v3009_v15 = vmul.f32 %v4485_v59, %v6179_v35  ;;  %vm3015_vm8 = vweird.f32 %v4485_v59 }
 0xdb9   :  { %v3121_v7 = vmul.f32 %v6122_v44, %v3096_v29  ;;  %v3122_v51 = vmul.f32 %v6130_v37, %v3097_v47  ;;  %v3123_v6 = vmul.f32 %v6133_v13, %v3098_v9  ;;  %v3124_v48 = vmul.f32 %v6136_v32, %v3099_v31  ;;  %vm3016_vm11 = vmor %vm3014_vm10, %vm3015_vm8 }
 0xdba   :  { %v3003_v62 = vmul.f32 %v4483_v53, %v3002_v3  ;;  %v3010_v14 = vmul.f32 %v4485_v59, %v3009_v15  ;;  %vm3825_vm8 = vcmask 408576   ;;  %vm3835_vm10 = vcmask 404480  }
 0xdbb   :  { %v6202_v28 = vadd.f32 %v6127_v27, %v3121_v7  ;;  %v6205_v42 = vadd.f32 %v6143_v55, %v3122_v51  ;;  %v6208_v11 = vadd.f32 %v6146_v16, %v3123_v6  ;;  %v6215_v60 = vadd.f32 %v6153_v21, %v3124_v48 }
 0xdbc   :  { %v3007_v34 = vsel %vm3006_vm7, %v4483_v53, %v3003_v62  ;;  %v3011_v49 = vmul.f32 0.5, %v3010_v14 }
 0xdbd   :  { %3188 = vst [vmem:[#allocation1 + $0x20] ss:$4 sm:$0xff] %v6202_v28  ;;  %v3057_v41 = vperm.slane %v3007_v34, %v5114_v50  ;;  %v3061_v12 = vperm.slane %v3007_v34, %v5116_v20  ;;  %v3065_v18 = vperm.slane %v3007_v34, %v5118_v25  ;;  %v3069_v0 = vperm.slane %v3007_v34, %v5120_v23 }
 0xdbe   :  { %3190 = vst [vmem:[#allocation1 + $0x21] ss:$4 sm:$0xff] %v6205_v42  ;;  %v3012_v39 = vsub.f32 1.5, %v3011_v49 }
 0xdbf   :  { %3192 = vst [vmem:[#allocation1 + $0x22] ss:$4 sm:$0xff] %v6208_v11  ;;  %v3100_v1 = vmul.f32 %v3057_v41, %v6071_v2  ;;  %v3101_v52 = vmul.f32 %v3061_v12, %v6074_v46  ;;  %v3102_v53 = vmul.f32 %v3065_v18, %v6077_v57  ;;  %v3103_v5 = vmul.f32 %v3069_v0, %v6080_v58 }
 0xdc0   :  { %3194 = vst [vmem:[#allocation1 + $0x23] ss:$4 sm:$0xff] %v6215_v60  ;;  %v3013_v56 = vmul.f32 %v4485_v59, %v3012_v39 }
 0xdc1   :  { %v3125_v45 = vmul.f32 %v6122_v44, %v3100_v1  ;;  %v3126_v2 = vmul.f32 %v6130_v37, %v3101_v52  ;;  %v3127_v46 = vmul.f32 %v6133_v13, %v3102_v53  ;;  %v3128_v57 = vmul.f32 %v6136_v32, %v3103_v5 }
 0xdc2   :  { %v3017_v58 = vsel %vm3016_vm11, %v4485_v59, %v3013_v56  ;;  %vm3945_vm11 = vcmask 326656  }
 0xdc3   :  { %v6242_v19 = vadd.f32 %v6127_v27, %v3125_v45  ;;  %v6245_v36 = vadd.f32 %v6143_v55, %v3126_v2  ;;  %v6248_v35 = vadd.f32 %v6146_v16, %v3127_v46  ;;  %v6251_v17 = vadd.f32 %v6153_v21, %v3128_v57 }
 0xdc4   :  { %v3073_v13 = vperm.slane %v3017_v58, %v5114_v50  ;;  %v3077_v32 = vperm.slane %v3017_v58, %v5116_v20 }
 0xdc5   :  { %3197 = vst [vmem:[#allocation1] ss:$4 sm:$0xff] %v6242_v19 }
 0xdc6   :  { %3198 = vst [vmem:[#allocation1 + $0x1] ss:$4 sm:$0xff] %v6245_v36  ;;  %v3104_v38 = vmul.f32 %v3073_v13, %v6094_v10  ;;  %v3105_v59 = vmul.f32 %v3077_v32, %v6097_v33 }
 0xdc7   :  { %3199 = vst [vmem:[#allocation1 + $0x2] ss:$4 sm:$0xff] %v6248_v35  ;;  %v3196_v8 = vld.sshfl [vmem:[#allocation1 + $0x20] sm:$0xff pattern:$0x73625140] }
 0xdc8   :  { %3200 = vst [vmem:[#allocation1 + $0x3] ss:$4 sm:$0xff] %v6251_v17  ;;  %v3129_v16 = vmul.f32 %v6122_v44, %v3104_v38  ;;  %v3130_v21 = vmul.f32 %v6130_v37, %v3105_v59  ;;  %4318 = vmatmul.msk.f32.gmra.mxu2 %vm139_vm0, %v3196_v8  ;;  %v4323_v44 = vld [vmem:[%s6786_s10 + $0x50] sm:$0xff]  ;;  %v4321_v37 = vld [vmem:[%s6786_s10 + $0x40] sm:$0xff] }
 0xdc9   :  { %3285 = vmatpush.msrb.mxu3 %v4323_v44 }
 0xdca   :  { %v6265_v29 = vadd.f32 %v6127_v27, %v3129_v16  ;;  %v6268_v47 = vadd.f32 %v6143_v55, %v3130_v21  ;;  %v4322_v27 = vld [vmem:[%s6786_s10 + $0x48] sm:$0xff]  ;;  %v4389_v55 = vld [vmem:[%s6784_s9 + $0x1] ss:$0 sm:$0xff] }
 0xdcb   :  { %3286 = vmatpush.msrb.mxu3 %v4322_v27 }
 0xdcc   :  { %3201 = vst [vmem:[#allocation1 + $0x20] ss:$4 sm:$0xff] %v6265_v29 }
 0xdcd   :  { %3202 = vst [vmem:[#allocation1 + $0x21] ss:$4 sm:$0xff] %v6268_v47  ;;  %3287 = vmatpush.msrb.mxu3 %v4321_v37 }
 0xdcf   :  { %v3203_v10 = vld.sshfl [vmem:[#allocation1] sm:$0xff pattern:$0x73625140] }
 0xdd0   :  { %4319 = vmatmul.msk.f32.gmra.mxu2 %vm139_vm0, %v3203_v10 }
 0xdd4   :  { %v3204_v33 = vld.sshfl [vmem:[#allocation1 + $0x20] sm:$0xff pattern:$0x73625140] }
 0xdd8   :  { %4320 = vmatmul.msk.f32.gmra.mxu2 %vm139_vm0, %v3204_v33 }
 0xe10   :  { %v3230_v9 = vpop.f32.mrf.mxu2 }
 0xe11   :  { %v3231_v31 = vadd.f32 %v4389_v55, %v3230_v9 }
 0xe13   :  { %v3242_v3 = vmax.f32 %v3231_v31, 0.0 }
 0xe15   :  { %4330 = vmatmul.msk.f32.vlgmr.msrb.gmra.mxu3 %vm1437_vm9, %v3242_v3 }
 0xe4b   :  { %v3233_v15 = vpop.f32.mrf.mxu2 }
 0xe4c   :  { %v3234_v54 = vadd.f32 %v4389_v55, %v3233_v15 }
 0xe4e   :  { %v3243_v26 = vmax.f32 %v3234_v54, 0.0 }
 0xe50   :  { %4331 = vmatmul.msk.f32.gmra.mxu3 %vm1437_vm9, %v3243_v26 }
 0xe53   :  { %v3236_v7 = vpop.f32.mrf.mxu2 }
 0xe54   :  { %v3237_v51 = vadd.f32 %v4389_v55, %v3236_v7 }
 0xe56   :  { %v3244_v6 = vmax.f32 %v3237_v51, 0.0 }
 0xe58   :  { %4332 = vmatmul.msk.f32.gmra.mxu3 %vm1437_vm9, %v3244_v6 }
 0xe5b   :  { %v3239_v48 = vpop.f32.mrf.mxu2 }
 0xe5c   :  { %v3240_v62 = vadd.f32 %v4389_v55, %v3239_v48 }
 0xe5e   :  { %v3245_v14 = vmax.f32 %v3240_v62, 0.0 }
 0xe60   :  { %4333 = vmatmul.msk.f32.gmra.mxu3 %vm1437_vm9, %v3245_v14 }
 0xe98   :  { %v3289_v34 = vpop.f32.mrf.mxu3 }
 0xe99   :  { %v3290_v49 = vadd.f32 %v4390_v30, %v3289_v34 }
 0xe9b   :  { %v3305_v41 = vrot.slane %v3290_v49, 2  ;;  %v3306_v12 = vrot.slane %v3290_v49, 4  ;;  %v3307_v18 = vrot.slane %v3290_v49, 6  ;;  %v3325_v0 = vadd.f32 %v3290_v49, %v6160_v22 }
 0xe9d   :  { %v3326_v61 = vadd.f32 %v3305_v41, %v6163_v63  ;;  %v3327_v39 = vadd.f32 %v3306_v12, %v6166_v40  ;;  %v3328_v1 = vadd.f32 %v3307_v18, %v6169_v4  ;;  %3353 = vst [vmem:[#allocation1] ss:$4 sm:$0xff] %v3325_v0 }
 0xe9f   :  { %3355 = vst [vmem:[#allocation1 + $0x1] ss:$4 sm:$0xff] %v3326_v61 }
 0xea0   :  { %3357 = vst [vmem:[#allocation1 + $0x2] ss:$4 sm:$0xff] %v3327_v39 }
 0xea1   :  { %3359 = vst [vmem:[#allocation1 + $0x3] ss:$4 sm:$0xff] %v3328_v1 }
 0xea8   :  { %v3368_v52 = vld.sshfl [vmem:[#allocation1] sm:$0xff pattern:$0x73625140] }
 0xea9   :  { %v3382_v53 = vsel %vm139_vm0, %v3368_v52, 0.0 }
 0xeaa   :  { %3383 = vadd.xlane.f32.xlu1 %v3382_v53 }
 0xed3   :  { %v3292_v5 = vpop.f32.mrf.mxu3 }
 0xed4   :  { %v3293_v43 = vadd.f32 %v4390_v30, %v3292_v5 }
 0xed6   :  { %v3308_v56 = vrot.slane %v3293_v43, 2  ;;  %v3309_v45 = vrot.slane %v3293_v43, 4  ;;  %v3310_v2 = vrot.slane %v3293_v43, 6  ;;  %v6299_v22 = vadd.f32 %v3293_v43, %v6202_v28 }
 0xed8   :  { %v6302_v63 = vadd.f32 %v3308_v56, %v6205_v42  ;;  %v6305_v40 = vadd.f32 %v3309_v45, %v6208_v11  ;;  %v6308_v4 = vadd.f32 %v3310_v2, %v6215_v60  ;;  %3361 = vst [vmem:[#allocation1 + $0x20] ss:$4 sm:$0xff] %v6299_v22 }
 0xeda   :  { %3363 = vst [vmem:[#allocation1 + $0x21] ss:$4 sm:$0xff] %v6302_v63 }
 0xedb   :  { %3365 = vst [vmem:[#allocation1 + $0x22] ss:$4 sm:$0xff] %v6305_v40  ;;  %v3295_v46 = vpop.f32.mrf.mxu3 }
 0xedc   :  { %3367 = vst [vmem:[#allocation1 + $0x23] ss:$4 sm:$0xff] %v6308_v4  ;;  %v3296_v28 = vadd.f32 %v4390_v30, %v3295_v46 }
 0xede   :  { %v3311_v57 = vrot.slane %v3296_v28, 2  ;;  %v3312_v58 = vrot.slane %v3296_v28, 4  ;;  %v3313_v42 = vrot.slane %v3296_v28, 6  ;;  %v6315_v13 = vadd.f32 %v3296_v28, %v6242_v19 }
 0xee0   :  { %v6318_v11 = vadd.f32 %v3311_v57, %v6245_v36  ;;  %v6321_v60 = vadd.f32 %v3312_v58, %v6248_v35  ;;  %v6324_v32 = vadd.f32 %v3313_v42, %v6251_v17  ;;  %3370 = vst [vmem:[#allocation1] ss:$4 sm:$0xff] %v6315_v13 }
 0xee2   :  { %3371 = vst [vmem:[#allocation1 + $0x1] ss:$4 sm:$0xff] %v6318_v11 }
 0xee3   :  { %3372 = vst [vmem:[#allocation1 + $0x2] ss:$4 sm:$0xff] %v6321_v60  ;;  %v3369_v38 = vld.sshfl [vmem:[#allocation1 + $0x20] sm:$0xff pattern:$0x73625140]  ;;  %v3298_v59 = vpop.f32.mrf.mxu3 }
 0xee4   :  { %3373 = vst [vmem:[#allocation1 + $0x3] ss:$4 sm:$0xff] %v6324_v32  ;;  %v3385_v19 = vsel %vm139_vm0, %v3369_v38, 0.0  ;;  %v3299_v36 = vadd.f32 %v4390_v30, %v3298_v59 }
 0xee5   :  { %3386 = vadd.xlane.f32.xlu2 %v3385_v19 }
 0xee6   :  { %v3314_v8 = vrot.slane %v3299_v36, 2  ;;  %v6332_v35 = vadd.f32 %v3299_v36, %v6265_v29 }
 0xee8   :  { %v6335_v17 = vadd.f32 %v3314_v8, %v6268_v47  ;;  %3374 = vst [vmem:[#allocation1 + $0x20] ss:$4 sm:$0xff] %v6332_v35 }
 0xeea   :  { %3375 = vst [vmem:[#allocation1 + $0x21] ss:$4 sm:$0xff] %v6335_v17 }
 0xeeb   :  { %v3376_v16 = vld.sshfl [vmem:[#allocation1] sm:$0xff pattern:$0x73625140] }
 0xeec   :  { %v3388_v21 = vsel %vm139_vm0, %v3376_v16, 0.0 }
 0xeed   :  { %3389 = vadd.xlane.f32.xlu0 %v3388_v21 }
 0xef1   :  { %v3377_v10 = vld.sshfl [vmem:[#allocation1 + $0x20] sm:$0xff pattern:$0x73625140] }
 0xef2   :  { %v3391_v33 = vsel %vm981_vm5, %v3377_v10, 0.0 }
 0xef3   :  { %3392 = vadd.xlane.f32.xlu1 %v3391_v33 }
 0xf1d   :  { %v3384_v44 = vpop.xlane.xlu1 %3383 }
 0xf1e   :  { %v3394_v27 = vmul.f32 %v3384_v44, %v5112_v24 }
 0xf20   :  { %v3405_v29 = vperm.slane %v3394_v27, %v5114_v50  ;;  %v3409_v47 = vperm.slane %v3394_v27, %v5116_v20  ;;  %v3413_v37 = vperm.slane %v3394_v27, %v5118_v25  ;;  %v3417_v55 = vperm.slane %v3394_v27, %v5120_v23  ;;  %v3744_v27 = vld [vmem:[%s6790_s14 + $0x18] sm:$0xff] }
 0xf21   :  { %3808 = vmatpush.msra.mxu0 %v3744_v27 }
 0xf22   :  { %v6346_v9 = vsub.f32 %v3325_v0, %v3405_v29  ;;  %v6348_v31 = vsub.f32 %v3326_v61, %v3409_v47  ;;  %v6350_v3 = vsub.f32 %v3327_v39, %v3413_v37  ;;  %v6352_v15 = vsub.f32 %v3328_v1, %v3417_v55  ;;  %v3743_v29 = vld [vmem:[%s6790_s14 + $0x10] sm:$0xff]  ;;  %v3742_v37 = vld [vmem:[%s6790_s14 + $0x8] sm:$0xff]  ;;  %v3741_v55 = vld [vmem:[%s6790_s14] sm:$0xff] }
 0xf23   :  { %3809 = vmatpush.msra.mxu0 %v3743_v29 }
 0xf24   :  { %v3486_v54 = vmul.f32 %v6346_v9, %v6346_v9  ;;  %v3487_v26 = vmul.f32 %v6348_v31, %v6348_v31  ;;  %v3488_v7 = vmul.f32 %v6350_v3, %v6350_v3  ;;  %v3489_v51 = vmul.f32 %v6352_v15, %v6352_v15 }
 0xf25   :  { %3810 = vmatpush.msra.mxu0 %v3742_v37 }
 0xf26   :  { %3514 = vst [vmem:[#allocation1] ss:$4 sm:$0xff] %v3486_v54 }
 0xf27   :  { %3516 = vst [vmem:[#allocation1 + $0x1] ss:$4 sm:$0xff] %v3487_v26  ;;  %3811 = vmatpush.msra.mxu0 %v3741_v55 }
 0xf28   :  { %3518 = vst [vmem:[#allocation1 + $0x2] ss:$4 sm:$0xff] %v3488_v7 }
 0xf29   :  { %3520 = vst [vmem:[#allocation1 + $0x3] ss:$4 sm:$0xff] %v3489_v51 }
 0xf30   :  { %v3529_v6 = vld.sshfl [vmem:[#allocation1] sm:$0xff pattern:$0x73625140] }
 0xf31   :  { %v3543_v48 = vsel %vm139_vm0, %v3529_v6, 0.0  ;;  %v6445_v6 = vld [vmem:[%s6788_s12 + $0x1] ss:$0 sm:$0xff] }
 0xf32   :  { %3544 = vadd.xlane.f32.xlu2 %v3543_v48 }
 0xf58   :  { %v3387_v62 = vpop.xlane.xlu2 %3386 }
 0xf59   :  { %v3395_v14 = vmul.f32 %v3387_v62, %v5112_v24  ;;  %v6450_v62 = vld [vmem:[%s6789_s13 + $0x1] ss:$0 sm:$0xff] }
 0xf5b   :  { %v3421_v30 = vperm.slane %v3395_v14, %v5114_v50  ;;  %v3425_v34 = vperm.slane %v3395_v14, %v5116_v20  ;;  %v3429_v49 = vperm.slane %v3395_v14, %v5118_v25  ;;  %v3433_v41 = vperm.slane %v3395_v14, %v5120_v23 }
 0xf5d   :  { %v6369_v12 = vsub.f32 %v6299_v22, %v3421_v30  ;;  %v6372_v18 = vsub.f32 %v6302_v63, %v3425_v34  ;;  %v6375_v0 = vsub.f32 %v6305_v40, %v3429_v49  ;;  %v6378_v61 = vsub.f32 %v6308_v4, %v3433_v41 }
 0xf5e   :  { %v6453_v30 = vrot.slane %v6445_v6, 2  ;;  %v6456_v34 = vrot.slane %v6445_v6, 4  ;;  %v6459_v49 = vrot.slane %v6445_v6, 6 }
 0xf5f   :  { %v3490_v39 = vmul.f32 %v6369_v12, %v6369_v12  ;;  %v3491_v1 = vmul.f32 %v6372_v18, %v6372_v18  ;;  %v3492_v52 = vmul.f32 %v6375_v0, %v6375_v0  ;;  %v3493_v53 = vmul.f32 %v6378_v61, %v6378_v61 }
 0xf60   :  { %v3390_v5 = vpop.xlane.xlu0 %3389 }
 0xf61   :  { %3522 = vst [vmem:[#allocation1 + $0x20] ss:$4 sm:$0xff] %v3490_v39  ;;  %v3396_v43 = vmul.f32 %v3390_v5, %v5112_v24  ;;  %v6466_v5 = vrot.slane %v6450_v62, 2 }
 0xf62   :  { %3524 = vst [vmem:[#allocation1 + $0x21] ss:$4 sm:$0xff] %v3491_v1 }
 0xf63   :  { %3526 = vst [vmem:[#allocation1 + $0x22] ss:$4 sm:$0xff] %v3492_v52  ;;  %v3437_v56 = vperm.slane %v3396_v43, %v5114_v50  ;;  %v3441_v45 = vperm.slane %v3396_v43, %v5116_v20  ;;  %v3445_v2 = vperm.slane %v3396_v43, %v5118_v25  ;;  %v3449_v22 = vperm.slane %v3396_v43, %v5120_v23 }
 0xf64   :  { %3528 = vst [vmem:[#allocation1 + $0x23] ss:$4 sm:$0xff] %v3493_v53  ;;  %v6469_v43 = vrot.slane %v6450_v62, 4 }
 0xf65   :  { %v6394_v63 = vsub.f32 %v6315_v13, %v3437_v56  ;;  %v6397_v40 = vsub.f32 %v6318_v11, %v3441_v45  ;;  %v6400_v4 = vsub.f32 %v6321_v60, %v3445_v2  ;;  %v6403_v46 = vsub.f32 %v6324_v32, %v3449_v22 }
 0xf66   :  { %v3393_v28 = vpop.xlane.xlu1 %3392 }
 0xf67   :  { %v3494_v57 = vmul.f32 %v6394_v63, %v6394_v63  ;;  %v3495_v58 = vmul.f32 %v6397_v40, %v6397_v40  ;;  %v3496_v42 = vmul.f32 %v6400_v4, %v6400_v4  ;;  %v3497_v13 = vmul.f32 %v6403_v46, %v6403_v46 }
 0xf68   :  { %v3397_v11 = vmul.f32 %v3393_v28, %v5112_v24  ;;  %v6476_v28 = vrot.slane %v6450_v62, 6 }
 0xf69   :  { %3531 = vst [vmem:[#allocation1] ss:$4 sm:$0xff] %v3494_v57 }
 0xf6a   :  { %3532 = vst [vmem:[#allocation1 + $0x1] ss:$4 sm:$0xff] %v3495_v58  ;;  %v3453_v60 = vperm.slane %v3397_v11, %v5114_v50  ;;  %v3457_v32 = vperm.slane %v3397_v11, %v5116_v20 }
 0xf6b   :  { %3533 = vst [vmem:[#allocation1 + $0x2] ss:$4 sm:$0xff] %v3496_v42  ;;  %v3530_v38 = vld.sshfl [vmem:[#allocation1 + $0x20] sm:$0xff pattern:$0x73625140] }
 0xf6c   :  { %3534 = vst [vmem:[#allocation1 + $0x3] ss:$4 sm:$0xff] %v3497_v13  ;;  %v6417_v59 = vsub.f32 %v6332_v35, %v3453_v60  ;;  %v6420_v19 = vsub.f32 %v6335_v17, %v3457_v32  ;;  %v3546_v36 = vsel %vm139_vm0, %v3530_v38, 0.0 }
 0xf6d   :  { %3547 = vadd.xlane.f32.xlu0 %v3546_v36 }
 0xf6e   :  { %v3498_v8 = vmul.f32 %v6417_v59, %v6417_v59  ;;  %v3499_v16 = vmul.f32 %v6420_v19, %v6420_v19 }
 0xf70   :  { %3535 = vst [vmem:[#allocation1 + $0x20] ss:$4 sm:$0xff] %v3498_v8 }
 0xf71   :  { %3536 = vst [vmem:[#allocation1 + $0x21] ss:$4 sm:$0xff] %v3499_v16 }
 0xf73   :  { %v3537_v21 = vld.sshfl [vmem:[#allocation1] sm:$0xff pattern:$0x73625140] }
 0xf74   :  { %v3549_v10 = vsel %vm139_vm0, %v3537_v21, 0.0 }
 0xf75   :  { %3550 = vadd.xlane.f32.xlu1 %v3549_v10 }
 0xf78   :  { %v3538_v35 = vld.sshfl [vmem:[#allocation1 + $0x20] sm:$0xff pattern:$0x73625140] }
 0xf79   :  { %v3552_v33 = vsel %vm981_vm5, %v3538_v35, 0.0 }
 0xf7a   :  { %3553 = vadd.xlane.f32.xlu2 %v3552_v33 }
 0xfa5   :  { %v3545_v17 = vpop.xlane.xlu2 %3544 }
 0xfa6   :  { %v3555_v44 = vmul.f32 %v3545_v17, %v5112_v24 }
 0xfa8   :  { %v3559_v47 = vadd.f32 1e-05, %v3555_v44 }
 0xfaa   :  { %4486 = vrsqrt.f32 %v3559_v47  ;;  %vm3569_vm9 = vweird.f32 %v3559_v47 }
 0xfb0   :  { %v4487_v54 = vpop.eup %4486 }
 0xfb1   :  { %v3564_v26 = vmul.f32 %v4487_v54, %v3559_v47  ;;  %vm3570_vm5 = vweird.f32 %v4487_v54 }
 0xfb2   :  { %vm3571_vm12 = vmor %vm3569_vm9, %vm3570_vm5  ;;  %vm3955_vm5 = vcmask 322560  }
 0xfb3   :  { %v3565_v7 = vmul.f32 %v4487_v54, %v3564_v26 }
 0xfb5   :  { %v3566_v51 = vmul.f32 0.5, %v3565_v7 }
 0xfb7   :  { %v3567_v48 = vsub.f32 1.5, %v3566_v51 }
 0xfb9   :  { %v3568_v14 = vmul.f32 %v4487_v54, %v3567_v48 }
 0xfbb   :  { %v3572_v41 = vsel %vm3571_vm12, %v4487_v54, %v3568_v14  ;;  %v3882_v54 = vld [vmem:[%s6792_s16 + $0x18] sm:$0xff] }
 0xfbc   :  { %v3610_v39 = vperm.slane %v3572_v41, %v5114_v50  ;;  %v3614_v1 = vperm.slane %v3572_v41, %v5116_v20  ;;  %v3618_v52 = vperm.slane %v3572_v41, %v5118_v25  ;;  %v3622_v53 = vperm.slane %v3572_v41, %v5120_v23  ;;  %3928 = vmatpush.msra.mxu1 %v3882_v54 }
 0xfbe   :  { %v3677_v56 = vmul.f32 %v3610_v39, %v6346_v9  ;;  %v3678_v45 = vmul.f32 %v3614_v1, %v6348_v31  ;;  %v3679_v2 = vmul.f32 %v3618_v52, %v6350_v3  ;;  %v3680_v22 = vmul.f32 %v3622_v53, %v6352_v15  ;;  %v3880_v39 = vld [vmem:[%s6792_s16 + $0x8] sm:$0xff] }
 0xfc0   :  { %v3702_v57 = vmul.f32 %v6445_v6, %v3677_v56  ;;  %v3703_v58 = vmul.f32 %v6453_v30, %v3678_v45  ;;  %v3704_v42 = vmul.f32 %v6456_v34, %v3679_v2  ;;  %v3705_v13 = vmul.f32 %v6459_v49, %v3680_v22  ;;  %v3879_v22 = vld [vmem:[%s6792_s16] sm:$0xff] }
 0xfc2   :  { %v6483_v11 = vadd.f32 %v6450_v62, %v3702_v57  ;;  %v6486_v9 = vadd.f32 %v6466_v5, %v3703_v58  ;;  %v6489_v31 = vadd.f32 %v6469_v43, %v3704_v42  ;;  %v6492_v3 = vadd.f32 %v6476_v28, %v3705_v13 }
 0xfc4   :  { %3763 = vst [vmem:[#allocation1] ss:$4 sm:$0xff] %v6483_v11 }
 0xfc5   :  { %3765 = vst [vmem:[#allocation1 + $0x1] ss:$4 sm:$0xff] %v6486_v9 }
 0xfc6   :  { %3767 = vst [vmem:[#allocation1 + $0x2] ss:$4 sm:$0xff] %v6489_v31 }
 0xfc7   :  { %3769 = vst [vmem:[#allocation1 + $0x3] ss:$4 sm:$0xff] %v6492_v3 }
 0xfce   :  { %v3778_v15 = vld.sshfl [vmem:[#allocation1] sm:$0xff pattern:$0x73625140] }
 0xfcf   :  { %4336 = vmatmul.msk.f32.vlgmr.msra.gmra.mxu0 %vm139_vm0, %v3778_v15 }
 0xfe0   :  { %v3548_v60 = vpop.xlane.xlu0 %3547 }
 0xfe1   :  { %v3556_v32 = vmul.f32 %v3548_v60, %v5112_v24 }
 0xfe3   :  { %v3560_v38 = vadd.f32 1e-05, %v3556_v32 }
 0xfe5   :  { %4488 = vrsqrt.f32 %v3560_v38  ;;  %vm3579_vm2 = vweird.f32 %v3560_v38 }
 0xfe8   :  { %v3551_v36 = vpop.xlane.xlu1 %3550 }
 0xfe9   :  { %v3557_v8 = vmul.f32 %v3551_v36, %v5112_v24 }
 0xfeb   :  { %v4489_v16 = vpop.eup %4488  ;;  %v3561_v21 = vadd.f32 1e-05, %v3557_v8 }
 0xfec   :  { %v3574_v10 = vmul.f32 %v4489_v16, %v3560_v38  ;;  %vm3580_vm1 = vweird.f32 %v4489_v16 }
 0xfed   :  { %4490 = vrsqrt.f32 %v3561_v21  ;;  %v3554_v35 = vpop.xlane.xlu2 %3553  ;;  %vm3581_vm3 = vmor %vm3579_vm2, %vm3580_vm1  ;;  %vm3589_vm13 = vweird.f32 %v3561_v21 }
 0xfee   :  { %v3575_v33 = vmul.f32 %v4489_v16, %v3574_v10  ;;  %v3558_v17 = vmul.f32 %v3554_v35, %v5112_v24  ;;  %v3881_v24 = vld [vmem:[%s6792_s16 + $0x10] sm:$0xff] }
 0xfef   :  { %3929 = vmatpush.msra.mxu1 %v3881_v24 }
 0xff0   :  { %v3576_v44 = vmul.f32 0.5, %v3575_v33  ;;  %v6502_v27 = vadd.f32 1e-05, %v3558_v17 }
 0xff1   :  { %3930 = vmatpush.msra.mxu1 %v3880_v39 }
 0xff2   :  { %v3577_v29 = vsub.f32 1.5, %v3576_v44  ;;  %4492 = vrsqrt.f32 %v6502_v27  ;;  %vm3599_vm6 = vweird.f32 %v6502_v27 }
 0xff3   :  { %v4491_v47 = vpop.eup %4490  ;;  %3931 = vmatpush.msra.mxu1 %v3879_v22 }
 0xff4   :  { %v3578_v37 = vmul.f32 %v4489_v16, %v3577_v29  ;;  %v3584_v55 = vmul.f32 %v4491_v47, %v3561_v21  ;;  %vm3590_vm4 = vweird.f32 %v4491_v47 }
 0xff5   :  { %vm3591_vm14 = vmor %vm3589_vm13, %vm3590_vm4 }
 0xff6   :  { %v3582_v26 = vsel %vm3581_vm3, %v4489_v16, %v3578_v37  ;;  %v3585_v7 = vmul.f32 %v4491_v47, %v3584_v55 }
 0xff7   :  { %v3626_v51 = vperm.slane %v3582_v26, %v5114_v50  ;;  %v3630_v48 = vperm.slane %v3582_v26, %v5116_v20  ;;  %v3634_v14 = vperm.slane %v3582_v26, %v5118_v25  ;;  %v3638_v41 = vperm.slane %v3582_v26, %v5120_v23 }
 0xff8   :  { %v4493_v1 = vpop.eup %4492  ;;  %v3586_v52 = vmul.f32 0.5, %v3585_v7 }
 0xff9   :  { %v3681_v53 = vmul.f32 %v3626_v51, %v6369_v12  ;;  %v3682_v56 = vmul.f32 %v3630_v48, %v6372_v18  ;;  %v3683_v45 = vmul.f32 %v3634_v14, %v6375_v0  ;;  %v3684_v2 = vmul.f32 %v3638_v41, %v6378_v61 }
 0xffa   :  { %v3587_v57 = vsub.f32 1.5, %v3586_v52  ;;  %v3594_v58 = vmul.f32 %v4493_v1, %v6502_v27  ;;  %vm3600_vm15 = vweird.f32 %v4493_v1  ;;  %v4002_v27 = vld [vmem:[%s6793_s17 + $0x18] sm:$0xff] }
 0xffb   :  { %v3706_v42 = vmul.f32 %v6445_v6, %v3681_v53  ;;  %v3707_v13 = vmul.f32 %v6453_v30, %v3682_v56  ;;  %v3708_v12 = vmul.f32 %v6456_v34, %v3683_v45  ;;  %v3709_v18 = vmul.f32 %v6459_v49, %v3684_v2  ;;  %vm3601_vm7 = vmor %vm3599_vm6, %vm3600_vm15  ;;  %4052 = vmatpush.msra.mxu2 %v4002_v27 }
 0xffc   :  { %v3588_v0 = vmul.f32 %v4491_v47, %v3587_v57  ;;  %v3595_v61 = vmul.f32 %v4493_v1, %v3594_v58 }
 0xffd   :  { %v6531_v15 = vadd.f32 %v6450_v62, %v3706_v42  ;;  %v6534_v60 = vadd.f32 %v6466_v5, %v3707_v13  ;;  %v6537_v32 = vadd.f32 %v6469_v43, %v3708_v12  ;;  %v6540_v38 = vadd.f32 %v6476_v28, %v3709_v18 }
 0xffe   :  { %v3592_v36 = vsel %vm3591_vm14, %v4491_v47, %v3588_v0  ;;  %v3596_v8 = vmul.f32 0.5, %v3595_v61 }
 0xfff   :  { %3771 = vst [vmem:[#allocation1 + $0x20] ss:$4 sm:$0xff] %v6531_v15  ;;  %v3642_v16 = vperm.slane %v3592_v36, %v5114_v50  ;;  %v3646_v21 = vperm.slane %v3592_v36, %v5116_v20  ;;  %v3650_v10 = vperm.slane %v3592_v36, %v5118_v25  ;;  %v3654_v35 = vperm.slane %v3592_v36, %v5120_v23 }
0x1000   :  { %3773 = vst [vmem:[#allocation1 + $0x21] ss:$4 sm:$0xff] %v6534_v60  ;;  %v3597_v33 = vsub.f32 1.5, %v3596_v8  ;;  %v4147_v8 = vld [vmem:[%s6795_s19 + $0x10] sm:$0xff] }
0x1001   :  { %3775 = vst [vmem:[#allocation1 + $0x22] ss:$4 sm:$0xff] %v6537_v32  ;;  %v3685_v17 = vmul.f32 %v3642_v16, %v6394_v63  ;;  %v3686_v44 = vmul.f32 %v3646_v21, %v6397_v40  ;;  %v3687_v29 = vmul.f32 %v3650_v10, %v6400_v4  ;;  %v3688_v47 = vmul.f32 %v3654_v35, %v6403_v46  ;;  %v4394_v16 = vld [vmem:[%s6794_s18] ss:$0 sm:$0xff]  ;;  %v4146_v10 = vld [vmem:[%s6795_s19 + $0x8] sm:$0xff] }
0x1002   :  { %3777 = vst [vmem:[#allocation1 + $0x23] ss:$4 sm:$0xff] %v6540_v38  ;;  %v3598_v37 = vmul.f32 %v4493_v1, %v3597_v33  ;;  %v4145_v33 = vld [vmem:[%s6795_s19] sm:$0xff] }
0x1003   :  { %v3710_v25 = vmul.f32 %v6445_v6, %v3685_v17  ;;  %v3711_v23 = vmul.f32 %v6453_v30, %v3686_v44  ;;  %v3712_v55 = vmul.f32 %v6456_v34, %v3687_v29  ;;  %v3713_v54 = vmul.f32 %v6459_v49, %v3688_v47  ;;  %v4001_v34 = vld [vmem:[%s6793_s17 + $0x10] sm:$0xff] }
0x1004   :  { %v3602_v63 = vsel %vm3601_vm7, %v4493_v1, %v3598_v37  ;;  %4053 = vmatpush.msra.mxu2 %v4001_v34 }
0x1005   :  { %v6560_v40 = vadd.f32 %v6450_v62, %v3710_v25  ;;  %v6563_v4 = vadd.f32 %v6466_v5, %v3711_v23  ;;  %v6566_v46 = vadd.f32 %v6469_v43, %v3712_v55  ;;  %v6575_v49 = vadd.f32 %v6476_v28, %v3713_v54  ;;  %v4000_v43 = vld [vmem:[%s6793_s17 + $0x8] sm:$0xff] }
0x1006   :  { %v3658_v24 = vperm.slane %v3602_v63, %v5114_v50  ;;  %v3662_v26 = vperm.slane %v3602_v63, %v5116_v20  ;;  %v3999_v50 = vld [vmem:[%s6793_s17] sm:$0xff]  ;;  %4054 = vmatpush.msra.mxu2 %v4000_v43 }
0x1007   :  { %3780 = vst [vmem:[#allocation1] ss:$4 sm:$0xff] %v6560_v40 }
0x1008   :  { %3781 = vst [vmem:[#allocation1 + $0x1] ss:$4 sm:$0xff] %v6563_v4  ;;  %v3689_v7 = vmul.f32 %v3658_v24, %v6417_v59  ;;  %v3690_v51 = vmul.f32 %v3662_v26, %v6420_v19  ;;  %4055 = vmatpush.msra.mxu2 %v3999_v50 }
0x1009   :  { %3782 = vst [vmem:[#allocation1 + $0x2] ss:$4 sm:$0xff] %v6566_v46  ;;  %v3779_v28 = vld.sshfl [vmem:[#allocation1 + $0x20] sm:$0xff pattern:$0x73625140] }
0x100a   :  { %3783 = vst [vmem:[#allocation1 + $0x3] ss:$4 sm:$0xff] %v6575_v49  ;;  %v3714_v20 = vmul.f32 %v6445_v6, %v3689_v7  ;;  %v3715_v48 = vmul.f32 %v6453_v30, %v3690_v51  ;;  %4337 = vmatmul.msk.f32.gmra.mxu0 %vm139_vm0, %v3779_v28 }
0x100c   :  { %v3739_v59 = vadd.f32 %v6450_v62, %v3714_v20  ;;  %v3740_v19 = vadd.f32 %v6466_v5, %v3715_v48 }
0x100e   :  { %3784 = vst [vmem:[#allocation1 + $0x20] ss:$4 sm:$0xff] %v3739_v59 }
0x100f   :  { %3785 = vst [vmem:[#allocation1 + $0x21] ss:$4 sm:$0xff] %v3740_v19 }
0x1011   :  { %v3786_v14 = vld.sshfl [vmem:[#allocation1] sm:$0xff pattern:$0x73625140] }
0x1012   :  { %4338 = vmatmul.msk.f32.gmra.mxu0 %vm139_vm0, %v3786_v14  ;;  %3883 = vst [vmem:[#allocation1] ss:$4 sm:$0xff] %v6483_v11 }
0x1013   :  { %3885 = vst [vmem:[#allocation1 + $0x1] ss:$4 sm:$0xff] %v6486_v9 }
0x1014   :  { %3887 = vst [vmem:[#allocation1 + $0x2] ss:$4 sm:$0xff] %v6489_v31 }
0x1015   :  { %3889 = vst [vmem:[#allocation1 + $0x3] ss:$4 sm:$0xff] %v6492_v3 }
0x1016   :  { %v3787_v6 = vld.sshfl [vmem:[#allocation1 + $0x20] sm:$0xff pattern:$0x73625140] }
0x1017   :  { %3891 = vst [vmem:[#allocation1 + $0x20] ss:$4 sm:$0xff] %v6531_v15 }
0x1018   :  { %3893 = vst [vmem:[#allocation1 + $0x21] ss:$4 sm:$0xff] %v6534_v60 }
0x1019   :  { %3895 = vst [vmem:[#allocation1 + $0x22] ss:$4 sm:$0xff] %v6537_v32 }
0x101a   :  { %4339 = vmatmul.msk.f32.gmra.mxu0 %vm139_vm0, %v3787_v6  ;;  %3897 = vst [vmem:[#allocation1 + $0x23] ss:$4 sm:$0xff] %v6540_v38 }
0x101c   :  { %v3898_v62 = vld.sshfl [vmem:[#allocation1] sm:$0xff pattern:$0x73625140] }
0x101d   :  { %4340 = vmatmul.msk.f32.vlgmr.msra.gmra.mxu1 %vm139_vm0, %v3898_v62  ;;  %3900 = vst [vmem:[#allocation1] ss:$4 sm:$0xff] %v6560_v40 }
0x101e   :  { %3901 = vst [vmem:[#allocation1 + $0x1] ss:$4 sm:$0xff] %v6563_v4 }
0x101f   :  { %3902 = vst [vmem:[#allocation1 + $0x2] ss:$4 sm:$0xff] %v6566_v46 }
0x1020   :  { %3903 = vst [vmem:[#allocation1 + $0x3] ss:$4 sm:$0xff] %v6575_v49 }
0x1021   :  { %v3899_v30 = vld.sshfl [vmem:[#allocation1 + $0x20] sm:$0xff pattern:$0x73625140] }
0x1022   :  { %3904 = vst [vmem:[#allocation1 + $0x20] ss:$4 sm:$0xff] %v3739_v59 }
0x1023   :  { %3905 = vst [vmem:[#allocation1 + $0x21] ss:$4 sm:$0xff] %v3740_v19 }
0x1025   :  { %4341 = vmatmul.msk.f32.gmra.mxu1 %vm139_vm0, %v3899_v30 }
0x1027   :  { %v3906_v5 = vld.sshfl [vmem:[#allocation1] sm:$0xff pattern:$0x73625140] }
0x1028   :  { %4007 = vst [vmem:[#allocation1] ss:$4 sm:$0xff] %v6483_v11 }
0x1029   :  { %4009 = vst [vmem:[#allocation1 + $0x1] ss:$4 sm:$0xff] %v6486_v9 }
0x102a   :  { %4011 = vst [vmem:[#allocation1 + $0x2] ss:$4 sm:$0xff] %v6489_v31  ;;  %v3907_v41 = vld.sshfl [vmem:[#allocation1 + $0x20] sm:$0xff pattern:$0x73625140] }
0x102b   :  { %4013 = vst [vmem:[#allocation1 + $0x3] ss:$4 sm:$0xff] %v6492_v3  ;;  %v4393_v31 = vld [vmem:[%s6791_s15] ss:$0 sm:$0xff]  ;;  %s6847_s15 = sld [smem:[#allocation12_spill]] }
0x102c   :  { %4015 = vst [vmem:[#allocation1 + $0x20] ss:$4 sm:$0xff] %v6531_v15 }
0x102d   :  { %4342 = vmatmul.msk.f32.gmra.mxu1 %vm139_vm0, %v3906_v5  ;;  %4017 = vst [vmem:[#allocation1 + $0x21] ss:$4 sm:$0xff] %v6534_v60 }
0x102e   :  { %4019 = vst [vmem:[#allocation1 + $0x22] ss:$4 sm:$0xff] %v6537_v32 }
0x102f   :  { %4021 = vst [vmem:[#allocation1 + $0x23] ss:$4 sm:$0xff] %v6540_v38  ;;  %v4148_v38 = vld [vmem:[%s6795_s19 + $0x18] sm:$0xff] }
0x1030   :  { %4177 = vmatpush.msra.mxu3 %v4148_v38 }
0x1032   :  { %v4022_v39 = vld.sshfl [vmem:[#allocation1] sm:$0xff pattern:$0x73625140]  ;;  %4178 = vmatpush.msra.mxu3 %v4147_v8 }
0x1033   :  { %4344 = vmatmul.msk.f32.vlgmr.msra.gmra.mxu2 %vm139_vm0, %v4022_v39  ;;  %4024 = vst [vmem:[#allocation1] ss:$4 sm:$0xff] %v6560_v40 }
0x1034   :  { %4025 = vst [vmem:[#allocation1 + $0x1] ss:$4 sm:$0xff] %v6563_v4  ;;  %4179 = vmatpush.msra.mxu3 %v4146_v10 }
0x1035   :  { %4026 = vst [vmem:[#allocation1 + $0x2] ss:$4 sm:$0xff] %v6566_v46  ;;  %4343 = vmatmul.msk.f32.gmra.mxu1 %vm139_vm0, %v3907_v41 }
0x1036   :  { %4027 = vst [vmem:[#allocation1 + $0x3] ss:$4 sm:$0xff] %v6575_v49  ;;  %v4023_v11 = vld.sshfl [vmem:[#allocation1 + $0x20] sm:$0xff pattern:$0x73625140]  ;;  %4180 = vmatpush.msra.mxu3 %v4145_v33 }
0x1037   :  { %4028 = vst [vmem:[#allocation1 + $0x20] ss:$4 sm:$0xff] %v3739_v59 }
0x1038   :  { %4029 = vst [vmem:[#allocation1 + $0x21] ss:$4 sm:$0xff] %v3740_v19 }
0x103b   :  { %4345 = vmatmul.msk.f32.gmra.mxu2 %vm139_vm0, %v4023_v11 }
0x103d   :  { %v4030_v9 = vld.sshfl [vmem:[#allocation1] sm:$0xff pattern:$0x73625140] }
0x103f   :  { %v4031_v3 = vld.sshfl [vmem:[#allocation1 + $0x20] sm:$0xff pattern:$0x73625140] }
0x1043   :  { %4346 = vmatmul.msk.f32.gmra.mxu2 %vm139_vm0, %v4030_v9 }
0x104b   :  { %4347 = vmatmul.msk.f32.gmra.mxu2 %vm139_vm0, %v4031_v3 }
0x104c   :  { %v3813_v1 = vpop.f32.mrf.mxu0 }
0x104d   :  { %v3814_v52 = vadd.f32 %v4393_v31, %v3813_v1 }
0x104f   :  { %v3826_v53 = vsel %vm3825_vm8, %v3814_v52, -inf }
0x1050   :  { %3827 = vmax.xlane.f32.xlu0 %v3826_v53 }
0x1087   :  { %v3816_v56 = vpop.f32.mrf.mxu0 }
0x1088   :  { %v6634_v45 = vadd.f32 %v4393_v31, %v3816_v56 }
0x108a   :  { %v3829_v2 = vsel %vm3825_vm8, %v6634_v45, -inf }
0x108b   :  { %3830 = vmax.xlane.f32.xlu1 %v3829_v2 }
0x108f   :  { %v3819_v22 = vpop.f32.mrf.mxu0 }
0x1090   :  { %v6638_v57 = vadd.f32 %v4393_v31, %v3819_v22 }
0x1092   :  { %v3832_v58 = vsel %vm3825_vm8, %v6638_v57, -inf }
0x1093   :  { %3833 = vmax.xlane.f32.xlu2 %v3832_v58 }
0x1097   :  { %v3822_v42 = vpop.f32.mrf.mxu0 }
0x1098   :  { %v6642_v13 = vadd.f32 %v4393_v31, %v3822_v42 }
0x109a   :  { %v6644_v12 = vpop.f32.mrf.mxu1  ;;  %v3836_v18 = vsel %vm3835_vm10, %v6642_v13, -inf }
0x109b   :  { %v3946_v0 = vsel %vm3945_vm11, %v6644_v12, -inf  ;;  %3837 = vmax.xlane.f32.xlu0 %v3836_v18 }
0x109c   :  { %3947 = vmax.xlane.f32.xlu1 %v3946_v0 }
0x10a2   :  { %v6650_v61 = vpop.f32.mrf.mxu1 }
0x10a3   :  { %v3949_v15 = vsel %vm3945_vm11, %v6650_v61, -inf }
0x10a4   :  { %3950 = vmax.xlane.f32.xlu2 %v3949_v15 }
0x10aa   :  { %v6654_v60 = vpop.f32.mrf.mxu1 }
0x10ab   :  { %v3952_v32 = vsel %vm3945_vm11, %v6654_v60, -inf }
0x10ac   :  { %3953 = vmax.xlane.f32.xlu0 %v3952_v32 }
0x10b2   :  { %v6661_v36 = vpop.f32.mrf.mxu1 }
0x10b3   :  { %v3956_v21 = vsel %vm3955_vm5, %v6661_v36, -inf }
0x10b4   :  { %3957 = vmax.xlane.f32.xlu1 %v3956_v21 }
0x10b6   :  { %v4057_v35 = vpop.f32.mrf.mxu2 }
0x10b7   :  { %v4058_v17 = vadd.f32 %v4394_v16, %v4057_v35 }
0x10b9   :  { %v4348_v44 = vmul.f32 -1.442695, %v4058_v17 }
0x10bb   :  { %4494 = vpow2.f32 %v4348_v44 }
0x10be   :  { %v4060_v29 = vpop.f32.mrf.mxu2 }
0x10bf   :  { %v4061_v47 = vadd.f32 %v4394_v16, %v4060_v29 }
0x10c1   :  { %v4495_v37 = vpop.eup %4494  ;;  %v4349_v25 = vmul.f32 -1.442695, %v4061_v47 }
0x10c2   :  { %v4081_v23 = vadd.f32 1.0, %v4495_v37 }
0x10c3   :  { %4496 = vpow2.f32 %v4349_v25  ;;  %v3828_v55 = vpop.xlane.xlu0 %3827 }
0x10c4   :  { %4498 = vrcp.f32 %v4081_v23  ;;  %v6677_v54 = vsub.f32 %v3814_v52, %v3828_v55  ;;  %v4094_v51 = vand.u32 2147483647, %v4081_v23  ;;  %v4096_v28 = vand.u32 2147483648, %v4081_v23 }
0x10c5   :  { %vm4090_vm12 = vweird.f32 %v4081_v23 }
0x10c6   :  { %v3843_v63 = vmul.f32 1.442695, %v6677_v54  ;;  %v4063_v40 = vpop.f32.mrf.mxu2  ;;  %v4097_v30 = vor.u32 1.1754944e-38, %v4096_v28  ;;  %vm4095_vm2 = vcmp.eq.f32.partialorder %v4094_v51, 8.507059e+37 }
0x10c7   :  { %v4064_v4 = vadd.f32 %v4394_v16, %v4063_v40 }
0x10c8   :  { %4500 = vpow2.f32 %v3843_v63 }
0x10c9   :  { %v4497_v46 = vpop.eup %4496  ;;  %v4350_v27 = vmul.f32 -1.442695, %v4064_v4 }
0x10ca   :  { %v4499_v34 = vpop.eup %4498  ;;  %v4082_v49 = vadd.f32 1.0, %v4497_v46 }
0x10cb   :  { %v4086_v24 = vmul.f32 %v4499_v34, %v4081_v23  ;;  %4502 = vpow2.f32 %v4350_v27  ;;  %vm4091_vm9 = vweird.f32 %v4499_v34 }
0x10cc   :  { %4504 = vrcp.f32 %v4082_v49  ;;  %vm4092_vm1 = vmor %vm4090_vm12, %vm4091_vm9  ;;  %v4111_v9 = vand.u32 2147483648, %v4082_v49  ;;  %v4109_v3 = vand.u32 2147483647, %v4082_v49  ;;  %vm4105_vm4 = vweird.f32 %v4082_v49 }
0x10cd   :  { %v4087_v26 = vsub.f32 1.0, %v4086_v24 }
0x10ce   :  { %v4501_v43 = vpop.eup %4500  ;;  %v4066_v7 = vpop.f32.mrf.mxu2  ;;  %v4112_v2 = vor.u32 1.1754944e-38, %v4111_v9  ;;  %vm4110_vm14 = vcmp.eq.f32.partialorder %v4109_v3, 8.507059e+37 }
0x10cf   :  { %v4067_v50 = vadd.f32 %v4394_v16, %v4066_v7  ;;  %v3851_v20 = vsel %vm3825_vm8, %v4501_v43, 0.0  ;;  %v4088_v48 = vmul.f32 %v4499_v34, %v4087_v26 }
0x10d0   :  { %3852 = vadd.xlane.f32.xlu2 %v3851_v20 }
0x10d1   :  { %v4503_v59 = vpop.eup %4502  ;;  %v4351_v19 = vmul.f32 -1.442695, %v4067_v50  ;;  %v4089_v14 = vadd.f32 %v4499_v34, %v4088_v48 }
0x10d2   :  { %v4505_v6 = vpop.eup %4504  ;;  %v4083_v62 = vadd.f32 1.0, %v4503_v59 }
0x10d3   :  { %4506 = vpow2.f32 %v4351_v19  ;;  %v4093_v5 = vsel %vm4092_vm1, %v4499_v34, %v4089_v14  ;;  %v4101_v41 = vmul.f32 %v4505_v6, %v4082_v49  ;;  %vm4106_vm3 = vweird.f32 %v4505_v6 }
0x10d4   :  { %4508 = vrcp.f32 %v4083_v62  ;;  %v4098_v39 = vsel %vm4095_vm2, %v4097_v30, %v4093_v5  ;;  %vm4107_vm13 = vmor %vm4105_vm4, %vm4106_vm3  ;;  %v4126_v0 = vand.u32 2147483648, %v4083_v62  ;;  %v4124_v32 = vand.u32 2147483647, %v4083_v62 }
0x10d5   :  { %4352 = vmatmul.msk.f32.vlgmr.msra.gmra.mxu3 %vm139_vm0, %v4098_v39  ;;  %v4102_v11 = vsub.f32 1.0, %v4101_v41  ;;  %vm4120_vm6 = vweird.f32 %v4083_v62  ;;  %vm4198_vm4 = vcmask 3072  }
0x10d6   :  { %v4127_v16 = vor.u32 1.1754944e-38, %v4126_v0  ;;  %vm4125_vm9 = vcmp.eq.f32.partialorder %v4124_v32, 8.507059e+37 }
0x10d7   :  { %v4103_v31 = vmul.f32 %v4505_v6, %v4102_v11 }
0x10d9   :  { %v4507_v1 = vpop.eup %4506  ;;  %v4104_v52 = vadd.f32 %v4505_v6, %v4103_v31 }
0x10da   :  { %v4509_v53 = vpop.eup %4508  ;;  %v4084_v56 = vadd.f32 1.0, %v4507_v1 }
0x10db   :  { %v4108_v22 = vsel %vm4107_vm13, %v4505_v6, %v4104_v52  ;;  %v4116_v58 = vmul.f32 %v4509_v53, %v4083_v62  ;;  %vm4121_vm15 = vweird.f32 %v4509_v53 }
0x10dc   :  { %4510 = vrcp.f32 %v4084_v56  ;;  %v4113_v42 = vsel %vm4110_vm14, %v4112_v2, %v4108_v22  ;;  %vm4122_vm7 = vmor %vm4120_vm6, %vm4121_vm15  ;;  %v4141_v17 = vand.u32 2147483648, %v4084_v56  ;;  %v4139_v29 = vand.u32 2147483647, %v4084_v56 }
0x10dd   :  { %4353 = vmatmul.msk.f32.gmra.mxu3 %vm139_vm0, %v4113_v42  ;;  %v4117_v18 = vsub.f32 1.0, %v4116_v58  ;;  %vm4135_vm1 = vweird.f32 %v4084_v56 }
0x10de   :  { %v4142_v37 = vor.u32 1.1754944e-38, %v4141_v17  ;;  %vm4140_vm3 = vcmp.eq.f32.partialorder %v4139_v29, 8.507059e+37 }
0x10df   :  { %v4118_v15 = vmul.f32 %v4509_v53, %v4117_v18 }
0x10e1   :  { %v4119_v38 = vadd.f32 %v4509_v53, %v4118_v15 }
0x10e2   :  { %v4511_v8 = vpop.eup %4510 }
0x10e3   :  { %v4123_v21 = vsel %vm4122_vm7, %v4509_v53, %v4119_v38  ;;  %v4131_v10 = vmul.f32 %v4511_v8, %v4084_v56  ;;  %vm4136_vm12 = vweird.f32 %v4511_v8 }
0x10e4   :  { %v4128_v35 = vsel %vm4125_vm9, %v4127_v16, %v4123_v21  ;;  %vm4137_vm2 = vmor %vm4135_vm1, %vm4136_vm12 }
0x10e5   :  { %4354 = vmatmul.msk.f32.gmra.mxu3 %vm139_vm0, %v4128_v35  ;;  %v4132_v33 = vsub.f32 1.0, %v4131_v10 }
0x10e7   :  { %v4133_v44 = vmul.f32 %v4511_v8, %v4132_v33 }
0x10e9   :  { %v4134_v47 = vadd.f32 %v4511_v8, %v4133_v44 }
0x10eb   :  { %v4138_v25 = vsel %vm4137_vm2, %v4511_v8, %v4134_v47 }
0x10ec   :  { %v4143_v23 = vsel %vm4140_vm3, %v4142_v37, %v4138_v25 }
0x10ed   :  { %4355 = vmatmul.msk.f32.gmra.mxu3 %vm139_vm0, %v4143_v23  ;;  %vm4194_vm0 = vcmask 7168  }
0x10fe   :  { %v3831_v55 = vpop.xlane.xlu1 %3830 }
0x10ff   :  { %v6686_v63 = vsub.f32 %v6634_v45, %v3831_v55 }
0x1101   :  { %v3845_v40 = vmul.f32 1.442695, %v6686_v63 }
0x1103   :  { %4512 = vpow2.f32 %v3845_v40 }
0x1106   :  { %v3834_v4 = vpop.xlane.xlu2 %3833 }
0x1107   :  { %v6690_v46 = vsub.f32 %v6638_v57, %v3834_v4 }
0x1109   :  { %v4513_v27 = vpop.eup %4512  ;;  %v3847_v34 = vmul.f32 1.442695, %v6690_v46 }
0x110a   :  { %v3854_v49 = vsel %vm3825_vm8, %v4513_v27, 0.0 }
0x110b   :  { %4514 = vpow2.f32 %v3847_v34  ;;  %3855 = vadd.xlane.f32.xlu0 %v3854_v49 }
0x110e   :  { %v3838_v24 = vpop.xlane.xlu0 %3837 }
0x110f   :  { %v3948_v26 = vpop.xlane.xlu1 %3947  ;;  %v6695_v43 = vsub.f32 %v6642_v13, %v3838_v24 }
0x1110   :  { %v6698_v45 = vsub.f32 %v6644_v12, %v3948_v26 }
0x1111   :  { %v4515_v7 = vpop.eup %4514  ;;  %v3849_v51 = vmul.f32 1.442695, %v6695_v43 }
0x1112   :  { %v3963_v57 = vmul.f32 1.442695, %v6698_v45  ;;  %v3857_v28 = vsel %vm3825_vm8, %v4515_v7, 0.0 }
0x1113   :  { %4516 = vpow2.f32 %v3849_v51  ;;  %3858 = vadd.xlane.f32.xlu1 %v3857_v28 }
0x1114   :  { %4518 = vpow2.f32 %v3963_v57 }
0x1117   :  { %v3951_v50 = vpop.xlane.xlu2 %3950 }
0x1118   :  { %v6704_v20 = vsub.f32 %v6650_v61, %v3951_v50 }
0x1119   :  { %v4517_v48 = vpop.eup %4516 }
0x111a   :  { %v4519_v13 = vpop.eup %4518  ;;  %v3965_v59 = vmul.f32 1.442695, %v6704_v20  ;;  %v3860_v12 = vsel %vm3835_vm10, %v4517_v48, 0.0 }
0x111b   :  { %v3971_v19 = vsel %vm3945_vm11, %v4519_v13, 0.0  ;;  %3861 = vadd.xlane.f32.xlu2 %v3860_v12 }
0x111c   :  { %4520 = vpow2.f32 %v3965_v59  ;;  %3972 = vadd.xlane.f32.xlu0 %v3971_v19 }
0x111f   :  { %v3954_v14 = vpop.xlane.xlu0 %3953 }
0x1120   :  { %v6710_v6 = vsub.f32 %v6654_v60, %v3954_v14  ;;  %v30_v60 = vstv %s6796_s20 }
0x1121   :  { %31 = vst [vmem:[#allocation2] sm:$0x1] %v30_v60 }
0x1122   :  { %v4521_v62 = vpop.eup %4520  ;;  %v3967_v30 = vmul.f32 1.442695, %v6710_v6 }
0x1123   :  { %v3974_v61 = vsel %vm3945_vm11, %v4521_v62, 0.0 }
0x1124   :  { %4522 = vpow2.f32 %v3967_v30  ;;  %3975 = vadd.xlane.f32.xlu1 %v3974_v61 }
0x1127   :  { %v3958_v5 = vpop.xlane.xlu1 %3957 }
0x1128   :  { %v6715_v41 = vsub.f32 %v6661_v36, %v3958_v5  ;;  %v4395_v56 = vld [vmem:[#allocation2] ss:$0 sm:$0xff] }
0x112a   :  { %v4523_v39 = vpop.eup %4522  ;;  %v3969_v11 = vmul.f32 1.442695, %v6715_v41 }
0x112b   :  { %v3977_v9 = vsel %vm3945_vm11, %v4523_v39, 0.0 }
0x112c   :  { %4524 = vpow2.f32 %v3969_v11  ;;  %3978 = vadd.xlane.f32.xlu2 %v3977_v9 }
0x1132   :  { %v4525_v31 = vpop.eup %4524 }
0x1133   :  { %v3980_v3 = vsel %vm3955_vm5, %v4525_v31, 0.0 }
0x1134   :  { %3981 = vadd.xlane.f32.xlu0 %v3980_v3 }
0x1143   :  { %v3853_v1 = vpop.xlane.xlu2 %3852 }
0x1144   :  { %4526 = vlog2.f32 %v3853_v1 }
0x114a   :  { %v4527_v36 = vpop.eup %4526 }
0x114b   :  { %v3864_v52 = vmul.f32 0.6931472, %v4527_v36 }
0x114d   :  { %v3871_v53 = vsub.f32 %v6677_v54, %v3864_v52 }
0x114f   :  { %3875 = vst.msk [vmem:[%s6797_s21] sm:$0xff] %vm3825_vm8, %v3871_v53 }
0x1158   :  { %v4182_v2 = vpop.f32.mrf.mxu3 }
0x1159   :  { %v4183_v22 = vadd.f32 %v4395_v56, %v4182_v2 }
0x115b   :  { %4195 = vst.msk [vmem:[%s6798_s23] sm:$0xff] %vm4194_vm0, %v4183_v22 }
0x1160   :  { %v4185_v58 = vpop.f32.mrf.mxu3 }
0x1161   :  { %v4186_v42 = vadd.f32 %v4395_v56, %v4185_v58 }
0x1163   :  { %4196 = vst.msk [vmem:[%s6798_s23 + $0x8] sm:$0xff] %vm4194_vm0, %v4186_v42 }
0x1168   :  { %v4188_v54 = vpop.f32.mrf.mxu3 }
0x1169   :  { %v4189_v18 = vadd.f32 %v4395_v56, %v4188_v54 }
0x116b   :  { %4197 = vst.msk [vmem:[%s6798_s23 + $0x10] sm:$0xff] %vm4194_vm0, %v4189_v18 }
0x1170   :  { %v4191_v0 = vpop.f32.mrf.mxu3 }
0x1171   :  { %v4192_v15 = vadd.f32 %v4395_v56, %v4191_v0 }
0x1173   :  { %4199 = vst.msk [vmem:[%s6798_s23 + $0x18] sm:$0xf] %vm4198_vm4, %v4192_v15 }
0x117e   :  { %v3856_v32 = vpop.xlane.xlu0 %3855 }
0x117f   :  { %4528 = vlog2.f32 %v3856_v32 }
0x1185   :  { %v4529_v38 = vpop.eup %4528 }
0x1186   :  { %v3866_v8 = vmul.f32 0.6931472, %v4529_v38  ;;  %v3859_v16 = vpop.xlane.xlu1 %3858 }
0x1187   :  { %4530 = vlog2.f32 %v3859_v16 }
0x1188   :  { %v3872_v21 = vsub.f32 %v6686_v63, %v3866_v8 }
0x118a   :  { %3876 = vst.msk [vmem:[%s6797_s21 + $0x8] sm:$0xff] %vm3825_vm8, %v3872_v21 }
0x118d   :  { %v4531_v10 = vpop.eup %4530 }
0x118e   :  { %v3868_v35 = vmul.f32 0.6931472, %v4531_v10  ;;  %v3862_v33 = vpop.xlane.xlu2 %3861 }
0x118f   :  { %v3973_v17 = vpop.xlane.xlu0 %3972  ;;  %4532 = vlog2.f32 %v3862_v33 }
0x1190   :  { %v3873_v44 = vsub.f32 %v6690_v46, %v3868_v35  ;;  %4534 = vlog2.f32 %v3973_v17 }
0x1192   :  { %3877 = vst.msk [vmem:[%s6797_s21 + $0x10] sm:$0xff] %vm3825_vm8, %v3873_v44 }
0x1195   :  { %v4533_v29 = vpop.eup %4532 }
0x1196   :  { %v4535_v47 = vpop.eup %4534  ;;  %v3870_v37 = vmul.f32 0.6931472, %v4533_v29 }
0x1197   :  { %v3984_v25 = vmul.f32 0.6931472, %v4535_v47  ;;  %v3976_v23 = vpop.xlane.xlu1 %3975 }
0x1198   :  { %v3874_v55 = vsub.f32 %v6695_v43, %v3870_v37  ;;  %4536 = vlog2.f32 %v3976_v23 }
0x1199   :  { %v3991_v63 = vsub.f32 %v6698_v45, %v3984_v25 }
0x119a   :  { %3878 = vst.msk [vmem:[%s6797_s21 + $0x18] sm:$0xf] %vm3835_vm10, %v3874_v55 }
0x119b   :  { %3995 = vst.msk [vmem:[%s6847_s15] sm:$0xff] %vm3945_vm11, %v3991_v63 }
0x119e   :  { %v4537_v40 = vpop.eup %4536 }
0x119f   :  { %v3986_v4 = vmul.f32 0.6931472, %v4537_v40  ;;  %v3979_v46 = vpop.xlane.xlu2 %3978 }
0x11a0   :  { %4538 = vlog2.f32 %v3979_v46 }
0x11a1   :  { %v3992_v27 = vsub.f32 %v6704_v20, %v3986_v4 }
0x11a3   :  { %3996 = vst.msk [vmem:[%s6847_s15 + $0x8] sm:$0xff] %vm3945_vm11, %v3992_v27 }
0x11a6   :  { %v4539_v34 = vpop.eup %4538 }
0x11a7   :  { %v3988_v49 = vmul.f32 0.6931472, %v4539_v34  ;;  %v3982_v24 = vpop.xlane.xlu0 %3981 }
0x11a8   :  { %4540 = vlog2.f32 %v3982_v24 }
0x11a9   :  { %v3993_v26 = vsub.f32 %v6710_v6, %v3988_v49 }
0x11ab   :  { %3997 = vst.msk [vmem:[%s6847_s15 + $0x10] sm:$0xff] %vm3945_vm11, %v3993_v26 }
0x11ae   :  { %v4541_v43 = vpop.eup %4540 }
0x11af   :  { %v3990_v45 = vmul.f32 0.6931472, %v4541_v43 }
0x11b1   :  { %v3994_v7 = vsub.f32 %v6715_v41, %v3990_v45 }
0x11b3   :  { %3998 = vst.msk [vmem:[%s6847_s15 + $0x18] sm:$0xf] %vm3955_vm5, %v3994_v7 }

</bundles_post_ra>
